<compile_context>
chip_gen: v7x
topology: tpu7x:2x2x1
jax: 0.10.0
libtpu: 0.0.40
codegen_flags: <defaults>
</compile_context>

<pallas_src>
import functools

import jax
import jax.numpy as jnp
import numpy as np
from jax.experimental import pallas as pl
from jax.experimental.pallas import tpu as pltpu


# ----------------------------------------------------------------------------
# Fused kernel
# ----------------------------------------------------------------------------
def _fused_lexicon_mha_kernel(
        q_ref, k_ref, v_ref, kl_ref, vl_ref,
        wq_ref, bq_ref, wk_ref, bk_ref, wv_ref, bv_ref,
        wkl_ref, bkl_ref, wvl_ref, bvl_ref,
        wo_ref, bo_ref, g_ref, beta_ref,
        out_ref, attn_c_ref, attn_l_ref, res_ref,
        kh_s, vh_s, klh_s, vlh_s,
        *, num_head, d_k, d_kl, alpha, eps):
    f32 = jnp.float32
    bf16 = jnp.bfloat16
    H = num_head
    qi = pl.program_id(1)

    def proj(x, w_ref, b_ref):
        # bf16 MXU operands, f32 accumulation, f32 bias add.
        y = jnp.dot(x.astype(bf16), w_ref[...], preferred_element_type=f32)
        return y + b_ref[...]

    def split_heads(y, dh):
        # (L, H*dh) -> (H, L, dh) via static lane slices (Mosaic-safe relayout).
        return jnp.stack([y[:, h * dh:(h + 1) * dh] for h in range(H)], axis=0)

    # ---- K/V/KL/VL projections + head split: once per batch, not per q-tile.
    @pl.when(qi == 0)
    def _fill_kv_scratch():
        kh_s[...] = split_heads(proj(k_ref[0], wk_ref, bk_ref).astype(bf16), d_k)
        vh_s[...] = split_heads(proj(v_ref[0], wv_ref, bv_ref).astype(bf16), d_k)
        klh_s[...] = split_heads(
            proj(kl_ref[0], wkl_ref, bkl_ref).astype(bf16), d_kl)
        vlh_s[...] = split_heads(
            proj(vl_ref[0], wvl_ref, bvl_ref).astype(bf16), d_kl)

    # ---- per q-tile work ----------------------------------------------------
    x_q = q_ref[0]                              # (TQ, d_x), also the skip input
    Q = proj(x_q, wq_ref, bq_ref)               # 1/sqrt(d_k) pre-folded into wq/bq
    Qh = split_heads(Q.astype(bf16), d_k)       # (H, TQ, d_k) bf16

    def softmax_last(s):                        # exact normalize (f32)
        m = jnp.max(s, axis=-1, keepdims=True)
        e = jnp.exp(s - m)
        return e / jnp.sum(e, axis=-1, keepdims=True)

    # TODO(synk): pad_mask / pad_mask_l / context_mask not implemented;
    #             dropout = identity (eval semantics).
    sc = jnp.einsum('hqd,hkd->hqk', Qh, kh_s[...],
                    preferred_element_type=f32)                 # (H, TQ, Lk)
    a_c = softmax_last(sc)
    sl = jnp.einsum('hqd,hkd->hqk', Qh, klh_s[...],
                    preferred_element_type=f32)                 # (H, TQ, Lkl)
    a_l = softmax_last(sl)

    o_c = jnp.einsum('hqk,hkd->hqd', a_c.astype(bf16), vh_s[...],
                     preferred_element_type=f32)                # (H, TQ, d_k)
    o_l = jnp.einsum('hqk,hkd->hqd', a_l.astype(bf16), vlh_s[...],
                     preferred_element_type=f32)                # (H, TQ, d_kl)

    blend = alpha * o_c + (1.0 - alpha) * o_l                   # f32
    merged = jnp.concatenate([blend[h] for h in range(H)], axis=-1)  # (TQ, H*d_k)

    # Output projection + skip (dropout identity) + LayerNorm, f32 epilogue.
    y = jnp.dot(merged.astype(bf16), wo_ref[...],
                preferred_element_type=f32) + bo_ref[...]
    y = y + x_q.astype(f32)
    mean = jnp.mean(y, axis=-1, keepdims=True)
    var = jnp.mean(jnp.square(y - mean), axis=-1, keepdims=True)
    y_hat = (y - mean) * jax.lax.rsqrt(var + eps)
    out_ref[0] = (y_hat * g_ref[...] + beta_ref[...]).astype(out_ref.dtype)

    # Attention maps directly in final (B, H, Lq, L) layout, f32 (module parity).
    attn_c_ref[0] = a_c.astype(attn_c_ref.dtype)
    attn_l_ref[0] = a_l.astype(attn_l_ref.dtype)

    # Cross-head residual (context maps only):
    #   sum_{m!=n} |A_m*A_n| == (sum_h A_h)^2 - sum_h A_h^2     (A >= 0)
    s1 = jnp.sum(a_c, axis=0)                                   # (TQ, Lk)
    s2 = jnp.sum(a_c * a_c, axis=0)                             # (TQ, Lk)
    part = jnp.sum(s1 * s1 - s2, axis=(0, 1), keepdims=True)    # (1, 1)
    part = jnp.maximum(part, 0.0)

    @pl.when(qi == 0)
    def _init_res():
        res_ref[...] = jnp.zeros_like(res_ref)
    res_ref[...] = res_ref[...] + part.reshape(1, 1, 1)


# ----------------------------------------------------------------------------
# VMEM-aware tiling helpers
# ----------------------------------------------------------------------------
def _vmem_caps():
    try:
        cap = int(pltpu.get_tpu_info().vmem_capacity_bytes)
    except Exception:
        cap = 64 << 20            # conservative (v7x per-TC VMEM)
    return int(cap * 0.6), int(cap * 0.85)     # (tile budget, scoped limit)


def _estimate_vmem_bytes(tq, lk, lkl, d_x, h, dk, dkl):
    """Rough per-step VMEM footprint (padded, double-buffered where relevant)."""
    f32, bf16 = 4, 2
    pad = lambda n, m: ((n + m - 1) // m) * m
    dx_p = pad(d_x, 128)
    lk_p, lkl_p = pad(lk, 128), pad(lkl, 128)
    tq_p = pad(tq, 8)
    inputs = 2 * (tq_p * dx_p + 2 * pad(lk, 8) * dx_p + 2 * pad(lkl, 8) * dx_p) * f32
    weights = (3 * d_x * pad(h * dk, 128) + 2 * d_x * pad(h * dkl, 128)
               + h * dk * dx_p) * bf16 + 8 * dx_p * f32
    scratch = 2 * (h * pad(lk, 8) * pad(dk, 128)
                   + h * pad(lkl, 8) * pad(dkl, 128)) * bf16
    outputs = 2 * (tq_p * dx_p + h * tq_p * lk_p + h * tq_p * lkl_p) * f32
    live = 8 * h * tq_p * max(lk_p, lkl_p, 128) * f32
    return inputs + weights + scratch + outputs + live


def _pick_q_tile(lq, est_fn, budget):
    cands = {t for t in range(8, min(lq, 512) + 1, 8) if lq % t == 0}
    if lq <= 512:
        cands.add(lq)
    if not cands:
        return lq
    fitting = [t for t in sorted(cands) if est_fn(t) <= budget]
    return max(fitting) if fitting else min(cands)


# ----------------------------------------------------------------------------
# Wrapper
# ----------------------------------------------------------------------------
def lexicon_mha_forward(params, q, k, v, kl, vl, *, num_head, d_k, d_kl,
                        alpha=0.5):
    assert d_k == d_kl, "alpha-blend of context/lexicon outputs needs d_k == d_kl"
    B, Lq, d_x = q.shape
    Lk = k.shape[1]
    assert v.shape[1] == Lk
    Lkl = kl.shape[1]
    assert vl.shape[1] == Lkl
    H = num_head

    budget, vmem_limit = _vmem_caps()
    est = lambda t: _estimate_vmem_bytes(t, Lk, Lkl, d_x, H, d_k, d_kl)
    TQ = _pick_q_tile(Lq, est, budget)
    NQ = Lq // TQ

    # One-time parameter transforms (outside the kernel): fold the softmax
    # scale into Wq/bq and cast matmul weights to bf16.
    bf16 = jnp.bfloat16
    scale = 1.0 / float(np.sqrt(d_k))
    wq = (params["wq_w"] * scale).astype(bf16)
    bq = (params["wq_b"] * scale).astype(jnp.float32)
    wk = params["wk_w"].astype(bf16)
    bk = params["wk_b"]
    wv = params["wv_w"].astype(bf16)
    bv = params["wv_b"]
    wkl = params["wkl_w"].astype(bf16)
    bkl = params["wkl_b"]
    wvl = params["wvl_w"].astype(bf16)
    bvl = params["wvl_b"]
    wo = params["wo_w"].astype(bf16)
    bo = params["wo_b"]
    g = params["ln_g"]
    beta = params["ln_b"]

    kern = functools.partial(
        _fused_lexicon_mha_kernel,
        num_head=H, d_k=d_k, d_kl=d_kl, alpha=float(alpha), eps=1e-5)

    const2 = lambda b, qi: (0, 0)

    def build_in_specs(single_buffer_weights):
        def wspec(shape):
            if single_buffer_weights:
                return pl.BlockSpec(shape, const2, pipeline_mode=pl.Buffered(1))
            return pl.BlockSpec(shape, const2)
        return [
            pl.BlockSpec((1, TQ, d_x), lambda b, qi: (b, qi, 0)),   # q (also X)
            pl.BlockSpec((1, Lk, d_x), lambda b, qi: (b, 0, 0)),    # k
            pl.BlockSpec((1, Lk, d_x), lambda b, qi: (b, 0, 0)),    # v
            pl.BlockSpec((1, Lkl, d_x), lambda b, qi: (b, 0, 0)),   # kl
            pl.BlockSpec((1, Lkl, d_x), lambda b, qi: (b, 0, 0)),   # vl
            wspec((d_x, H * d_k)), wspec((1, H * d_k)),             # wq, bq
            wspec((d_x, H * d_k)), wspec((1, H * d_k)),             # wk, bk
            wspec((d_x, H * d_k)), wspec((1, H * d_k)),             # wv, bv
            wspec((d_x, H * d_kl)), wspec((1, H * d_kl)),           # wkl, bkl
            wspec((d_x, H * d_kl)), wspec((1, H * d_kl)),           # wvl, bvl
            wspec((H * d_k, d_x)), wspec((1, d_x)),                 # wo, bo
            wspec((1, d_x)), wspec((1, d_x)),                       # ln g, beta
        ]

    out_shapes = (
        jax.ShapeDtypeStruct((B, Lq, d_x), q.dtype),
        jax.ShapeDtypeStruct((B, H, Lq, Lk), jnp.float32),
        jax.ShapeDtypeStruct((B, H, Lq, Lkl), jnp.float32),
        jax.ShapeDtypeStruct((B, 1, 1), jnp.float32),
    )
    out_specs = (
        pl.BlockSpec((1, TQ, d_x), lambda b, qi: (b, qi, 0)),
        pl.BlockSpec((1, H, TQ, Lk), lambda b, qi: (b, 0, qi, 0)),
        pl.BlockSpec((1, H, TQ, Lkl), lambda b, qi: (b, 0, qi, 0)),
        pl.BlockSpec((1, 1, 1), lambda b, qi: (b, 0, 0)),           # resident acc
    )
    scratch_shapes = [
        pltpu.VMEM((H, Lk, d_k), bf16),     # Kh
        pltpu.VMEM((H, Lk, d_k), bf16),     # Vh
        pltpu.VMEM((H, Lkl, d_kl), bf16),   # KLh
        pltpu.VMEM((H, Lkl, d_kl), bf16),   # VLh
    ]
    cparams = pltpu.CompilerParams(
        dimension_semantics=("parallel", "arbitrary"),
        vmem_limit_bytes=vmem_limit)

    def run(single_buffer_weights):
        fn = pl.pallas_call(
            kern,
            out_shape=out_shapes,
            grid=(B, NQ),
            in_specs=build_in_specs(single_buffer_weights),
            out_specs=out_specs,
            scratch_shapes=scratch_shapes,
            compiler_params=cparams)
        return fn(q, k, v, kl, vl,
                  wq, bq, wk, bk, wv, bv, wkl, bkl, wvl, bvl,
                  wo, bo, g, beta)

    try:
        out, attn_c, attn_l, res = run(True)
    except Exception:
        # Fallback: drop the single-buffered-weights hint if this Pallas
        # build rejects pipeline_mode=pl.Buffered(1).
        out, attn_c, attn_l, res = run(False)

    residual = jnp.sum(res) / Lq / H / H / 2.0
    return out, attn_c, attn_l, residual


# ----------------------------------------------------------------------------
# Parameters (deterministic xavier-normal weights, zero biases)
# ----------------------------------------------------------------------------
def init_params(key, num_head, d_x, d_k, d_kl):
    def xavier(kk, fan_in, fan_out):
        std = np.sqrt(2.0 / (fan_in + fan_out))
        return jax.random.normal(kk, (fan_in, fan_out), jnp.float32) * std

    ks = jax.random.split(key, 6)
    return {
        "wq_w": xavier(ks[0], d_x, num_head * d_k),
        "wk_w": xavier(ks[1], d_x, num_head * d_k),
        "wv_w": xavier(ks[2], d_x, num_head * d_k),
        "wkl_w": xavier(ks[3], d_x, num_head * d_kl),
        "wvl_w": xavier(ks[4], d_x, num_head * d_kl),
        "wo_w": xavier(ks[5], num_head * d_k, d_x),
        "wq_b": jnp.zeros((1, num_head * d_k), jnp.float32),
        "wk_b": jnp.zeros((1, num_head * d_k), jnp.float32),
        "wv_b": jnp.zeros((1, num_head * d_k), jnp.float32),
        "wkl_b": jnp.zeros((1, num_head * d_kl), jnp.float32),
        "wvl_b": jnp.zeros((1, num_head * d_kl), jnp.float32),
        "wo_b": jnp.zeros((1, d_x), jnp.float32),
        "ln_g": jnp.ones((1, d_x), jnp.float32),
        "ln_b": jnp.zeros((1, d_x), jnp.float32),
    }


# ----------------------------------------------------------------------------
# Pure-JAX reference (mirrors the PyTorch module, eval / no-mask path)
# ----------------------------------------------------------------------------
def _reference_forward(params, q, k, v, kl, vl, *, num_head, d_k, d_kl,
                       alpha=0.5):
    H = num_head
    B, Lq, d_x = q.shape
    Lk, Lkl = k.shape[1], kl.shape[1]
    X = q

    def lin(x, w, b):
        return jnp.einsum('bld,do->blo', x, w) + b

    def heads(y, dh):
        return (y.reshape(B, y.shape[1], H, dh)
                 .transpose(2, 0, 1, 3)
                 .reshape(H * B, y.shape[1], dh))

    Q = heads(lin(q, params["wq_w"], params["wq_b"]), d_k)
    K = heads(lin(k, params["wk_w"], params["wk_b"]), d_k)
    V = heads(lin(v, params["wv_w"], params["wv_b"]), d_k)
    KL = heads(lin(kl, params["wkl_w"], params["wkl_b"]), d_kl)
    VL = heads(lin(vl, params["wvl_w"], params["wvl_b"]), d_kl)

    def sdp(qh, kh, vh, dh):
        att = jnp.einsum('bqd,bkd->bqk', qh, kh) / np.sqrt(dh)
        att = jax.nn.softmax(att, axis=-1)
        return jnp.einsum('bqk,bkd->bqd', att, vh), att

    oc, ac = sdp(Q, K, V, d_k)
    ol, al = sdp(Q, KL, VL, d_kl)

    a4 = ac.reshape(H, B, Lq, Lk)
    res = 0.0
    for m in range(H):
        for n in range(H):
            if m != n:
                res = res + jnp.sum(jnp.abs(a4[m] * a4[n])) / Lq
    res = res / H / H / 2.0

    out = alpha * oc + (1.0 - alpha) * ol
    merged = (out.reshape(H, B, Lq, d_k).transpose(1, 2, 0, 3)
                 .reshape(B, Lq, H * d_k))
    y = jnp.einsum('blh,hd->bld', merged, params["wo_w"]) + params["wo_b"]
    y = y + X
    mean = y.mean(-1, keepdims=True)
    var = ((y - mean) ** 2).mean(-1, keepdims=True)
    y = (y - mean) / jnp.sqrt(var + 1e-5) * params["ln_g"] + params["ln_b"]

    ac_out = ac.reshape(H, B, Lq, Lk).transpose(1, 0, 2, 3)
    al_out = al.reshape(H, B, Lq, Lkl).transpose(1, 0, 2, 3)
    return y, ac_out, al_out, res


# ----------------------------------------------------------------------------
if __name__ == "__main__":
    num_head = 4
    d_x = 32
    d_k = 16
    d_kl = 16    # must equal d_k: reference bmm's q (d_k) against kl (d_kl)
    B, Lq, Lk, Lkl = 2, 8, 8, 6

    key = jax.random.PRNGKey(0)
    kp, kq, kk, kv, kkl, kvl = jax.random.split(key, 6)

    params = init_params(kp, num_head, d_x, d_k, d_kl)
    q = jax.random.normal(kq, (B, Lq, d_x), jnp.float32)
    k = jax.random.normal(kk, (B, Lk, d_x), jnp.float32)
    v = jax.random.normal(kv, (B, Lk, d_x), jnp.float32)
    kl = jax.random.normal(kkl, (B, Lkl, d_x), jnp.float32)
    vl = jax.random.normal(kvl, (B, Lkl, d_x), jnp.float32)

    out, attn_c, attn_l, residual = lexicon_mha_forward(
        params, q, k, v, kl, vl,
        num_head=num_head, d_k=d_k, d_kl=d_kl, alpha=0.5)
    jax.block_until_ready((out, attn_c, attn_l, residual))

    assert out.shape == (B, Lq, d_x)
    assert attn_c.shape == (B, num_head, Lq, Lk)
    assert attn_l.shape == (B, num_head, Lq, Lkl)

    # Correctness check vs plain-JAX reference (tolerance accounts for the
    # bf16-operand / f32-accumulate MXU path).
    out_r, ac_r, al_r, res_r = _reference_forward(
        params, q, k, v, kl, vl,
        num_head=num_head, d_k=d_k, d_kl=d_kl, alpha=0.5)
    np.testing.assert_allclose(np.asarray(out), np.asarray(out_r),
                               rtol=3e-2, atol=3e-2)
    np.testing.assert_allclose(np.asarray(attn_c), np.asarray(ac_r),
                               rtol=3e-2, atol=3e-2)
    np.testing.assert_allclose(np.asarray(attn_l), np.asarray(al_r),
                               rtol=3e-2, atol=3e-2)
    np.testing.assert_allclose(float(residual), float(res_r),
                               rtol=3e-2, atol=3e-2)

    print("KERNEL_OK")
</pallas_src>

<mosaic_0001>
module attributes {stable_mosaic.version = 11 : i64} {
  func.func @_fused_lexicon_mha_kernel(%arg0: i32, %arg1: i32, %arg2: memref<1x8x32xf32, #tpu.memory_space<vmem>>, %arg3: memref<1x8x32xf32, #tpu.memory_space<vmem>>, %arg4: memref<1x8x32xf32, #tpu.memory_space<vmem>>, %arg5: memref<1x6x32xf32, #tpu.memory_space<vmem>>, %arg6: memref<1x6x32xf32, #tpu.memory_space<vmem>>, %arg7: memref<32x64xbf16, #tpu.memory_space<vmem>>, %arg8: memref<1x64xf32, #tpu.memory_space<vmem>>, %arg9: memref<32x64xbf16, #tpu.memory_space<vmem>>, %arg10: memref<1x64xf32, #tpu.memory_space<vmem>>, %arg11: memref<32x64xbf16, #tpu.memory_space<vmem>>, %arg12: memref<1x64xf32, #tpu.memory_space<vmem>>, %arg13: memref<32x64xbf16, #tpu.memory_space<vmem>>, %arg14: memref<1x64xf32, #tpu.memory_space<vmem>>, %arg15: memref<32x64xbf16, #tpu.memory_space<vmem>>, %arg16: memref<1x64xf32, #tpu.memory_space<vmem>>, %arg17: memref<64x32xbf16, #tpu.memory_space<vmem>>, %arg18: memref<1x32xf32, #tpu.memory_space<vmem>>, %arg19: memref<1x32xf32, #tpu.memory_space<vmem>>, %arg20: memref<1x32xf32, #tpu.memory_space<vmem>>, %arg21: memref<1x8x32xf32, #tpu.memory_space<vmem>>, %arg22: memref<1x4x8x8xf32, #tpu.memory_space<vmem>>, %arg23: memref<1x4x8x6xf32, #tpu.memory_space<vmem>>, %arg24: memref<1x1x1xf32, #tpu.memory_space<vmem>>, %arg25: memref<4x8x16xbf16, #tpu.memory_space<vmem>>, %arg26: memref<4x8x16xbf16, #tpu.memory_space<vmem>>, %arg27: memref<4x6x16xbf16, #tpu.memory_space<vmem>>, %arg28: memref<4x6x16xbf16, #tpu.memory_space<vmem>>) attributes {dimension_semantics = [#tpu.dimension_semantics<parallel>, #tpu.dimension_semantics<arbitrary>], iteration_bounds = array<i64: 2, 1>, scalar_prefetch = 0 : i64, scratch_operands = 4 : i64, tpu.core_type = #tpu.core_type<tc>, window_params = [{transform_indices = @transform_0, window_bounds = array<i64: 1, 8, 32>}, {transform_indices = @transform_1, window_bounds = array<i64: 1, 8, 32>}, {transform_indices = @transform_2, window_bounds = array<i64: 1, 8, 32>}, {transform_indices = @transform_3, window_bounds = array<i64: 1, 6, 32>}, {transform_indices = @transform_4, window_bounds = array<i64: 1, 6, 32>}, {pipeline_mode = #tpu.pipeline_mode<synchronous>, transform_indices = @transform_5, window_bounds = array<i64: 32, 64>}, {pipeline_mode = #tpu.pipeline_mode<synchronous>, transform_indices = @transform_6, window_bounds = array<i64: 1, 64>}, {pipeline_mode = #tpu.pipeline_mode<synchronous>, transform_indices = @transform_7, window_bounds = array<i64: 32, 64>}, {pipeline_mode = #tpu.pipeline_mode<synchronous>, transform_indices = @transform_8, window_bounds = array<i64: 1, 64>}, {pipeline_mode = #tpu.pipeline_mode<synchronous>, transform_indices = @transform_9, window_bounds = array<i64: 32, 64>}, {pipeline_mode = #tpu.pipeline_mode<synchronous>, transform_indices = @transform_10, window_bounds = array<i64: 1, 64>}, {pipeline_mode = #tpu.pipeline_mode<synchronous>, transform_indices = @transform_11, window_bounds = array<i64: 32, 64>}, {pipeline_mode = #tpu.pipeline_mode<synchronous>, transform_indices = @transform_12, window_bounds = array<i64: 1, 64>}, {pipeline_mode = #tpu.pipeline_mode<synchronous>, transform_indices = @transform_13, window_bounds = array<i64: 32, 64>}, {pipeline_mode = #tpu.pipeline_mode<synchronous>, transform_indices = @transform_14, window_bounds = array<i64: 1, 64>}, {pipeline_mode = #tpu.pipeline_mode<synchronous>, transform_indices = @transform_15, window_bounds = array<i64: 64, 32>}, {pipeline_mode = #tpu.pipeline_mode<synchronous>, transform_indices = @transform_16, window_bounds = array<i64: 1, 32>}, {pipeline_mode = #tpu.pipeline_mode<synchronous>, transform_indices = @transform_17, window_bounds = array<i64: 1, 32>}, {pipeline_mode = #tpu.pipeline_mode<synchronous>, transform_indices = @transform_18, window_bounds = array<i64: 1, 32>}, {transform_indices = @transform_19, window_bounds = array<i64: 1, 8, 32>}, {transform_indices = @transform_20, window_bounds = array<i64: 1, 4, 8, 8>}, {transform_indices = @transform_21, window_bounds = array<i64: 1, 4, 8, 6>}, {transform_indices = @transform_22, window_bounds = array<i64: 1, 1, 1>}]} {
    %c0_i32 = arith.constant 0 : i32
    %0 = arith.cmpi eq, %arg1, %c0_i32 : i32
    %1 = arith.extui %0 : i1 to i32
    %c0_i32_0 = arith.constant 0 : i32
    %2 = arith.cmpi ne, %1, %c0_i32_0 : i32
    scf.if %2 {
      %c0_66 = arith.constant 0 : index
      %c0_67 = arith.constant 0 : index
      %c0_68 = arith.constant 0 : index
      %122 = vector.load %arg3[%c0_66, %c0_67, %c0_68] : memref<1x8x32xf32, #tpu.memory_space<vmem>>, vector<1x8x32xf32>
      %123 = vector.shape_cast %122 : vector<1x8x32xf32> to vector<8x32xf32>
      %124 = arith.truncf %123 : vector<8x32xf32> to vector<8x32xbf16>
      %c0_69 = arith.constant 0 : index
      %c0_70 = arith.constant 0 : index
      %125 = vector.load %arg9[%c0_69, %c0_70] : memref<32x64xbf16, #tpu.memory_space<vmem>>, vector<32x64xbf16>
      %cst_71 = arith.constant dense<0.000000e+00> : vector<8x64xf32>
      %126 = tpu.matmul %124, %125, %cst_71 {dimension_numbers = #tpu.dot_dimension_numbers<[1], [0], [0], [1], [0, 0, 1, 1], [], []>} : vector<8x32xbf16>, vector<32x64xbf16>, vector<8x64xf32> -> vector<8x64xf32>
      %c0_72 = arith.constant 0 : index
      %c0_73 = arith.constant 0 : index
      %127 = vector.load %arg10[%c0_72, %c0_73] : memref<1x64xf32, #tpu.memory_space<vmem>>, vector<1x64xf32>
      %128 = vector.broadcast %127 : vector<1x64xf32> to vector<8x64xf32>
      %129 = arith.addf %126, %128 : vector<8x64xf32>
      %130 = arith.truncf %129 : vector<8x64xf32> to vector<8x64xbf16>
      %131 = vector.extract_strided_slice %130 {offsets = [0, 0], sizes = [8, 16], strides = [1, 1]} : vector<8x64xbf16> to vector<8x16xbf16>
      %132 = vector.extract_strided_slice %130 {offsets = [0, 16], sizes = [8, 16], strides = [1, 1]} : vector<8x64xbf16> to vector<8x16xbf16>
      %133 = vector.extract_strided_slice %130 {offsets = [0, 32], sizes = [8, 16], strides = [1, 1]} : vector<8x64xbf16> to vector<8x16xbf16>
      %134 = vector.extract_strided_slice %130 {offsets = [0, 48], sizes = [8, 16], strides = [1, 1]} : vector<8x64xbf16> to vector<8x16xbf16>
      %135 = vector.shape_cast %131 : vector<8x16xbf16> to vector<1x8x16xbf16>
      %136 = vector.shape_cast %132 : vector<8x16xbf16> to vector<1x8x16xbf16>
      %137 = vector.shape_cast %133 : vector<8x16xbf16> to vector<1x8x16xbf16>
      %138 = vector.shape_cast %134 : vector<8x16xbf16> to vector<1x8x16xbf16>
      %139 = tpu.concatenate %135, %136, %137, %138 in 0 : vector<1x8x16xbf16>, vector<1x8x16xbf16>, vector<1x8x16xbf16>, vector<1x8x16xbf16> -> vector<4x8x16xbf16>
      %c0_74 = arith.constant 0 : index
      %c0_75 = arith.constant 0 : index
      %c0_76 = arith.constant 0 : index
      %140 = vector.load %arg25[%c0_74, %c0_75, %c0_76] : memref<4x8x16xbf16, #tpu.memory_space<vmem>>, vector<4x8x16xbf16>
      tpu.vector_store %arg25[%c0_74, %c0_75, %c0_76], %139 {strides = array<i32>} : memref<4x8x16xbf16, #tpu.memory_space<vmem>>, vector<4x8x16xbf16>,
      %c0_77 = arith.constant 0 : index
      %c0_78 = arith.constant 0 : index
      %c0_79 = arith.constant 0 : index
      %141 = vector.load %arg4[%c0_77, %c0_78, %c0_79] : memref<1x8x32xf32, #tpu.memory_space<vmem>>, vector<1x8x32xf32>
      %142 = vector.shape_cast %141 : vector<1x8x32xf32> to vector<8x32xf32>
      %143 = arith.truncf %142 : vector<8x32xf32> to vector<8x32xbf16>
      %c0_80 = arith.constant 0 : index
      %c0_81 = arith.constant 0 : index
      %144 = vector.load %arg11[%c0_80, %c0_81] : memref<32x64xbf16, #tpu.memory_space<vmem>>, vector<32x64xbf16>
      %cst_82 = arith.constant dense<0.000000e+00> : vector<8x64xf32>
      %145 = tpu.matmul %143, %144, %cst_82 {dimension_numbers = #tpu.dot_dimension_numbers<[1], [0], [0], [1], [0, 0, 1, 1], [], []>} : vector<8x32xbf16>, vector<32x64xbf16>, vector<8x64xf32> -> vector<8x64xf32>
      %c0_83 = arith.constant 0 : index
      %c0_84 = arith.constant 0 : index
      %146 = vector.load %arg12[%c0_83, %c0_84] : memref<1x64xf32, #tpu.memory_space<vmem>>, vector<1x64xf32>
      %147 = vector.broadcast %146 : vector<1x64xf32> to vector<8x64xf32>
      %148 = arith.addf %145, %147 : vector<8x64xf32>
      %149 = arith.truncf %148 : vector<8x64xf32> to vector<8x64xbf16>
      %150 = vector.extract_strided_slice %149 {offsets = [0, 0], sizes = [8, 16], strides = [1, 1]} : vector<8x64xbf16> to vector<8x16xbf16>
      %151 = vector.extract_strided_slice %149 {offsets = [0, 16], sizes = [8, 16], strides = [1, 1]} : vector<8x64xbf16> to vector<8x16xbf16>
      %152 = vector.extract_strided_slice %149 {offsets = [0, 32], sizes = [8, 16], strides = [1, 1]} : vector<8x64xbf16> to vector<8x16xbf16>
      %153 = vector.extract_strided_slice %149 {offsets = [0, 48], sizes = [8, 16], strides = [1, 1]} : vector<8x64xbf16> to vector<8x16xbf16>
      %154 = vector.shape_cast %150 : vector<8x16xbf16> to vector<1x8x16xbf16>
      %155 = vector.shape_cast %151 : vector<8x16xbf16> to vector<1x8x16xbf16>
      %156 = vector.shape_cast %152 : vector<8x16xbf16> to vector<1x8x16xbf16>
      %157 = vector.shape_cast %153 : vector<8x16xbf16> to vector<1x8x16xbf16>
      %158 = tpu.concatenate %154, %155, %156, %157 in 0 : vector<1x8x16xbf16>, vector<1x8x16xbf16>, vector<1x8x16xbf16>, vector<1x8x16xbf16> -> vector<4x8x16xbf16>
      %c0_85 = arith.constant 0 : index
      %c0_86 = arith.constant 0 : index
      %c0_87 = arith.constant 0 : index
      %159 = vector.load %arg26[%c0_85, %c0_86, %c0_87] : memref<4x8x16xbf16, #tpu.memory_space<vmem>>, vector<4x8x16xbf16>
      tpu.vector_store %arg26[%c0_85, %c0_86, %c0_87], %158 {strides = array<i32>} : memref<4x8x16xbf16, #tpu.memory_space<vmem>>, vector<4x8x16xbf16>,
      %c0_88 = arith.constant 0 : index
      %c0_89 = arith.constant 0 : index
      %c0_90 = arith.constant 0 : index
      %160 = vector.load %arg5[%c0_88, %c0_89, %c0_90] : memref<1x6x32xf32, #tpu.memory_space<vmem>>, vector<1x6x32xf32>
      %161 = vector.shape_cast %160 : vector<1x6x32xf32> to vector<6x32xf32>
      %162 = arith.truncf %161 : vector<6x32xf32> to vector<6x32xbf16>
      %c0_91 = arith.constant 0 : index
      %c0_92 = arith.constant 0 : index
      %163 = vector.load %arg13[%c0_91, %c0_92] : memref<32x64xbf16, #tpu.memory_space<vmem>>, vector<32x64xbf16>
      %cst_93 = arith.constant dense<0.000000e+00> : vector<6x64xf32>
      %164 = tpu.matmul %162, %163, %cst_93 {dimension_numbers = #tpu.dot_dimension_numbers<[1], [0], [0], [1], [0, 0, 1, 1], [], []>} : vector<6x32xbf16>, vector<32x64xbf16>, vector<6x64xf32> -> vector<6x64xf32>
      %c0_94 = arith.constant 0 : index
      %c0_95 = arith.constant 0 : index
      %165 = vector.load %arg14[%c0_94, %c0_95] : memref<1x64xf32, #tpu.memory_space<vmem>>, vector<1x64xf32>
      %166 = vector.broadcast %165 : vector<1x64xf32> to vector<6x64xf32>
      %167 = arith.addf %164, %166 : vector<6x64xf32>
      %168 = arith.truncf %167 : vector<6x64xf32> to vector<6x64xbf16>
      %169 = vector.extract_strided_slice %168 {offsets = [0, 0], sizes = [6, 16], strides = [1, 1]} : vector<6x64xbf16> to vector<6x16xbf16>
      %170 = vector.extract_strided_slice %168 {offsets = [0, 16], sizes = [6, 16], strides = [1, 1]} : vector<6x64xbf16> to vector<6x16xbf16>
      %171 = vector.extract_strided_slice %168 {offsets = [0, 32], sizes = [6, 16], strides = [1, 1]} : vector<6x64xbf16> to vector<6x16xbf16>
      %172 = vector.extract_strided_slice %168 {offsets = [0, 48], sizes = [6, 16], strides = [1, 1]} : vector<6x64xbf16> to vector<6x16xbf16>
      %173 = vector.shape_cast %169 : vector<6x16xbf16> to vector<1x6x16xbf16>
      %174 = vector.shape_cast %170 : vector<6x16xbf16> to vector<1x6x16xbf16>
      %175 = vector.shape_cast %171 : vector<6x16xbf16> to vector<1x6x16xbf16>
      %176 = vector.shape_cast %172 : vector<6x16xbf16> to vector<1x6x16xbf16>
      %177 = tpu.concatenate %173, %174, %175, %176 in 0 : vector<1x6x16xbf16>, vector<1x6x16xbf16>, vector<1x6x16xbf16>, vector<1x6x16xbf16> -> vector<4x6x16xbf16>
      %c0_96 = arith.constant 0 : index
      %c0_97 = arith.constant 0 : index
      %c0_98 = arith.constant 0 : index
      %178 = vector.load %arg27[%c0_96, %c0_97, %c0_98] : memref<4x6x16xbf16, #tpu.memory_space<vmem>>, vector<4x6x16xbf16>
      tpu.vector_store %arg27[%c0_96, %c0_97, %c0_98], %177 {strides = array<i32>} : memref<4x6x16xbf16, #tpu.memory_space<vmem>>, vector<4x6x16xbf16>,
      %c0_99 = arith.constant 0 : index
      %c0_100 = arith.constant 0 : index
      %c0_101 = arith.constant 0 : index
      %179 = vector.load %arg6[%c0_99, %c0_100, %c0_101] : memref<1x6x32xf32, #tpu.memory_space<vmem>>, vector<1x6x32xf32>
      %180 = vector.shape_cast %179 : vector<1x6x32xf32> to vector<6x32xf32>
      %181 = arith.truncf %180 : vector<6x32xf32> to vector<6x32xbf16>
      %c0_102 = arith.constant 0 : index
      %c0_103 = arith.constant 0 : index
      %182 = vector.load %arg15[%c0_102, %c0_103] : memref<32x64xbf16, #tpu.memory_space<vmem>>, vector<32x64xbf16>
      %cst_104 = arith.constant dense<0.000000e+00> : vector<6x64xf32>
      %183 = tpu.matmul %181, %182, %cst_104 {dimension_numbers = #tpu.dot_dimension_numbers<[1], [0], [0], [1], [0, 0, 1, 1], [], []>} : vector<6x32xbf16>, vector<32x64xbf16>, vector<6x64xf32> -> vector<6x64xf32>
      %c0_105 = arith.constant 0 : index
      %c0_106 = arith.constant 0 : index
      %184 = vector.load %arg16[%c0_105, %c0_106] : memref<1x64xf32, #tpu.memory_space<vmem>>, vector<1x64xf32>
      %185 = vector.broadcast %184 : vector<1x64xf32> to vector<6x64xf32>
      %186 = arith.addf %183, %185 : vector<6x64xf32>
      %187 = arith.truncf %186 : vector<6x64xf32> to vector<6x64xbf16>
      %188 = vector.extract_strided_slice %187 {offsets = [0, 0], sizes = [6, 16], strides = [1, 1]} : vector<6x64xbf16> to vector<6x16xbf16>
      %189 = vector.extract_strided_slice %187 {offsets = [0, 16], sizes = [6, 16], strides = [1, 1]} : vector<6x64xbf16> to vector<6x16xbf16>
      %190 = vector.extract_strided_slice %187 {offsets = [0, 32], sizes = [6, 16], strides = [1, 1]} : vector<6x64xbf16> to vector<6x16xbf16>
      %191 = vector.extract_strided_slice %187 {offsets = [0, 48], sizes = [6, 16], strides = [1, 1]} : vector<6x64xbf16> to vector<6x16xbf16>
      %192 = vector.shape_cast %188 : vector<6x16xbf16> to vector<1x6x16xbf16>
      %193 = vector.shape_cast %189 : vector<6x16xbf16> to vector<1x6x16xbf16>
      %194 = vector.shape_cast %190 : vector<6x16xbf16> to vector<1x6x16xbf16>
      %195 = vector.shape_cast %191 : vector<6x16xbf16> to vector<1x6x16xbf16>
      %196 = tpu.concatenate %192, %193, %194, %195 in 0 : vector<1x6x16xbf16>, vector<1x6x16xbf16>, vector<1x6x16xbf16>, vector<1x6x16xbf16> -> vector<4x6x16xbf16>
      %c0_107 = arith.constant 0 : index
      %c0_108 = arith.constant 0 : index
      %c0_109 = arith.constant 0 : index
      %197 = vector.load %arg28[%c0_107, %c0_108, %c0_109] : memref<4x6x16xbf16, #tpu.memory_space<vmem>>, vector<4x6x16xbf16>
      tpu.vector_store %arg28[%c0_107, %c0_108, %c0_109], %196 {strides = array<i32>} : memref<4x6x16xbf16, #tpu.memory_space<vmem>>, vector<4x6x16xbf16>,
    } else {
    }
    %c0 = arith.constant 0 : index
    %c0_1 = arith.constant 0 : index
    %c0_2 = arith.constant 0 : index
    %3 = vector.load %arg2[%c0, %c0_1, %c0_2] : memref<1x8x32xf32, #tpu.memory_space<vmem>>, vector<1x8x32xf32>
    %4 = vector.shape_cast %3 : vector<1x8x32xf32> to vector<8x32xf32>
    %5 = arith.truncf %4 : vector<8x32xf32> to vector<8x32xbf16>
    %c0_3 = arith.constant 0 : index
    %c0_4 = arith.constant 0 : index
    %6 = vector.load %arg7[%c0_3, %c0_4] : memref<32x64xbf16, #tpu.memory_space<vmem>>, vector<32x64xbf16>
    %cst = arith.constant dense<0.000000e+00> : vector<8x64xf32>
    %7 = tpu.matmul %5, %6, %cst {dimension_numbers = #tpu.dot_dimension_numbers<[1], [0], [0], [1], [0, 0, 1, 1], [], []>} : vector<8x32xbf16>, vector<32x64xbf16>, vector<8x64xf32> -> vector<8x64xf32>
    %c0_5 = arith.constant 0 : index
    %c0_6 = arith.constant 0 : index
    %8 = vector.load %arg8[%c0_5, %c0_6] : memref<1x64xf32, #tpu.memory_space<vmem>>, vector<1x64xf32>
    %9 = vector.broadcast %8 : vector<1x64xf32> to vector<8x64xf32>
    %10 = arith.addf %7, %9 : vector<8x64xf32>
    %11 = arith.truncf %10 : vector<8x64xf32> to vector<8x64xbf16>
    %12 = vector.extract_strided_slice %11 {offsets = [0, 0], sizes = [8, 16], strides = [1, 1]} : vector<8x64xbf16> to vector<8x16xbf16>
    %13 = vector.extract_strided_slice %11 {offsets = [0, 16], sizes = [8, 16], strides = [1, 1]} : vector<8x64xbf16> to vector<8x16xbf16>
    %14 = vector.extract_strided_slice %11 {offsets = [0, 32], sizes = [8, 16], strides = [1, 1]} : vector<8x64xbf16> to vector<8x16xbf16>
    %15 = vector.extract_strided_slice %11 {offsets = [0, 48], sizes = [8, 16], strides = [1, 1]} : vector<8x64xbf16> to vector<8x16xbf16>
    %16 = vector.shape_cast %12 : vector<8x16xbf16> to vector<1x8x16xbf16>
    %17 = vector.shape_cast %13 : vector<8x16xbf16> to vector<1x8x16xbf16>
    %18 = vector.shape_cast %14 : vector<8x16xbf16> to vector<1x8x16xbf16>
    %19 = vector.shape_cast %15 : vector<8x16xbf16> to vector<1x8x16xbf16>
    %20 = tpu.concatenate %16, %17, %18, %19 in 0 : vector<1x8x16xbf16>, vector<1x8x16xbf16>, vector<1x8x16xbf16>, vector<1x8x16xbf16> -> vector<4x8x16xbf16>
    %c0_7 = arith.constant 0 : index
    %c0_8 = arith.constant 0 : index
    %c0_9 = arith.constant 0 : index
    %21 = vector.load %arg25[%c0_7, %c0_8, %c0_9] : memref<4x8x16xbf16, #tpu.memory_space<vmem>>, vector<4x8x16xbf16>
    "tpu.trace_start"() <{level = 10 : i32, message = "hqd,hkd->hqk"}> : () -> ()
    %cst_10 = arith.constant dense<0.000000e+00> : vector<4x8x8xf32>
    %22 = tpu.matmul %20, %21, %cst_10 {dimension_numbers = #tpu.dot_dimension_numbers<[2], [2], [1], [1], [0, 0, 0, 1, 1, 1], [0], [0]>} : vector<4x8x16xbf16>, vector<4x8x16xbf16>, vector<4x8x8xf32> -> vector<4x8x8xf32>
    "tpu.trace_stop"() : () -> ()
    %cst_11 = arith.constant dense<0xFF800000> : vector<4x8xf32>
    %23 = vector.multi_reduction <maximumf>, %22, %cst_11 [2] : vector<4x8x8xf32> to vector<4x8xf32>
    %24 = vector.shape_cast %23 : vector<4x8xf32> to vector<4x8x1xf32>
    %25 = vector.broadcast %24 : vector<4x8x1xf32> to vector<4x8x8xf32>
    %26 = arith.subf %22, %25 : vector<4x8x8xf32>
    %27 = math.exp %26 : vector<4x8x8xf32>
    %cst_12 = arith.constant dense<0.000000e+00> : vector<4x8xf32>
    %28 = vector.multi_reduction <add>, %27, %cst_12 [2] : vector<4x8x8xf32> to vector<4x8xf32>
    %29 = vector.shape_cast %28 : vector<4x8xf32> to vector<4x8x1xf32>
    %30 = vector.broadcast %29 : vector<4x8x1xf32> to vector<4x8x8xf32>
    %31 = arith.divf %27, %30 : vector<4x8x8xf32>
    %c0_13 = arith.constant 0 : index
    %c0_14 = arith.constant 0 : index
    %c0_15 = arith.constant 0 : index
    %32 = vector.load %arg27[%c0_13, %c0_14, %c0_15] : memref<4x6x16xbf16, #tpu.memory_space<vmem>>, vector<4x6x16xbf16>
    "tpu.trace_start"() <{level = 10 : i32, message = "hqd,hkd->hqk"}> : () -> ()
    %cst_16 = arith.constant dense<0.000000e+00> : vector<4x8x6xf32>
    %33 = tpu.matmul %20, %32, %cst_16 {dimension_numbers = #tpu.dot_dimension_numbers<[2], [2], [1], [1], [0, 0, 0, 1, 1, 1], [0], [0]>} : vector<4x8x16xbf16>, vector<4x6x16xbf16>, vector<4x8x6xf32> -> vector<4x8x6xf32>
    "tpu.trace_stop"() : () -> ()
    %cst_17 = arith.constant dense<0xFF800000> : vector<4x8xf32>
    %34 = vector.multi_reduction <maximumf>, %33, %cst_17 [2] : vector<4x8x6xf32> to vector<4x8xf32>
    %35 = vector.shape_cast %34 : vector<4x8xf32> to vector<4x8x1xf32>
    %36 = vector.broadcast %35 : vector<4x8x1xf32> to vector<4x8x6xf32>
    %37 = arith.subf %33, %36 : vector<4x8x6xf32>
    %38 = math.exp %37 : vector<4x8x6xf32>
    %cst_18 = arith.constant dense<0.000000e+00> : vector<4x8xf32>
    %39 = vector.multi_reduction <add>, %38, %cst_18 [2] : vector<4x8x6xf32> to vector<4x8xf32>
    %40 = vector.shape_cast %39 : vector<4x8xf32> to vector<4x8x1xf32>
    %41 = vector.broadcast %40 : vector<4x8x1xf32> to vector<4x8x6xf32>
    %42 = arith.divf %38, %41 : vector<4x8x6xf32>
    %43 = arith.truncf %31 : vector<4x8x8xf32> to vector<4x8x8xbf16>
    %c0_19 = arith.constant 0 : index
    %c0_20 = arith.constant 0 : index
    %c0_21 = arith.constant 0 : index
    %44 = vector.load %arg26[%c0_19, %c0_20, %c0_21] : memref<4x8x16xbf16, #tpu.memory_space<vmem>>, vector<4x8x16xbf16>
    "tpu.trace_start"() <{level = 10 : i32, message = "hqk,hkd->hqd"}> : () -> ()
    %cst_22 = arith.constant dense<0.000000e+00> : vector<4x8x16xf32>
    %45 = tpu.matmul %43, %44, %cst_22 {dimension_numbers = #tpu.dot_dimension_numbers<[2], [1], [1], [2], [0, 0, 0, 1, 1, 2], [0], [0]>} : vector<4x8x8xbf16>, vector<4x8x16xbf16>, vector<4x8x16xf32> -> vector<4x8x16xf32>
    "tpu.trace_stop"() : () -> ()
    %46 = arith.truncf %42 : vector<4x8x6xf32> to vector<4x8x6xbf16>
    %c0_23 = arith.constant 0 : index
    %c0_24 = arith.constant 0 : index
    %c0_25 = arith.constant 0 : index
    %47 = vector.load %arg28[%c0_23, %c0_24, %c0_25] : memref<4x6x16xbf16, #tpu.memory_space<vmem>>, vector<4x6x16xbf16>
    "tpu.trace_start"() <{level = 10 : i32, message = "hqk,hkd->hqd"}> : () -> ()
    %cst_26 = arith.constant dense<0.000000e+00> : vector<4x8x16xf32>
    %48 = tpu.matmul %46, %47, %cst_26 {dimension_numbers = #tpu.dot_dimension_numbers<[2], [1], [1], [2], [0, 0, 0, 1, 1, 2], [0], [0]>} : vector<4x8x6xbf16>, vector<4x6x16xbf16>, vector<4x8x16xf32> -> vector<4x8x16xf32>
    "tpu.trace_stop"() : () -> ()
    %cst_27 = arith.constant 5.000000e-01 : f32
    %49 = vector.broadcast %cst_27 : f32 to vector<4x8x16xf32>
    %50 = arith.mulf %49, %45 : vector<4x8x16xf32>
    %cst_28 = arith.constant 5.000000e-01 : f32
    %51 = vector.broadcast %cst_28 : f32 to vector<4x8x16xf32>
    %52 = arith.mulf %51, %48 : vector<4x8x16xf32>
    %53 = arith.addf %50, %52 : vector<4x8x16xf32>
    %54 = vector.extract_strided_slice %53 {offsets = [0, 0, 0], sizes = [1, 8, 16], strides = [1, 1, 1]} : vector<4x8x16xf32> to vector<1x8x16xf32>
    %55 = vector.shape_cast %54 : vector<1x8x16xf32> to vector<8x16xf32>
    %56 = vector.extract_strided_slice %53 {offsets = [1, 0, 0], sizes = [1, 8, 16], strides = [1, 1, 1]} : vector<4x8x16xf32> to vector<1x8x16xf32>
    %57 = vector.shape_cast %56 : vector<1x8x16xf32> to vector<8x16xf32>
    %58 = vector.extract_strided_slice %53 {offsets = [2, 0, 0], sizes = [1, 8, 16], strides = [1, 1, 1]} : vector<4x8x16xf32> to vector<1x8x16xf32>
    %59 = vector.shape_cast %58 : vector<1x8x16xf32> to vector<8x16xf32>
    %60 = vector.extract_strided_slice %53 {offsets = [3, 0, 0], sizes = [1, 8, 16], strides = [1, 1, 1]} : vector<4x8x16xf32> to vector<1x8x16xf32>
    %61 = vector.shape_cast %60 : vector<1x8x16xf32> to vector<8x16xf32>
    %62 = tpu.concatenate %55, %57, %59, %61 in 1 : vector<8x16xf32>, vector<8x16xf32>, vector<8x16xf32>, vector<8x16xf32> -> vector<8x64xf32>
    %63 = arith.truncf %62 : vector<8x64xf32> to vector<8x64xbf16>
    %c0_29 = arith.constant 0 : index
    %c0_30 = arith.constant 0 : index
    %64 = vector.load %arg17[%c0_29, %c0_30] : memref<64x32xbf16, #tpu.memory_space<vmem>>, vector<64x32xbf16>
    %cst_31 = arith.constant dense<0.000000e+00> : vector<8x32xf32>
    %65 = tpu.matmul %63, %64, %cst_31 {dimension_numbers = #tpu.dot_dimension_numbers<[1], [0], [0], [1], [0, 0, 1, 1], [], []>} : vector<8x64xbf16>, vector<64x32xbf16>, vector<8x32xf32> -> vector<8x32xf32>
    %c0_32 = arith.constant 0 : index
    %c0_33 = arith.constant 0 : index
    %66 = vector.load %arg18[%c0_32, %c0_33] : memref<1x32xf32, #tpu.memory_space<vmem>>, vector<1x32xf32>
    %67 = vector.broadcast %66 : vector<1x32xf32> to vector<8x32xf32>
    %68 = arith.addf %65, %67 : vector<8x32xf32>
    %69 = arith.addf %68, %4 : vector<8x32xf32>
    %cst_34 = arith.constant dense<0.000000e+00> : vector<8xf32>
    %70 = vector.multi_reduction <add>, %69, %cst_34 [1] : vector<8x32xf32> to vector<8xf32>
    %71 = vector.shape_cast %70 : vector<8xf32> to vector<8x1xf32>
    %cst_35 = arith.constant 3.200000e+01 : f32
    %72 = vector.broadcast %cst_35 : f32 to vector<8x1xf32>
    %73 = arith.divf %71, %72 : vector<8x1xf32>
    %74 = vector.broadcast %73 : vector<8x1xf32> to vector<8x32xf32>
    %75 = arith.subf %69, %74 : vector<8x32xf32>
    %76 = arith.mulf %75, %75 : vector<8x32xf32>
    %cst_36 = arith.constant dense<0.000000e+00> : vector<8xf32>
    %77 = vector.multi_reduction <add>, %76, %cst_36 [1] : vector<8x32xf32> to vector<8xf32>
    %78 = vector.shape_cast %77 : vector<8xf32> to vector<8x1xf32>
    %cst_37 = arith.constant 3.200000e+01 : f32
    %79 = vector.broadcast %cst_37 : f32 to vector<8x1xf32>
    %80 = arith.divf %78, %79 : vector<8x1xf32>
    %81 = vector.broadcast %73 : vector<8x1xf32> to vector<8x32xf32>
    %82 = arith.subf %69, %81 : vector<8x32xf32>
    %cst_38 = arith.constant 9.99999974E-6 : f32
    %83 = vector.broadcast %cst_38 : f32 to vector<8x1xf32>
    %84 = arith.addf %80, %83 : vector<8x1xf32>
    %85 = math.rsqrt %84 : vector<8x1xf32>
    %86 = vector.broadcast %85 : vector<8x1xf32> to vector<8x32xf32>
    %87 = arith.mulf %82, %86 : vector<8x32xf32>
    %c0_39 = arith.constant 0 : index
    %c0_40 = arith.constant 0 : index
    %88 = vector.load %arg19[%c0_39, %c0_40] : memref<1x32xf32, #tpu.memory_space<vmem>>, vector<1x32xf32>
    %89 = vector.broadcast %88 : vector<1x32xf32> to vector<8x32xf32>
    %90 = arith.mulf %87, %89 : vector<8x32xf32>
    %c0_41 = arith.constant 0 : index
    %c0_42 = arith.constant 0 : index
    %91 = vector.load %arg20[%c0_41, %c0_42] : memref<1x32xf32, #tpu.memory_space<vmem>>, vector<1x32xf32>
    %92 = vector.broadcast %91 : vector<1x32xf32> to vector<8x32xf32>
    %93 = arith.addf %90, %92 : vector<8x32xf32>
    %c0_43 = arith.constant 0 : index
    %c0_44 = arith.constant 0 : index
    %c0_45 = arith.constant 0 : index
    %94 = vector.load %arg21[%c0_43, %c0_44, %c0_45] : memref<1x8x32xf32, #tpu.memory_space<vmem>>, vector<1x8x32xf32>
    %95 = vector.shape_cast %94 : vector<1x8x32xf32> to vector<8x32xf32>
    %96 = vector.shape_cast %93 : vector<8x32xf32> to vector<1x8x32xf32>
    tpu.vector_store %arg21[%c0_43, %c0_44, %c0_45], %96 {strides = array<i32>} : memref<1x8x32xf32, #tpu.memory_space<vmem>>, vector<1x8x32xf32>,
    %c0_46 = arith.constant 0 : index
    %c0_47 = arith.constant 0 : index
    %c0_48 = arith.constant 0 : index
    %c0_49 = arith.constant 0 : index
    %97 = vector.load %arg22[%c0_46, %c0_47, %c0_48, %c0_49] : memref<1x4x8x8xf32, #tpu.memory_space<vmem>>, vector<1x4x8x8xf32>
    %98 = vector.shape_cast %97 : vector<1x4x8x8xf32> to vector<4x8x8xf32>
    %99 = vector.shape_cast %31 : vector<4x8x8xf32> to vector<1x4x8x8xf32>
    tpu.vector_store %arg22[%c0_46, %c0_47, %c0_48, %c0_49], %99 {strides = array<i32>} : memref<1x4x8x8xf32, #tpu.memory_space<vmem>>, vector<1x4x8x8xf32>,
    %c0_50 = arith.constant 0 : index
    %c0_51 = arith.constant 0 : index
    %c0_52 = arith.constant 0 : index
    %c0_53 = arith.constant 0 : index
    %100 = vector.load %arg23[%c0_50, %c0_51, %c0_52, %c0_53] : memref<1x4x8x6xf32, #tpu.memory_space<vmem>>, vector<1x4x8x6xf32>
    %101 = vector.shape_cast %100 : vector<1x4x8x6xf32> to vector<4x8x6xf32>
    %102 = vector.shape_cast %42 : vector<4x8x6xf32> to vector<1x4x8x6xf32>
    tpu.vector_store %arg23[%c0_50, %c0_51, %c0_52, %c0_53], %102 {strides = array<i32>} : memref<1x4x8x6xf32, #tpu.memory_space<vmem>>, vector<1x4x8x6xf32>,
    %cst_54 = arith.constant dense<0.000000e+00> : vector<8x8xf32>
    %103 = vector.multi_reduction <add>, %31, %cst_54 [0] : vector<4x8x8xf32> to vector<8x8xf32>
    %104 = arith.mulf %31, %31 : vector<4x8x8xf32>
    %cst_55 = arith.constant dense<0.000000e+00> : vector<8x8xf32>
    %105 = vector.multi_reduction <add>, %104, %cst_55 [0] : vector<4x8x8xf32> to vector<8x8xf32>
    %106 = arith.mulf %103, %103 : vector<8x8xf32>
    %107 = arith.subf %106, %105 : vector<8x8xf32>
    %108 = vector.shape_cast %107 : vector<8x8xf32> to vector<1x8x8xf32>
    %cst_56 = arith.constant dense<0.000000e+00> : vector<1xf32>
    %109 = vector.multi_reduction <add>, %108, %cst_56 [1, 2] : vector<1x8x8xf32> to vector<1xf32>
    %110 = vector.shape_cast %109 : vector<1xf32> to vector<1x1x1xf32>
    %111 = vector.extract %110[0, 0, 0] : f32 from vector<1x1x1xf32>
    %112 = vector.broadcast %111 : f32 to vector<1x1xf32>
    %cst_57 = arith.constant 0.000000e+00 : f32
    %113 = vector.broadcast %cst_57 : f32 to vector<1x1xf32>
    %114 = arith.maximumf %112, %113 : vector<1x1xf32>
    %c0_i32_58 = arith.constant 0 : i32
    %115 = arith.cmpi eq, %arg1, %c0_i32_58 : i32
    %116 = arith.extui %115 : i1 to i32
    %c0_i32_59 = arith.constant 0 : i32
    %117 = arith.cmpi ne, %116, %c0_i32_59 : i32
    scf.if %117 {
      %cst_66 = arith.constant 0.000000e+00 : f32
      %122 = vector.broadcast %cst_66 : f32 to vector<1x1x1xf32>
      %c0_67 = arith.constant 0 : index
      %c0_68 = arith.constant 0 : index
      %c0_69 = arith.constant 0 : index
      %123 = vector.load %arg24[%c0_67, %c0_68, %c0_69] : memref<1x1x1xf32, #tpu.memory_space<vmem>>, vector<1x1x1xf32>
      tpu.vector_store %arg24[%c0_67, %c0_68, %c0_69], %122 {strides = array<i32>} : memref<1x1x1xf32, #tpu.memory_space<vmem>>, vector<1x1x1xf32>,
    } else {
    }
    %c0_60 = arith.constant 0 : index
    %c0_61 = arith.constant 0 : index
    %c0_62 = arith.constant 0 : index
    %118 = vector.load %arg24[%c0_60, %c0_61, %c0_62] : memref<1x1x1xf32, #tpu.memory_space<vmem>>, vector<1x1x1xf32>
    %119 = vector.shape_cast %114 : vector<1x1xf32> to vector<1x1x1xf32>
    %120 = arith.addf %118, %119 : vector<1x1x1xf32>
    %c0_63 = arith.constant 0 : index
    %c0_64 = arith.constant 0 : index
    %c0_65 = arith.constant 0 : index
    %121 = vector.load %arg24[%c0_63, %c0_64, %c0_65] : memref<1x1x1xf32, #tpu.memory_space<vmem>>, vector<1x1x1xf32>
    tpu.vector_store %arg24[%c0_63, %c0_64, %c0_65], %120 {strides = array<i32>} : memref<1x1x1xf32, #tpu.memory_space<vmem>>, vector<1x1x1xf32>,
    return
  }
  func.func @transform_0(%arg0: i32, %arg1: i32) -> (i32, i32, i32) {
    %c0_i32 = arith.constant 0 : i32
    %c0_i32_0 = arith.constant 0 : i32
    return %arg0, %arg1, %c0_i32 : i32, i32, i32
  }
  func.func @transform_1(%arg0: i32, %arg1: i32) -> (i32, i32, i32) {
    %c0_i32 = arith.constant 0 : i32
    %c0_i32_0 = arith.constant 0 : i32
    %c0_i32_1 = arith.constant 0 : i32
    return %arg0, %c0_i32, %c0_i32_0 : i32, i32, i32
  }
  func.func @transform_2(%arg0: i32, %arg1: i32) -> (i32, i32, i32) {
    %c0_i32 = arith.constant 0 : i32
    %c0_i32_0 = arith.constant 0 : i32
    %c0_i32_1 = arith.constant 0 : i32
    return %arg0, %c0_i32, %c0_i32_0 : i32, i32, i32
  }
  func.func @transform_3(%arg0: i32, %arg1: i32) -> (i32, i32, i32) {
    %c0_i32 = arith.constant 0 : i32
    %c0_i32_0 = arith.constant 0 : i32
    %c0_i32_1 = arith.constant 0 : i32
    return %arg0, %c0_i32, %c0_i32_0 : i32, i32, i32
  }
  func.func @transform_4(%arg0: i32, %arg1: i32) -> (i32, i32, i32) {
    %c0_i32 = arith.constant 0 : i32
    %c0_i32_0 = arith.constant 0 : i32
    %c0_i32_1 = arith.constant 0 : i32
    return %arg0, %c0_i32, %c0_i32_0 : i32, i32, i32
  }
  func.func @transform_5(%arg0: i32, %arg1: i32) -> (i32, i32) {
    %c0_i32 = arith.constant 0 : i32
    %c0_i32_0 = arith.constant 0 : i32
    %c0_i32_1 = arith.constant 0 : i32
    return %c0_i32, %c0_i32_0 : i32, i32
  }
  func.func @transform_6(%arg0: i32, %arg1: i32) -> (i32, i32) {
    %c0_i32 = arith.constant 0 : i32
    %c0_i32_0 = arith.constant 0 : i32
    %c0_i32_1 = arith.constant 0 : i32
    return %c0_i32, %c0_i32_0 : i32, i32
  }
  func.func @transform_7(%arg0: i32, %arg1: i32) -> (i32, i32) {
    %c0_i32 = arith.constant 0 : i32
    %c0_i32_0 = arith.constant 0 : i32
    %c0_i32_1 = arith.constant 0 : i32
    return %c0_i32, %c0_i32_0 : i32, i32
  }
  func.func @transform_8(%arg0: i32, %arg1: i32) -> (i32, i32) {
    %c0_i32 = arith.constant 0 : i32
    %c0_i32_0 = arith.constant 0 : i32
    %c0_i32_1 = arith.constant 0 : i32
    return %c0_i32, %c0_i32_0 : i32, i32
  }
  func.func @transform_9(%arg0: i32, %arg1: i32) -> (i32, i32) {
    %c0_i32 = arith.constant 0 : i32
    %c0_i32_0 = arith.constant 0 : i32
    %c0_i32_1 = arith.constant 0 : i32
    return %c0_i32, %c0_i32_0 : i32, i32
  }
  func.func @transform_10(%arg0: i32, %arg1: i32) -> (i32, i32) {
    %c0_i32 = arith.constant 0 : i32
    %c0_i32_0 = arith.constant 0 : i32
    %c0_i32_1 = arith.constant 0 : i32
    return %c0_i32, %c0_i32_0 : i32, i32
  }
  func.func @transform_11(%arg0: i32, %arg1: i32) -> (i32, i32) {
    %c0_i32 = arith.constant 0 : i32
    %c0_i32_0 = arith.constant 0 : i32
    %c0_i32_1 = arith.constant 0 : i32
    return %c0_i32, %c0_i32_0 : i32, i32
  }
  func.func @transform_12(%arg0: i32, %arg1: i32) -> (i32, i32) {
    %c0_i32 = arith.constant 0 : i32
    %c0_i32_0 = arith.constant 0 : i32
    %c0_i32_1 = arith.constant 0 : i32
    return %c0_i32, %c0_i32_0 : i32, i32
  }
  func.func @transform_13(%arg0: i32, %arg1: i32) -> (i32, i32) {
    %c0_i32 = arith.constant 0 : i32
    %c0_i32_0 = arith.constant 0 : i32
    %c0_i32_1 = arith.constant 0 : i32
    return %c0_i32, %c0_i32_0 : i32, i32
  }
  func.func @transform_14(%arg0: i32, %arg1: i32) -> (i32, i32) {
    %c0_i32 = arith.constant 0 : i32
    %c0_i32_0 = arith.constant 0 : i32
    %c0_i32_1 = arith.constant 0 : i32
    return %c0_i32, %c0_i32_0 : i32, i32
  }
  func.func @transform_15(%arg0: i32, %arg1: i32) -> (i32, i32) {
    %c0_i32 = arith.constant 0 : i32
    %c0_i32_0 = arith.constant 0 : i32
    %c0_i32_1 = arith.constant 0 : i32
    return %c0_i32, %c0_i32_0 : i32, i32
  }
  func.func @transform_16(%arg0: i32, %arg1: i32) -> (i32, i32) {
    %c0_i32 = arith.constant 0 : i32
    %c0_i32_0 = arith.constant 0 : i32
    %c0_i32_1 = arith.constant 0 : i32
    return %c0_i32, %c0_i32_0 : i32, i32
  }
  func.func @transform_17(%arg0: i32, %arg1: i32) -> (i32, i32) {
    %c0_i32 = arith.constant 0 : i32
    %c0_i32_0 = arith.constant 0 : i32
    %c0_i32_1 = arith.constant 0 : i32
    return %c0_i32, %c0_i32_0 : i32, i32
  }
  func.func @transform_18(%arg0: i32, %arg1: i32) -> (i32, i32) {
    %c0_i32 = arith.constant 0 : i32
    %c0_i32_0 = arith.constant 0 : i32
    %c0_i32_1 = arith.constant 0 : i32
    return %c0_i32, %c0_i32_0 : i32, i32
  }
  func.func @transform_19(%arg0: i32, %arg1: i32) -> (i32, i32, i32) {
    %c0_i32 = arith.constant 0 : i32
    %c0_i32_0 = arith.constant 0 : i32
    return %arg0, %arg1, %c0_i32 : i32, i32, i32
  }
  func.func @transform_20(%arg0: i32, %arg1: i32) -> (i32, i32, i32, i32) {
    %c0_i32 = arith.constant 0 : i32
    %c0_i32_0 = arith.constant 0 : i32
    %c0_i32_1 = arith.constant 0 : i32
    return %arg0, %c0_i32, %arg1, %c0_i32_0 : i32, i32, i32, i32
  }
  func.func @transform_21(%arg0: i32, %arg1: i32) -> (i32, i32, i32, i32) {
    %c0_i32 = arith.constant 0 : i32
    %c0_i32_0 = arith.constant 0 : i32
    %c0_i32_1 = arith.constant 0 : i32
    return %arg0, %c0_i32, %arg1, %c0_i32_0 : i32, i32, i32, i32
  }
  func.func @transform_22(%arg0: i32, %arg1: i32) -> (i32, i32, i32) {
    %c0_i32 = arith.constant 0 : i32
    %c0_i32_0 = arith.constant 0 : i32
    %c0_i32_1 = arith.constant 0 : i32
    return %arg0, %c0_i32, %c0_i32_0 : i32, i32, i32
  }
}

module attributes {stable_mosaic.version = 11 : i64} {
  func.func @_fused_lexicon_mha_kernel(%arg0: i32, %arg1: i32, %arg2: memref<1x8x32xf32, #tpu.memory_space<vmem>>, %arg3: memref<1x8x32xf32, #tpu.memory_space<vmem>>, %arg4: memref<1x8x32xf32, #tpu.memory_space<vmem>>, %arg5: memref<1x6x32xf32, #tpu.memory_space<vmem>>, %arg6: memref<1x6x32xf32, #tpu.memory_space<vmem>>, %arg7: memref<32x64xbf16, #tpu.memory_space<vmem>>, %arg8: memref<1x64xf32, #tpu.memory_space<vmem>>, %arg9: memref<32x64xbf16, #tpu.memory_space<vmem>>, %arg10: memref<1x64xf32, #tpu.memory_space<vmem>>, %arg11: memref<32x64xbf16, #tpu.memory_space<vmem>>, %arg12: memref<1x64xf32, #tpu.memory_space<vmem>>, %arg13: memref<32x64xbf16, #tpu.memory_space<vmem>>, %arg14: memref<1x64xf32, #tpu.memory_space<vmem>>, %arg15: memref<32x64xbf16, #tpu.memory_space<vmem>>, %arg16: memref<1x64xf32, #tpu.memory_space<vmem>>, %arg17: memref<64x32xbf16, #tpu.memory_space<vmem>>, %arg18: memref<1x32xf32, #tpu.memory_space<vmem>>, %arg19: memref<1x32xf32, #tpu.memory_space<vmem>>, %arg20: memref<1x32xf32, #tpu.memory_space<vmem>>, %arg21: memref<1x8x32xf32, #tpu.memory_space<vmem>>, %arg22: memref<1x4x8x8xf32, #tpu.memory_space<vmem>>, %arg23: memref<1x4x8x6xf32, #tpu.memory_space<vmem>>, %arg24: memref<1x1x1xf32, #tpu.memory_space<vmem>>, %arg25: memref<4x8x16xbf16, #tpu.memory_space<vmem>>, %arg26: memref<4x8x16xbf16, #tpu.memory_space<vmem>>, %arg27: memref<4x6x16xbf16, #tpu.memory_space<vmem>>, %arg28: memref<4x6x16xbf16, #tpu.memory_space<vmem>>) attributes {dimension_semantics = [#tpu.dimension_semantics<parallel>, #tpu.dimension_semantics<arbitrary>], iteration_bounds = array<i64: 2, 1>, scalar_prefetch = 0 : i64, scratch_operands = 4 : i64, tpu.core_type = #tpu.core_type<tc>, window_params = [{transform_indices = @transform_0, window_bounds = array<i64: 1, 8, 32>}, {transform_indices = @transform_1, window_bounds = array<i64: 1, 8, 32>}, {transform_indices = @transform_2, window_bounds = array<i64: 1, 8, 32>}, {transform_indices = @transform_3, window_bounds = array<i64: 1, 6, 32>}, {transform_indices = @transform_4, window_bounds = array<i64: 1, 6, 32>}, {pipeline_mode = #tpu.pipeline_mode<synchronous>, transform_indices = @transform_5, window_bounds = array<i64: 32, 64>}, {pipeline_mode = #tpu.pipeline_mode<synchronous>, transform_indices = @transform_6, window_bounds = array<i64: 1, 64>}, {pipeline_mode = #tpu.pipeline_mode<synchronous>, transform_indices = @transform_7, window_bounds = array<i64: 32, 64>}, {pipeline_mode = #tpu.pipeline_mode<synchronous>, transform_indices = @transform_8, window_bounds = array<i64: 1, 64>}, {pipeline_mode = #tpu.pipeline_mode<synchronous>, transform_indices = @transform_9, window_bounds = array<i64: 32, 64>}, {pipeline_mode = #tpu.pipeline_mode<synchronous>, transform_indices = @transform_10, window_bounds = array<i64: 1, 64>}, {pipeline_mode = #tpu.pipeline_mode<synchronous>, transform_indices = @transform_11, window_bounds = array<i64: 32, 64>}, {pipeline_mode = #tpu.pipeline_mode<synchronous>, transform_indices = @transform_12, window_bounds = array<i64: 1, 64>}, {pipeline_mode = #tpu.pipeline_mode<synchronous>, transform_indices = @transform_13, window_bounds = array<i64: 32, 64>}, {pipeline_mode = #tpu.pipeline_mode<synchronous>, transform_indices = @transform_14, window_bounds = array<i64: 1, 64>}, {pipeline_mode = #tpu.pipeline_mode<synchronous>, transform_indices = @transform_15, window_bounds = array<i64: 64, 32>}, {pipeline_mode = #tpu.pipeline_mode<synchronous>, transform_indices = @transform_16, window_bounds = array<i64: 1, 32>}, {pipeline_mode = #tpu.pipeline_mode<synchronous>, transform_indices = @transform_17, window_bounds = array<i64: 1, 32>}, {pipeline_mode = #tpu.pipeline_mode<synchronous>, transform_indices = @transform_18, window_bounds = array<i64: 1, 32>}, {transform_indices = @transform_19, window_bounds = array<i64: 1, 8, 32>}, {transform_indices = @transform_20, window_bounds = array<i64: 1, 4, 8, 8>}, {transform_indices = @transform_21, window_bounds = array<i64: 1, 4, 8, 6>}, {transform_indices = @transform_22, window_bounds = array<i64: 1, 1, 1>}]} {
    %c0_i32 = arith.constant 0 : i32
    %0 = arith.cmpi eq, %arg1, %c0_i32 : i32
    %1 = arith.extui %0 : i1 to i32
    %c0_i32_0 = arith.constant 0 : i32
    %2 = arith.cmpi ne, %1, %c0_i32_0 : i32
    scf.if %2 {
      %c0_66 = arith.constant 0 : index
      %c0_67 = arith.constant 0 : index
      %c0_68 = arith.constant 0 : index
      %122 = vector.load %arg3[%c0_66, %c0_67, %c0_68] : memref<1x8x32xf32, #tpu.memory_space<vmem>>, vector<1x8x32xf32>
      %123 = vector.shape_cast %122 : vector<1x8x32xf32> to vector<8x32xf32>
      %124 = arith.truncf %123 : vector<8x32xf32> to vector<8x32xbf16>
      %c0_69 = arith.constant 0 : index
      %c0_70 = arith.constant 0 : index
      %125 = vector.load %arg9[%c0_69, %c0_70] : memref<32x64xbf16, #tpu.memory_space<vmem>>, vector<32x64xbf16>
      %cst_71 = arith.constant dense<0.000000e+00> : vector<8x64xf32>
      %126 = tpu.matmul %124, %125, %cst_71 {dimension_numbers = #tpu.dot_dimension_numbers<[1], [0], [0], [1], [0, 0, 1, 1], [], []>} : vector<8x32xbf16>, vector<32x64xbf16>, vector<8x64xf32> -> vector<8x64xf32>
      %c0_72 = arith.constant 0 : index
      %c0_73 = arith.constant 0 : index
      %127 = vector.load %arg10[%c0_72, %c0_73] : memref<1x64xf32, #tpu.memory_space<vmem>>, vector<1x64xf32>
      %128 = vector.broadcast %127 : vector<1x64xf32> to vector<8x64xf32>
      %129 = arith.addf %126, %128 : vector<8x64xf32>
      %130 = arith.truncf %129 : vector<8x64xf32> to vector<8x64xbf16>
      %131 = vector.extract_strided_slice %130 {offsets = [0, 0], sizes = [8, 16], strides = [1, 1]} : vector<8x64xbf16> to vector<8x16xbf16>
      %132 = vector.extract_strided_slice %130 {offsets = [0, 16], sizes = [8, 16], strides = [1, 1]} : vector<8x64xbf16> to vector<8x16xbf16>
      %133 = vector.extract_strided_slice %130 {offsets = [0, 32], sizes = [8, 16], strides = [1, 1]} : vector<8x64xbf16> to vector<8x16xbf16>
      %134 = vector.extract_strided_slice %130 {offsets = [0, 48], sizes = [8, 16], strides = [1, 1]} : vector<8x64xbf16> to vector<8x16xbf16>
      %135 = vector.shape_cast %131 : vector<8x16xbf16> to vector<1x8x16xbf16>
      %136 = vector.shape_cast %132 : vector<8x16xbf16> to vector<1x8x16xbf16>
      %137 = vector.shape_cast %133 : vector<8x16xbf16> to vector<1x8x16xbf16>
      %138 = vector.shape_cast %134 : vector<8x16xbf16> to vector<1x8x16xbf16>
      %139 = tpu.concatenate %135, %136, %137, %138 in 0 : vector<1x8x16xbf16>, vector<1x8x16xbf16>, vector<1x8x16xbf16>, vector<1x8x16xbf16> -> vector<4x8x16xbf16>
      %c0_74 = arith.constant 0 : index
      %c0_75 = arith.constant 0 : index
      %c0_76 = arith.constant 0 : index
      %140 = vector.load %arg25[%c0_74, %c0_75, %c0_76] : memref<4x8x16xbf16, #tpu.memory_space<vmem>>, vector<4x8x16xbf16>
      tpu.vector_store %arg25[%c0_74, %c0_75, %c0_76], %139 {strides = array<i32>} : memref<4x8x16xbf16, #tpu.memory_space<vmem>>, vector<4x8x16xbf16>,
      %c0_77 = arith.constant 0 : index
      %c0_78 = arith.constant 0 : index
      %c0_79 = arith.constant 0 : index
      %141 = vector.load %arg4[%c0_77, %c0_78, %c0_79] : memref<1x8x32xf32, #tpu.memory_space<vmem>>, vector<1x8x32xf32>
      %142 = vector.shape_cast %141 : vector<1x8x32xf32> to vector<8x32xf32>
      %143 = arith.truncf %142 : vector<8x32xf32> to vector<8x32xbf16>
      %c0_80 = arith.constant 0 : index
      %c0_81 = arith.constant 0 : index
      %144 = vector.load %arg11[%c0_80, %c0_81] : memref<32x64xbf16, #tpu.memory_space<vmem>>, vector<32x64xbf16>
      %cst_82 = arith.constant dense<0.000000e+00> : vector<8x64xf32>
      %145 = tpu.matmul %143, %144, %cst_82 {dimension_numbers = #tpu.dot_dimension_numbers<[1], [0], [0], [1], [0, 0, 1, 1], [], []>} : vector<8x32xbf16>, vector<32x64xbf16>, vector<8x64xf32> -> vector<8x64xf32>
      %c0_83 = arith.constant 0 : index
      %c0_84 = arith.constant 0 : index
      %146 = vector.load %arg12[%c0_83, %c0_84] : memref<1x64xf32, #tpu.memory_space<vmem>>, vector<1x64xf32>
      %147 = vector.broadcast %146 : vector<1x64xf32> to vector<8x64xf32>
      %148 = arith.addf %145, %147 : vector<8x64xf32>
      %149 = arith.truncf %148 : vector<8x64xf32> to vector<8x64xbf16>
      %150 = vector.extract_strided_slice %149 {offsets = [0, 0], sizes = [8, 16], strides = [1, 1]} : vector<8x64xbf16> to vector<8x16xbf16>
      %151 = vector.extract_strided_slice %149 {offsets = [0, 16], sizes = [8, 16], strides = [1, 1]} : vector<8x64xbf16> to vector<8x16xbf16>
      %152 = vector.extract_strided_slice %149 {offsets = [0, 32], sizes = [8, 16], strides = [1, 1]} : vector<8x64xbf16> to vector<8x16xbf16>
      %153 = vector.extract_strided_slice %149 {offsets = [0, 48], sizes = [8, 16], strides = [1, 1]} : vector<8x64xbf16> to vector<8x16xbf16>
      %154 = vector.shape_cast %150 : vector<8x16xbf16> to vector<1x8x16xbf16>
      %155 = vector.shape_cast %151 : vector<8x16xbf16> to vector<1x8x16xbf16>
      %156 = vector.shape_cast %152 : vector<8x16xbf16> to vector<1x8x16xbf16>
      %157 = vector.shape_cast %153 : vector<8x16xbf16> to vector<1x8x16xbf16>
      %158 = tpu.concatenate %154, %155, %156, %157 in 0 : vector<1x8x16xbf16>, vector<1x8x16xbf16>, vector<1x8x16xbf16>, vector<1x8x16xbf16> -> vector<4x8x16xbf16>
      %c0_85 = arith.constant 0 : index
      %c0_86 = arith.constant 0 : index
      %c0_87 = arith.constant 0 : index
      %159 = vector.load %arg26[%c0_85, %c0_86, %c0_87] : memref<4x8x16xbf16, #tpu.memory_space<vmem>>, vector<4x8x16xbf16>
      tpu.vector_store %arg26[%c0_85, %c0_86, %c0_87], %158 {strides = array<i32>} : memref<4x8x16xbf16, #tpu.memory_space<vmem>>, vector<4x8x16xbf16>,
      %c0_88 = arith.constant 0 : index
      %c0_89 = arith.constant 0 : index
      %c0_90 = arith.constant 0 : index
      %160 = vector.load %arg5[%c0_88, %c0_89, %c0_90] : memref<1x6x32xf32, #tpu.memory_space<vmem>>, vector<1x6x32xf32>
      %161 = vector.shape_cast %160 : vector<1x6x32xf32> to vector<6x32xf32>
      %162 = arith.truncf %161 : vector<6x32xf32> to vector<6x32xbf16>
      %c0_91 = arith.constant 0 : index
      %c0_92 = arith.constant 0 : index
      %163 = vector.load %arg13[%c0_91, %c0_92] : memref<32x64xbf16, #tpu.memory_space<vmem>>, vector<32x64xbf16>
      %cst_93 = arith.constant dense<0.000000e+00> : vector<6x64xf32>
      %164 = tpu.matmul %162, %163, %cst_93 {dimension_numbers = #tpu.dot_dimension_numbers<[1], [0], [0], [1], [0, 0, 1, 1], [], []>} : vector<6x32xbf16>, vector<32x64xbf16>, vector<6x64xf32> -> vector<6x64xf32>
      %c0_94 = arith.constant 0 : index
      %c0_95 = arith.constant 0 : index
      %165 = vector.load %arg14[%c0_94, %c0_95] : memref<1x64xf32, #tpu.memory_space<vmem>>, vector<1x64xf32>
      %166 = vector.broadcast %165 : vector<1x64xf32> to vector<6x64xf32>
      %167 = arith.addf %164, %166 : vector<6x64xf32>
      %168 = arith.truncf %167 : vector<6x64xf32> to vector<6x64xbf16>
      %169 = vector.extract_strided_slice %168 {offsets = [0, 0], sizes = [6, 16], strides = [1, 1]} : vector<6x64xbf16> to vector<6x16xbf16>
      %170 = vector.extract_strided_slice %168 {offsets = [0, 16], sizes = [6, 16], strides = [1, 1]} : vector<6x64xbf16> to vector<6x16xbf16>
      %171 = vector.extract_strided_slice %168 {offsets = [0, 32], sizes = [6, 16], strides = [1, 1]} : vector<6x64xbf16> to vector<6x16xbf16>
      %172 = vector.extract_strided_slice %168 {offsets = [0, 48], sizes = [6, 16], strides = [1, 1]} : vector<6x64xbf16> to vector<6x16xbf16>
      %173 = vector.shape_cast %169 : vector<6x16xbf16> to vector<1x6x16xbf16>
      %174 = vector.shape_cast %170 : vector<6x16xbf16> to vector<1x6x16xbf16>
      %175 = vector.shape_cast %171 : vector<6x16xbf16> to vector<1x6x16xbf16>
      %176 = vector.shape_cast %172 : vector<6x16xbf16> to vector<1x6x16xbf16>
      %177 = tpu.concatenate %173, %174, %175, %176 in 0 : vector<1x6x16xbf16>, vector<1x6x16xbf16>, vector<1x6x16xbf16>, vector<1x6x16xbf16> -> vector<4x6x16xbf16>
      %c0_96 = arith.constant 0 : index
      %c0_97 = arith.constant 0 : index
      %c0_98 = arith.constant 0 : index
      %178 = vector.load %arg27[%c0_96, %c0_97, %c0_98] : memref<4x6x16xbf16, #tpu.memory_space<vmem>>, vector<4x6x16xbf16>
      tpu.vector_store %arg27[%c0_96, %c0_97, %c0_98], %177 {strides = array<i32>} : memref<4x6x16xbf16, #tpu.memory_space<vmem>>, vector<4x6x16xbf16>,
      %c0_99 = arith.constant 0 : index
      %c0_100 = arith.constant 0 : index
      %c0_101 = arith.constant 0 : index
      %179 = vector.load %arg6[%c0_99, %c0_100, %c0_101] : memref<1x6x32xf32, #tpu.memory_space<vmem>>, vector<1x6x32xf32>
      %180 = vector.shape_cast %179 : vector<1x6x32xf32> to vector<6x32xf32>
      %181 = arith.truncf %180 : vector<6x32xf32> to vector<6x32xbf16>
      %c0_102 = arith.constant 0 : index
      %c0_103 = arith.constant 0 : index
      %182 = vector.load %arg15[%c0_102, %c0_103] : memref<32x64xbf16, #tpu.memory_space<vmem>>, vector<32x64xbf16>
      %cst_104 = arith.constant dense<0.000000e+00> : vector<6x64xf32>
      %183 = tpu.matmul %181, %182, %cst_104 {dimension_numbers = #tpu.dot_dimension_numbers<[1], [0], [0], [1], [0, 0, 1, 1], [], []>} : vector<6x32xbf16>, vector<32x64xbf16>, vector<6x64xf32> -> vector<6x64xf32>
      %c0_105 = arith.constant 0 : index
      %c0_106 = arith.constant 0 : index
      %184 = vector.load %arg16[%c0_105, %c0_106] : memref<1x64xf32, #tpu.memory_space<vmem>>, vector<1x64xf32>
      %185 = vector.broadcast %184 : vector<1x64xf32> to vector<6x64xf32>
      %186 = arith.addf %183, %185 : vector<6x64xf32>
      %187 = arith.truncf %186 : vector<6x64xf32> to vector<6x64xbf16>
      %188 = vector.extract_strided_slice %187 {offsets = [0, 0], sizes = [6, 16], strides = [1, 1]} : vector<6x64xbf16> to vector<6x16xbf16>
      %189 = vector.extract_strided_slice %187 {offsets = [0, 16], sizes = [6, 16], strides = [1, 1]} : vector<6x64xbf16> to vector<6x16xbf16>
      %190 = vector.extract_strided_slice %187 {offsets = [0, 32], sizes = [6, 16], strides = [1, 1]} : vector<6x64xbf16> to vector<6x16xbf16>
      %191 = vector.extract_strided_slice %187 {offsets = [0, 48], sizes = [6, 16], strides = [1, 1]} : vector<6x64xbf16> to vector<6x16xbf16>
      %192 = vector.shape_cast %188 : vector<6x16xbf16> to vector<1x6x16xbf16>
      %193 = vector.shape_cast %189 : vector<6x16xbf16> to vector<1x6x16xbf16>
      %194 = vector.shape_cast %190 : vector<6x16xbf16> to vector<1x6x16xbf16>
      %195 = vector.shape_cast %191 : vector<6x16xbf16> to vector<1x6x16xbf16>
      %196 = tpu.concatenate %192, %193, %194, %195 in 0 : vector<1x6x16xbf16>, vector<1x6x16xbf16>, vector<1x6x16xbf16>, vector<1x6x16xbf16> -> vector<4x6x16xbf16>
      %c0_107 = arith.constant 0 : index
      %c0_108 = arith.constant 0 : index
      %c0_109 = arith.constant 0 : index
      %197 = vector.load %arg28[%c0_107, %c0_108, %c0_109] : memref<4x6x16xbf16, #tpu.memory_space<vmem>>, vector<4x6x16xbf16>
      tpu.vector_store %arg28[%c0_107, %c0_108, %c0_109], %196 {strides = array<i32>} : memref<4x6x16xbf16, #tpu.memory_space<vmem>>, vector<4x6x16xbf16>,
    } else {
    }
    %c0 = arith.constant 0 : index
    %c0_1 = arith.constant 0 : index
    %c0_2 = arith.constant 0 : index
    %3 = vector.load %arg2[%c0, %c0_1, %c0_2] : memref<1x8x32xf32, #tpu.memory_space<vmem>>, vector<1x8x32xf32>
    %4 = vector.shape_cast %3 : vector<1x8x32xf32> to vector<8x32xf32>
    %5 = arith.truncf %4 : vector<8x32xf32> to vector<8x32xbf16>
    %c0_3 = arith.constant 0 : index
    %c0_4 = arith.constant 0 : index
    %6 = vector.load %arg7[%c0_3, %c0_4] : memref<32x64xbf16, #tpu.memory_space<vmem>>, vector<32x64xbf16>
    %cst = arith.constant dense<0.000000e+00> : vector<8x64xf32>
    %7 = tpu.matmul %5, %6, %cst {dimension_numbers = #tpu.dot_dimension_numbers<[1], [0], [0], [1], [0, 0, 1, 1], [], []>} : vector<8x32xbf16>, vector<32x64xbf16>, vector<8x64xf32> -> vector<8x64xf32>
    %c0_5 = arith.constant 0 : index
    %c0_6 = arith.constant 0 : index
    %8 = vector.load %arg8[%c0_5, %c0_6] : memref<1x64xf32, #tpu.memory_space<vmem>>, vector<1x64xf32>
    %9 = vector.broadcast %8 : vector<1x64xf32> to vector<8x64xf32>
    %10 = arith.addf %7, %9 : vector<8x64xf32>
    %11 = arith.truncf %10 : vector<8x64xf32> to vector<8x64xbf16>
    %12 = vector.extract_strided_slice %11 {offsets = [0, 0], sizes = [8, 16], strides = [1, 1]} : vector<8x64xbf16> to vector<8x16xbf16>
    %13 = vector.extract_strided_slice %11 {offsets = [0, 16], sizes = [8, 16], strides = [1, 1]} : vector<8x64xbf16> to vector<8x16xbf16>
    %14 = vector.extract_strided_slice %11 {offsets = [0, 32], sizes = [8, 16], strides = [1, 1]} : vector<8x64xbf16> to vector<8x16xbf16>
    %15 = vector.extract_strided_slice %11 {offsets = [0, 48], sizes = [8, 16], strides = [1, 1]} : vector<8x64xbf16> to vector<8x16xbf16>
    %16 = vector.shape_cast %12 : vector<8x16xbf16> to vector<1x8x16xbf16>
    %17 = vector.shape_cast %13 : vector<8x16xbf16> to vector<1x8x16xbf16>
    %18 = vector.shape_cast %14 : vector<8x16xbf16> to vector<1x8x16xbf16>
    %19 = vector.shape_cast %15 : vector<8x16xbf16> to vector<1x8x16xbf16>
    %20 = tpu.concatenate %16, %17, %18, %19 in 0 : vector<1x8x16xbf16>, vector<1x8x16xbf16>, vector<1x8x16xbf16>, vector<1x8x16xbf16> -> vector<4x8x16xbf16>
    %c0_7 = arith.constant 0 : index
    %c0_8 = arith.constant 0 : index
    %c0_9 = arith.constant 0 : index
    %21 = vector.load %arg25[%c0_7, %c0_8, %c0_9] : memref<4x8x16xbf16, #tpu.memory_space<vmem>>, vector<4x8x16xbf16>
    "tpu.trace_start"() <{level = 10 : i32, message = "hqd,hkd->hqk"}> : () -> ()
    %cst_10 = arith.constant dense<0.000000e+00> : vector<4x8x8xf32>
    %22 = tpu.matmul %20, %21, %cst_10 {dimension_numbers = #tpu.dot_dimension_numbers<[2], [2], [1], [1], [0, 0, 0, 1, 1, 1], [0], [0]>} : vector<4x8x16xbf16>, vector<4x8x16xbf16>, vector<4x8x8xf32> -> vector<4x8x8xf32>
    "tpu.trace_stop"() : () -> ()
    %cst_11 = arith.constant dense<0xFF800000> : vector<4x8xf32>
    %23 = vector.multi_reduction <maximumf>, %22, %cst_11 [2] : vector<4x8x8xf32> to vector<4x8xf32>
    %24 = vector.shape_cast %23 : vector<4x8xf32> to vector<4x8x1xf32>
    %25 = vector.broadcast %24 : vector<4x8x1xf32> to vector<4x8x8xf32>
    %26 = arith.subf %22, %25 : vector<4x8x8xf32>
    %27 = math.exp %26 : vector<4x8x8xf32>
    %cst_12 = arith.constant dense<0.000000e+00> : vector<4x8xf32>
    %28 = vector.multi_reduction <add>, %27, %cst_12 [2] : vector<4x8x8xf32> to vector<4x8xf32>
    %29 = vector.shape_cast %28 : vector<4x8xf32> to vector<4x8x1xf32>
    %30 = vector.broadcast %29 : vector<4x8x1xf32> to vector<4x8x8xf32>
    %31 = arith.divf %27, %30 : vector<4x8x8xf32>
    %c0_13 = arith.constant 0 : index
    %c0_14 = arith.constant 0 : index
    %c0_15 = arith.constant 0 : index
    %32 = vector.load %arg27[%c0_13, %c0_14, %c0_15] : memref<4x6x16xbf16, #tpu.memory_space<vmem>>, vector<4x6x16xbf16>
    "tpu.trace_start"() <{level = 10 : i32, message = "hqd,hkd->hqk"}> : () -> ()
    %cst_16 = arith.constant dense<0.000000e+00> : vector<4x8x6xf32>
    %33 = tpu.matmul %20, %32, %cst_16 {dimension_numbers = #tpu.dot_dimension_numbers<[2], [2], [1], [1], [0, 0, 0, 1, 1, 1], [0], [0]>} : vector<4x8x16xbf16>, vector<4x6x16xbf16>, vector<4x8x6xf32> -> vector<4x8x6xf32>
    "tpu.trace_stop"() : () -> ()
    %cst_17 = arith.constant dense<0xFF800000> : vector<4x8xf32>
    %34 = vector.multi_reduction <maximumf>, %33, %cst_17 [2] : vector<4x8x6xf32> to vector<4x8xf32>
    %35 = vector.shape_cast %34 : vector<4x8xf32> to vector<4x8x1xf32>
    %36 = vector.broadcast %35 : vector<4x8x1xf32> to vector<4x8x6xf32>
    %37 = arith.subf %33, %36 : vector<4x8x6xf32>
    %38 = math.exp %37 : vector<4x8x6xf32>
    %cst_18 = arith.constant dense<0.000000e+00> : vector<4x8xf32>
    %39 = vector.multi_reduction <add>, %38, %cst_18 [2] : vector<4x8x6xf32> to vector<4x8xf32>
    %40 = vector.shape_cast %39 : vector<4x8xf32> to vector<4x8x1xf32>
    %41 = vector.broadcast %40 : vector<4x8x1xf32> to vector<4x8x6xf32>
    %42 = arith.divf %38, %41 : vector<4x8x6xf32>
    %43 = arith.truncf %31 : vector<4x8x8xf32> to vector<4x8x8xbf16>
    %c0_19 = arith.constant 0 : index
    %c0_20 = arith.constant 0 : index
    %c0_21 = arith.constant 0 : index
    %44 = vector.load %arg26[%c0_19, %c0_20, %c0_21] : memref<4x8x16xbf16, #tpu.memory_space<vmem>>, vector<4x8x16xbf16>
    "tpu.trace_start"() <{level = 10 : i32, message = "hqk,hkd->hqd"}> : () -> ()
    %cst_22 = arith.constant dense<0.000000e+00> : vector<4x8x16xf32>
    %45 = tpu.matmul %43, %44, %cst_22 {dimension_numbers = #tpu.dot_dimension_numbers<[2], [1], [1], [2], [0, 0, 0, 1, 1, 2], [0], [0]>} : vector<4x8x8xbf16>, vector<4x8x16xbf16>, vector<4x8x16xf32> -> vector<4x8x16xf32>
    "tpu.trace_stop"() : () -> ()
    %46 = arith.truncf %42 : vector<4x8x6xf32> to vector<4x8x6xbf16>
    %c0_23 = arith.constant 0 : index
    %c0_24 = arith.constant 0 : index
    %c0_25 = arith.constant 0 : index
    %47 = vector.load %arg28[%c0_23, %c0_24, %c0_25] : memref<4x6x16xbf16, #tpu.memory_space<vmem>>, vector<4x6x16xbf16>
    "tpu.trace_start"() <{level = 10 : i32, message = "hqk,hkd->hqd"}> : () -> ()
    %cst_26 = arith.constant dense<0.000000e+00> : vector<4x8x16xf32>
    %48 = tpu.matmul %46, %47, %cst_26 {dimension_numbers = #tpu.dot_dimension_numbers<[2], [1], [1], [2], [0, 0, 0, 1, 1, 2], [0], [0]>} : vector<4x8x6xbf16>, vector<4x6x16xbf16>, vector<4x8x16xf32> -> vector<4x8x16xf32>
    "tpu.trace_stop"() : () -> ()
    %cst_27 = arith.constant 5.000000e-01 : f32
    %49 = vector.broadcast %cst_27 : f32 to vector<4x8x16xf32>
    %50 = arith.mulf %49, %45 : vector<4x8x16xf32>
    %cst_28 = arith.constant 5.000000e-01 : f32
    %51 = vector.broadcast %cst_28 : f32 to vector<4x8x16xf32>
    %52 = arith.mulf %51, %48 : vector<4x8x16xf32>
    %53 = arith.addf %50, %52 : vector<4x8x16xf32>
    %54 = vector.extract_strided_slice %53 {offsets = [0, 0, 0], sizes = [1, 8, 16], strides = [1, 1, 1]} : vector<4x8x16xf32> to vector<1x8x16xf32>
    %55 = vector.shape_cast %54 : vector<1x8x16xf32> to vector<8x16xf32>
    %56 = vector.extract_strided_slice %53 {offsets = [1, 0, 0], sizes = [1, 8, 16], strides = [1, 1, 1]} : vector<4x8x16xf32> to vector<1x8x16xf32>
    %57 = vector.shape_cast %56 : vector<1x8x16xf32> to vector<8x16xf32>
    %58 = vector.extract_strided_slice %53 {offsets = [2, 0, 0], sizes = [1, 8, 16], strides = [1, 1, 1]} : vector<4x8x16xf32> to vector<1x8x16xf32>
    %59 = vector.shape_cast %58 : vector<1x8x16xf32> to vector<8x16xf32>
    %60 = vector.extract_strided_slice %53 {offsets = [3, 0, 0], sizes = [1, 8, 16], strides = [1, 1, 1]} : vector<4x8x16xf32> to vector<1x8x16xf32>
    %61 = vector.shape_cast %60 : vector<1x8x16xf32> to vector<8x16xf32>
    %62 = tpu.concatenate %55, %57, %59, %61 in 1 : vector<8x16xf32>, vector<8x16xf32>, vector<8x16xf32>, vector<8x16xf32> -> vector<8x64xf32>
    %63 = arith.truncf %62 : vector<8x64xf32> to vector<8x64xbf16>
    %c0_29 = arith.constant 0 : index
    %c0_30 = arith.constant 0 : index
    %64 = vector.load %arg17[%c0_29, %c0_30] : memref<64x32xbf16, #tpu.memory_space<vmem>>, vector<64x32xbf16>
    %cst_31 = arith.constant dense<0.000000e+00> : vector<8x32xf32>
    %65 = tpu.matmul %63, %64, %cst_31 {dimension_numbers = #tpu.dot_dimension_numbers<[1], [0], [0], [1], [0, 0, 1, 1], [], []>} : vector<8x64xbf16>, vector<64x32xbf16>, vector<8x32xf32> -> vector<8x32xf32>
    %c0_32 = arith.constant 0 : index
    %c0_33 = arith.constant 0 : index
    %66 = vector.load %arg18[%c0_32, %c0_33] : memref<1x32xf32, #tpu.memory_space<vmem>>, vector<1x32xf32>
    %67 = vector.broadcast %66 : vector<1x32xf32> to vector<8x32xf32>
    %68 = arith.addf %65, %67 : vector<8x32xf32>
    %69 = arith.addf %68, %4 : vector<8x32xf32>
    %cst_34 = arith.constant dense<0.000000e+00> : vector<8xf32>
    %70 = vector.multi_reduction <add>, %69, %cst_34 [1] : vector<8x32xf32> to vector<8xf32>
    %71 = vector.shape_cast %70 : vector<8xf32> to vector<8x1xf32>
    %cst_35 = arith.constant 3.200000e+01 : f32
    %72 = vector.broadcast %cst_35 : f32 to vector<8x1xf32>
    %73 = arith.divf %71, %72 : vector<8x1xf32>
    %74 = vector.broadcast %73 : vector<8x1xf32> to vector<8x32xf32>
    %75 = arith.subf %69, %74 : vector<8x32xf32>
    %76 = arith.mulf %75, %75 : vector<8x32xf32>
    %cst_36 = arith.constant dense<0.000000e+00> : vector<8xf32>
    %77 = vector.multi_reduction <add>, %76, %cst_36 [1] : vector<8x32xf32> to vector<8xf32>
    %78 = vector.shape_cast %77 : vector<8xf32> to vector<8x1xf32>
    %cst_37 = arith.constant 3.200000e+01 : f32
    %79 = vector.broadcast %cst_37 : f32 to vector<8x1xf32>
    %80 = arith.divf %78, %79 : vector<8x1xf32>
    %81 = vector.broadcast %73 : vector<8x1xf32> to vector<8x32xf32>
    %82 = arith.subf %69, %81 : vector<8x32xf32>
    %cst_38 = arith.constant 9.99999974E-6 : f32
    %83 = vector.broadcast %cst_38 : f32 to vector<8x1xf32>
    %84 = arith.addf %80, %83 : vector<8x1xf32>
    %85 = math.rsqrt %84 : vector<8x1xf32>
    %86 = vector.broadcast %85 : vector<8x1xf32> to vector<8x32xf32>
    %87 = arith.mulf %82, %86 : vector<8x32xf32>
    %c0_39 = arith.constant 0 : index
    %c0_40 = arith.constant 0 : index
    %88 = vector.load %arg19[%c0_39, %c0_40] : memref<1x32xf32, #tpu.memory_space<vmem>>, vector<1x32xf32>
    %89 = vector.broadcast %88 : vector<1x32xf32> to vector<8x32xf32>
    %90 = arith.mulf %87, %89 : vector<8x32xf32>
    %c0_41 = arith.constant 0 : index
    %c0_42 = arith.constant 0 : index
    %91 = vector.load %arg20[%c0_41, %c0_42] : memref<1x32xf32, #tpu.memory_space<vmem>>, vector<1x32xf32>
    %92 = vector.broadcast %91 : vector<1x32xf32> to vector<8x32xf32>
    %93 = arith.addf %90, %92 : vector<8x32xf32>
    %c0_43 = arith.constant 0 : index
    %c0_44 = arith.constant 0 : index
    %c0_45 = arith.constant 0 : index
    %94 = vector.load %arg21[%c0_43, %c0_44, %c0_45] : memref<1x8x32xf32, #tpu.memory_space<vmem>>, vector<1x8x32xf32>
    %95 = vector.shape_cast %94 : vector<1x8x32xf32> to vector<8x32xf32>
    %96 = vector.shape_cast %93 : vector<8x32xf32> to vector<1x8x32xf32>
    tpu.vector_store %arg21[%c0_43, %c0_44, %c0_45], %96 {strides = array<i32>} : memref<1x8x32xf32, #tpu.memory_space<vmem>>, vector<1x8x32xf32>,
    %c0_46 = arith.constant 0 : index
    %c0_47 = arith.constant 0 : index
    %c0_48 = arith.constant 0 : index
    %c0_49 = arith.constant 0 : index
    %97 = vector.load %arg22[%c0_46, %c0_47, %c0_48, %c0_49] : memref<1x4x8x8xf32, #tpu.memory_space<vmem>>, vector<1x4x8x8xf32>
    %98 = vector.shape_cast %97 : vector<1x4x8x8xf32> to vector<4x8x8xf32>
    %99 = vector.shape_cast %31 : vector<4x8x8xf32> to vector<1x4x8x8xf32>
    tpu.vector_store %arg22[%c0_46, %c0_47, %c0_48, %c0_49], %99 {strides = array<i32>} : memref<1x4x8x8xf32, #tpu.memory_space<vmem>>, vector<1x4x8x8xf32>,
    %c0_50 = arith.constant 0 : index
    %c0_51 = arith.constant 0 : index
    %c0_52 = arith.constant 0 : index
    %c0_53 = arith.constant 0 : index
    %100 = vector.load %arg23[%c0_50, %c0_51, %c0_52, %c0_53] : memref<1x4x8x6xf32, #tpu.memory_space<vmem>>, vector<1x4x8x6xf32>
    %101 = vector.shape_cast %100 : vector<1x4x8x6xf32> to vector<4x8x6xf32>
    %102 = vector.shape_cast %42 : vector<4x8x6xf32> to vector<1x4x8x6xf32>
    tpu.vector_store %arg23[%c0_50, %c0_51, %c0_52, %c0_53], %102 {strides = array<i32>} : memref<1x4x8x6xf32, #tpu.memory_space<vmem>>, vector<1x4x8x6xf32>,
    %cst_54 = arith.constant dense<0.000000e+00> : vector<8x8xf32>
    %103 = vector.multi_reduction <add>, %31, %cst_54 [0] : vector<4x8x8xf32> to vector<8x8xf32>
    %104 = arith.mulf %31, %31 : vector<4x8x8xf32>
    %cst_55 = arith.constant dense<0.000000e+00> : vector<8x8xf32>
    %105 = vector.multi_reduction <add>, %104, %cst_55 [0] : vector<4x8x8xf32> to vector<8x8xf32>
    %106 = arith.mulf %103, %103 : vector<8x8xf32>
    %107 = arith.subf %106, %105 : vector<8x8xf32>
    %108 = vector.shape_cast %107 : vector<8x8xf32> to vector<1x8x8xf32>
    %cst_56 = arith.constant dense<0.000000e+00> : vector<1xf32>
    %109 = vector.multi_reduction <add>, %108, %cst_56 [1, 2] : vector<1x8x8xf32> to vector<1xf32>
    %110 = vector.shape_cast %109 : vector<1xf32> to vector<1x1x1xf32>
    %111 = vector.extract %110[0, 0, 0] : f32 from vector<1x1x1xf32>
    %112 = vector.broadcast %111 : f32 to vector<1x1xf32>
    %cst_57 = arith.constant 0.000000e+00 : f32
    %113 = vector.broadcast %cst_57 : f32 to vector<1x1xf32>
    %114 = arith.maximumf %112, %113 : vector<1x1xf32>
    %c0_i32_58 = arith.constant 0 : i32
    %115 = arith.cmpi eq, %arg1, %c0_i32_58 : i32
    %116 = arith.extui %115 : i1 to i32
    %c0_i32_59 = arith.constant 0 : i32
    %117 = arith.cmpi ne, %116, %c0_i32_59 : i32
    scf.if %117 {
      %cst_66 = arith.constant 0.000000e+00 : f32
      %122 = vector.broadcast %cst_66 : f32 to vector<1x1x1xf32>
      %c0_67 = arith.constant 0 : index
      %c0_68 = arith.constant 0 : index
      %c0_69 = arith.constant 0 : index
      %123 = vector.load %arg24[%c0_67, %c0_68, %c0_69] : memref<1x1x1xf32, #tpu.memory_space<vmem>>, vector<1x1x1xf32>
      tpu.vector_store %arg24[%c0_67, %c0_68, %c0_69], %122 {strides = array<i32>} : memref<1x1x1xf32, #tpu.memory_space<vmem>>, vector<1x1x1xf32>,
    } else {
    }
    %c0_60 = arith.constant 0 : index
    %c0_61 = arith.constant 0 : index
    %c0_62 = arith.constant 0 : index
    %118 = vector.load %arg24[%c0_60, %c0_61, %c0_62] : memref<1x1x1xf32, #tpu.memory_space<vmem>>, vector<1x1x1xf32>
    %119 = vector.shape_cast %114 : vector<1x1xf32> to vector<1x1x1xf32>
    %120 = arith.addf %118, %119 : vector<1x1x1xf32>
    %c0_63 = arith.constant 0 : index
    %c0_64 = arith.constant 0 : index
    %c0_65 = arith.constant 0 : index
    %121 = vector.load %arg24[%c0_63, %c0_64, %c0_65] : memref<1x1x1xf32, #tpu.memory_space<vmem>>, vector<1x1x1xf32>
    tpu.vector_store %arg24[%c0_63, %c0_64, %c0_65], %120 {strides = array<i32>} : memref<1x1x1xf32, #tpu.memory_space<vmem>>, vector<1x1x1xf32>,
    return
  }
  func.func @transform_0(%arg0: i32, %arg1: i32) -> (i32, i32, i32) {
    %c0_i32 = arith.constant 0 : i32
    %c0_i32_0 = arith.constant 0 : i32
    return %arg0, %arg1, %c0_i32 : i32, i32, i32
  }
  func.func @transform_1(%arg0: i32, %arg1: i32) -> (i32, i32, i32) {
    %c0_i32 = arith.constant 0 : i32
    %c0_i32_0 = arith.constant 0 : i32
    %c0_i32_1 = arith.constant 0 : i32
    return %arg0, %c0_i32, %c0_i32_0 : i32, i32, i32
  }
  func.func @transform_2(%arg0: i32, %arg1: i32) -> (i32, i32, i32) {
    %c0_i32 = arith.constant 0 : i32
    %c0_i32_0 = arith.constant 0 : i32
    %c0_i32_1 = arith.constant 0 : i32
    return %arg0, %c0_i32, %c0_i32_0 : i32, i32, i32
  }
  func.func @transform_3(%arg0: i32, %arg1: i32) -> (i32, i32, i32) {
    %c0_i32 = arith.constant 0 : i32
    %c0_i32_0 = arith.constant 0 : i32
    %c0_i32_1 = arith.constant 0 : i32
    return %arg0, %c0_i32, %c0_i32_0 : i32, i32, i32
  }
  func.func @transform_4(%arg0: i32, %arg1: i32) -> (i32, i32, i32) {
    %c0_i32 = arith.constant 0 : i32
    %c0_i32_0 = arith.constant 0 : i32
    %c0_i32_1 = arith.constant 0 : i32
    return %arg0, %c0_i32, %c0_i32_0 : i32, i32, i32
  }
  func.func @transform_5(%arg0: i32, %arg1: i32) -> (i32, i32) {
    %c0_i32 = arith.constant 0 : i32
    %c0_i32_0 = arith.constant 0 : i32
    %c0_i32_1 = arith.constant 0 : i32
    return %c0_i32, %c0_i32_0 : i32, i32
  }
  func.func @transform_6(%arg0: i32, %arg1: i32) -> (i32, i32) {
    %c0_i32 = arith.constant 0 : i32
    %c0_i32_0 = arith.constant 0 : i32
    %c0_i32_1 = arith.constant 0 : i32
    return %c0_i32, %c0_i32_0 : i32, i32
  }
  func.func @transform_7(%arg0: i32, %arg1: i32) -> (i32, i32) {
    %c0_i32 = arith.constant 0 : i32
    %c0_i32_0 = arith.constant 0 : i32
    %c0_i32_1 = arith.constant 0 : i32
    return %c0_i32, %c0_i32_0 : i32, i32
  }
  func.func @transform_8(%arg0: i32, %arg1: i32) -> (i32, i32) {
    %c0_i32 = arith.constant 0 : i32
    %c0_i32_0 = arith.constant 0 : i32
    %c0_i32_1 = arith.constant 0 : i32
    return %c0_i32, %c0_i32_0 : i32, i32
  }
  func.func @transform_9(%arg0: i32, %arg1: i32) -> (i32, i32) {
    %c0_i32 = arith.constant 0 : i32
    %c0_i32_0 = arith.constant 0 : i32
    %c0_i32_1 = arith.constant 0 : i32
    return %c0_i32, %c0_i32_0 : i32, i32
  }
  func.func @transform_10(%arg0: i32, %arg1: i32) -> (i32, i32) {
    %c0_i32 = arith.constant 0 : i32
    %c0_i32_0 = arith.constant 0 : i32
    %c0_i32_1 = arith.constant 0 : i32
    return %c0_i32, %c0_i32_0 : i32, i32
  }
  func.func @transform_11(%arg0: i32, %arg1: i32) -> (i32, i32) {
    %c0_i32 = arith.constant 0 : i32
    %c0_i32_0 = arith.constant 0 : i32
    %c0_i32_1 = arith.constant 0 : i32
    return %c0_i32, %c0_i32_0 : i32, i32
  }
  func.func @transform_12(%arg0: i32, %arg1: i32) -> (i32, i32) {
    %c0_i32 = arith.constant 0 : i32
    %c0_i32_0 = arith.constant 0 : i32
    %c0_i32_1 = arith.constant 0 : i32
    return %c0_i32, %c0_i32_0 : i32, i32
  }
  func.func @transform_13(%arg0: i32, %arg1: i32) -> (i32, i32) {
    %c0_i32 = arith.constant 0 : i32
    %c0_i32_0 = arith.constant 0 : i32
    %c0_i32_1 = arith.constant 0 : i32
    return %c0_i32, %c0_i32_0 : i32, i32
  }
  func.func @transform_14(%arg0: i32, %arg1: i32) -> (i32, i32) {
    %c0_i32 = arith.constant 0 : i32
    %c0_i32_0 = arith.constant 0 : i32
    %c0_i32_1 = arith.constant 0 : i32
    return %c0_i32, %c0_i32_0 : i32, i32
  }
  func.func @transform_15(%arg0: i32, %arg1: i32) -> (i32, i32) {
    %c0_i32 = arith.constant 0 : i32
    %c0_i32_0 = arith.constant 0 : i32
    %c0_i32_1 = arith.constant 0 : i32
    return %c0_i32, %c0_i32_0 : i32, i32
  }
  func.func @transform_16(%arg0: i32, %arg1: i32) -> (i32, i32) {
    %c0_i32 = arith.constant 0 : i32
    %c0_i32_0 = arith.constant 0 : i32
    %c0_i32_1 = arith.constant 0 : i32
    return %c0_i32, %c0_i32_0 : i32, i32
  }
  func.func @transform_17(%arg0: i32, %arg1: i32) -> (i32, i32) {
    %c0_i32 = arith.constant 0 : i32
    %c0_i32_0 = arith.constant 0 : i32
    %c0_i32_1 = arith.constant 0 : i32
    return %c0_i32, %c0_i32_0 : i32, i32
  }
  func.func @transform_18(%arg0: i32, %arg1: i32) -> (i32, i32) {
    %c0_i32 = arith.constant 0 : i32
    %c0_i32_0 = arith.constant 0 : i32
    %c0_i32_1 = arith.constant 0 : i32
    return %c0_i32, %c0_i32_0 : i32, i32
  }
  func.func @transform_19(%arg0: i32, %arg1: i32) -> (i32, i32, i32) {
    %c0_i32 = arith.constant 0 : i32
    %c0_i32_0 = arith.constant 0 : i32
    return %arg0, %arg1, %c0_i32 : i32, i32, i32
  }
  func.func @transform_20(%arg0: i32, %arg1: i32) -> (i32, i32, i32, i32) {
    %c0_i32 = arith.constant 0 : i32
    %c0_i32_0 = arith.constant 0 : i32
    %c0_i32_1 = arith.constant 0 : i32
    return %arg0, %c0_i32, %arg1, %c0_i32_0 : i32, i32, i32, i32
  }
  func.func @transform_21(%arg0: i32, %arg1: i32) -> (i32, i32, i32, i32) {
    %c0_i32 = arith.constant 0 : i32
    %c0_i32_0 = arith.constant 0 : i32
    %c0_i32_1 = arith.constant 0 : i32
    return %arg0, %c0_i32, %arg1, %c0_i32_0 : i32, i32, i32, i32
  }
  func.func @transform_22(%arg0: i32, %arg1: i32) -> (i32, i32, i32) {
    %c0_i32 = arith.constant 0 : i32
    %c0_i32_0 = arith.constant 0 : i32
    %c0_i32_1 = arith.constant 0 : i32
    return %arg0, %c0_i32, %c0_i32_0 : i32, i32, i32
  }
}

</mosaic_0001>

<bundles_post_ra>
// kernel: tpu_custom_call.1
= control target key start
LH: loop header
LB: loop body
LE: loop exit
PB: predicated region body
PF: predicated region fallthrough
CT: control target
= control target key end

     0   :  { %s3866_s0 = inlined_call_operand.vmem [shape: f32[2,8,32], index: 0, kind: input, shape index: {}]   ;;  %s3867_s1 = inlined_call_operand.vmem [shape: f32[2,8,32], index: 1, kind: input, shape index: {}]   ;;  %s3868_s2 = inlined_call_operand.vmem [shape: f32[2,8,32], index: 2, kind: input, shape index: {}]   ;;  %s3869_s3 = inlined_call_operand.vmem [shape: f32[2,6,32], index: 3, kind: input, shape index: {}]   ;;  %s3870_s4 = inlined_call_operand.vmem [shape: f32[2,6,32], index: 4, kind: input, shape index: {}]   ;;  %s3871_s5 = inlined_call_operand.vmem [shape: bf16[32,64], index: 5, kind: input, shape index: {}]   ;;  %s3872_s6 = inlined_call_operand.vmem [shape: f32[1,64], index: 6, kind: input, shape index: {}]   ;;  %s3873_s7 = inlined_call_operand.vmem [shape: bf16[32,64], index: 7, kind: input, shape index: {}]   ;;  %s3874_s8 = inlined_call_operand.hbm [shape: f32[1,64], index: 8, kind: input, shape index: {}]   ;;  %s3875_s9 = inlined_call_operand.vmem [shape: bf16[32,64], index: 9, kind: input, shape index: {}]   ;;  %s3876_s10 = inlined_call_operand.hbm [shape: f32[1,64], index: 10, kind: input, shape index: {}]   ;;  %s3877_s11 = inlined_call_operand.vmem [shape: bf16[32,64], index: 11, kind: input, shape index: {}]   ;;  %s3878_s12 = inlined_call_operand.vmem [shape: f32[1,64], index: 12, kind: input, shape index: {}]   ;;  %s3879_s13 = inlined_call_operand.vmem [shape: bf16[32,64], index: 13, kind: input, shape index: {}]   ;;  %s3880_s14 = inlined_call_operand.vmem [shape: f32[1,64], index: 14, kind: input, shape index: {}]   ;;  %s3881_s15 = inlined_call_operand.vmem [shape: bf16[64,32], index: 15, kind: input, shape index: {}]   ;;  %s3882_s16 = inlined_call_operand.vmem [shape: f32[1,32], index: 16, kind: input, shape index: {}]   ;;  %s3883_s17 = inlined_call_operand.vmem [shape: f32[1,32], index: 17, kind: input, shape index: {}]   ;;  %s3884_s18 = inlined_call_operand.vmem [shape: f32[1,32], index: 18, kind: input, shape index: {}]   ;;  %s3885_s19 = inlined_call_operand.hbm [shape: f32[2,8,32], index: 19, kind: output, shape index: {0}]   ;;  %s3886_s20 = inlined_call_operand.hbm [shape: f32[2,4,8,8], index: 20, kind: output, shape index: {1}]   ;;  %s3887_s21 = inlined_call_operand.vmem [shape: f32[2,4,8,6], index: 21, kind: output, shape index: {2}]   ;;  %s3888_s22 = inlined_call_operand.vmem [shape: f32[2,1,1], index: 22, kind: output, shape index: {3}]  }
   0x1   :  { %3902 = sst [smem:[#allocation25_spill]] %s3866_s0 }
   0x2   :  { %3903 = sst [smem:[#allocation26_spill]] %s3867_s1 }
   0x3   :  { %3904 = sst [smem:[#allocation27_spill]] %s3868_s2 }
   0x4   :  { %3905 = sst [smem:[#allocation28_spill]] %s3869_s3 }
   0x5   :  { %3906 = sst [smem:[#allocation29_spill]] %s3870_s4 }
   0x6   :  { %3907 = sst [smem:[#allocation30_spill]] %s3871_s5 }
   0x7   :  { %3908 = sst [smem:[#allocation31_spill]] %s3872_s6 }
   0x8   :  { %3909 = sst [smem:[#allocation32_spill]] %s3873_s7 }
   0x9   :  { %3910 = sst [smem:[#allocation33_spill]] %s3884_s18 }
   0xa   :  { %3911 = sst [smem:[#allocation34_spill]] %s3885_s19 }
   0xb   :  { %28 = vsyncpa [#allocation7], 0 }
   0xc   :  { %29 = vsyncpa [#allocation10], 0 }
   0xd   :  { %30 = vsyncpa [#allocation8], 0 }
   0xe   :  { %32 = vsyncpa [#allocation8 + $0x1], 0 }
   0xf   :  { %33 = vsyncpa [#allocation13], 0 }
  0x10   :  { %35 = vsyncpa [#allocation13 + $0x1], 0  ;;  %s3291_s3 = smov 0   ;;  %s3293_s28 = smov 0  }
  0x11   :  { %s3295_s29 = smov 0   ;;  %s3297_s30 = smov 0  }
  0x12   :  { %s3299_s4 = smov 0   ;;  %s3301_s0 = smov 0  }
  0x13 LB: > { %3912 = sst [smem:[#allocation18_spill]] %s3140_s3  ;;  %s2574_s23 = sadd.s32 4294967295, %s3160_s0   ;;  %s3160_s0 = sphi %s3301_s0, %s41_s0   ;;  %s3156_s4 = sphi %s3299_s4, %s3944_s4   ;;  %s3152_s30 = sphi %s3297_s30, %s3943_s30   ;;  %s3148_s29 = sphi %s3295_s29, %s3942_s29   ;;  %s3144_s28 = sphi %s3293_s28, %s3946_s28   ;;  %s3140_s3 = sphi %s3291_s3, %s3945_s3  }
  0x14   : > { %3913 = sst [smem:[#allocation19_spill]] %s3148_s29  ;;  %s2575_s1 = sadd.s32 4294967294, %s3160_s0  }
  0x15   : > { %3914 = sst [smem:[#allocation20_spill]] %s3156_s4  ;;  %s53_s5 = sadd.s32 1, %s3156_s4 }
  0x16   : > { %3915 = sst [smem:[#allocation21_spill]] %s3160_s0  ;;  %s488_s24 = sadd.s32 1, %s3148_s29 }
  0x17   : > { %p55_p0 = scmp.ge.s32.totalorder %s53_s5, 2  ;;  %p498_p1 = scmp.ne.s32.totalorder %s3148_s29, %s3144_s28 }
  0x18   : > { %p499_p2 = scmp.eq.s32.totalorder %s2574_s23, 1  ;;  %p504_p3 = scmp.ne.s32.totalorder %s3144_s28, %s3140_s3 }
  0x19   : > { %s3948_s5 = smov (%p55_p0, %s53_s5), 0  ;;  %p505_p5 = scmp.eq.s32.totalorder %s2575_s1, 1 }
  0x1a   : > { %3916 = sst [smem:[#allocation22_spill]] %s3948_s5  ;;  %p3331_p4 = por %p499_p2, %p498_p1 }
  0x1b   : > { %s483_s25 = ssub.s32 %s3156_s4, %s3948_s5  ;;  %p2576_p6 = scmp.ge.s32.totalorder %s3160_s0, 1 }
  0x1c   : > { %s3917_s6 = scalar_select %p3331_p4, 1, 0 }
  0x1d   : > { %p486_p7 = scmp.eq.s32.totalorder %s483_s25, 0  ;;  %p3338_p8 = por %p505_p5, %p504_p3 }
  0x1e   : > { %p594_p9 = scmp.lt.s32.totalorder %s3160_s0, 3  ;;  %p3350_p11 = scmp.eq.s32.totalorder %s2574_s23, 0 }
  0x1f   : > { %s3918_s26 = scalar_select %p3338_p8, 1, 0 }
  0x20   : > { %s3344_s2 = scalar_select %p486_p7, %s3148_s29, %s488_s24  }
  0x21   : > { %3919 = sst [smem:[#allocation23_spill]] %s3918_s26  ;;  %p3346_p10 = pnand %p2576_p6, %p594_p9 }
  0x22   : > { %3920 = sst [smem:[#allocation24_spill]] %s3344_s2  ;;  %s3162_s1 = smov [#allocation6]  }
  0x23   : > { %s3921_s27 = scalar_select %p3346_p10, 1, 0 }
  0x24   : > { %s3922_s3 = scalar_select %p3350_p11, 1, 0 }
  0x25   : > { %p2859_p12 = pneg %p3346_p10  ;;  %s616_s25 = sshll.u32 %s3162_s1, 4  ;;  %s617_s25 = int_to_ptr.vmem [resolvable:$true] %s616_s25 }
  0x26   : > { %s3163_s5 = smov [#allocation9]   ;;  %s2986_s29 = scalar_lea.hbm %s3874_s8, 16 }
  0x27   : > { %s630_s4 = sshll.u32 %s3163_s5, 4  ;;  %p3358_p13 = pnand %p3350_p11, %p2859_p12  ;;  %s3362_s4 = int_to_ptr.vmem [resolvable:$true] %s630_s4 }
  0x28   : > { %p2987_p0 = scmp.ne.s32.totalorder %s3874_s8, %s2986_s29  ;;  %p2993_p5 = scmp.lt.u32.totalorder %s2986_s29, %s3874_s8 }
  0x29   : > { %p2988_p1 = pneg %p3358_p13 }
  0x2b   : > { %p2989_p2 = pnand %p2988_p1, %p2987_p0 }
  0x2d   : > { %p2990_p3 = pneg %p2989_p2 }
  0x2f   : > { %p2995_p6 = pnand %p2993_p5, %p2990_p3 }
  0x31   : > { %2998 = shalt.err (!%p2995_p6)
}
  0x32   : > { %s2999_s19 = scalar_lea.vmem %s617_s25, 16  ;;  %s3006_s0 = scalar_lea.vmem %s617_s25, 32 }
  0x33   : > { %p3000_p7 = scmp.ne.s32.totalorder %s617_s25, %s2999_s19  ;;  %p3007_p8 = scmp.lt.s32.totalorder %s617_s25, %s617_s25 }
  0x34   : > { %p3008_p4 = scmp.lt.s32.totalorder %s3006_s0, %s2999_s19 }
  0x35   : > { %p3002_p9 = pnand %p3000_p7, %p2988_p1 }
  0x36   : > { %p3009_p11 = por %p3008_p4, %p3007_p8 }
  0x37   : > { %p3003_p12 = pneg %p3002_p9 }
  0x39   : > { %p3010_p10 = pnand %p3009_p11, %p3003_p12 }
  0x3b   : > { %3013 = shalt.err (!%p3010_p10)
}
  0x3c   : > { %2862 = dma.hbm_to_vmem [thread:$0]  (!%p3358_p13), %s3874_s8, 16, %s617_s25, [#allocation7]  }
  0x3d   : > { %s3014_s5 = scalar_lea.hbm %s3876_s10, 16 }
  0x3e   : > { %p3015_p0 = scmp.ne.s32.totalorder %s3876_s10, %s3014_s5  ;;  %p3021_p10 = scmp.lt.u32.totalorder %s3014_s5, %s3876_s10 }
  0x40   : > { %p3017_p4 = pnand %p3015_p0, %p2988_p1 }
  0x42   : > { %p3018_p8 = pneg %p3017_p4 }
  0x44   : > { %p3023_p11 = pnand %p3021_p10, %p3018_p8 }
  0x46   : > { %3026 = shalt.err (!%p3023_p11)
}
  0x47   : > { %s3027_s25 = scalar_lea.vmem %s3362_s4, 16  ;;  %s3034_s18 = scalar_lea.vmem %s3362_s4, 32 }
  0x48   : > { %p3028_p2 = scmp.ne.s32.totalorder %s3362_s4, %s3027_s25  ;;  %p3035_p6 = scmp.lt.s32.totalorder %s3362_s4, %s3362_s4 }
  0x49   : > { %p3036_p7 = scmp.lt.s32.totalorder %s3034_s18, %s3027_s25 }
  0x4a   : > { %p3030_p3 = pnand %p3028_p2, %p2988_p1 }
  0x4b   : > { %p3037_p9 = por %p3036_p7, %p3035_p6 }
  0x4c   : > { %p3031_p5 = pneg %p3030_p3 }
  0x4e   : > { %p3038_p12 = pnand %p3037_p9, %p3031_p5 }
  0x50   : > { %3041 = shalt.err (!%p3038_p12)
}
  0x51   : > { %2865 = dma.hbm_to_vmem [thread:$0]  (!%p3358_p13), %s3876_s10, 16, %s3362_s4, [#allocation10]  }
  0x52   : > { %p3924_p0 = scmp.ne.s32.totalorder %s3921_s27, 0 }
  0x53   : > { %p3925_p1 = scmp.ne.s32.totalorder (!%p3924_p0), %s3922_s3, 0 }
  0x54   : > { %705 = sbr.rel (%p3924_p0) target bundleno = 1943 (0x797), region = 96 }
  0x5b   : > { %3123 = dma.done.wait (%p3925_p1), [#allocation7], 16  }
  0x5c   : > { %3125 = vsyncadd (%p3925_p1), [#allocation7], 4294967280 }
  0x5d   : > { %3127 = dma.done.wait (%p3925_p1), [#allocation10], 16  }
  0x5e   : > { %3129 = vsyncadd (%p3925_p1), [#allocation10], 4294967280  ;;  %p805_p4 = scmp.lt.s32.totalorder %s3152_s30, 1  ;;  %v3164_v0 = vmov 0.0   ;;  %vm3165_vm0 = vmmov 0   ;;  %s3926_s29 = sld [smem:[#allocation26_spill]] }
  0x5f   : > { %2697 = vmatprep.subr.bf16.mxu0 %v3164_v0  ;;  %2701 = vmatprep.mubr.msk.bf16.mxu0 %vm3165_vm0, %v3164_v0  ;;  %s3927_s7 = sld [smem:[#allocation32_spill]]  ;;  %s3928_s26 = sld [smem:[#allocation28_spill]]  ;;  %vm869_vm1 = vcmask 261120   ;;  %v2940_v5 = vld [vmem:[%s3877_s11] sm:$0xff]   ;;  %v2941_v7 = vld [vmem:[%s3877_s11 + $0x8] sm:$0xff]   ;;  %vm924_vm2 = vcmask 125952  }
  0x60   : > { %s3427_s4 = scalar_select %p805_p4, %s3152_s30, 1  ;;  %2705 = vmatprep.subr.bf16.mxu1 %v3164_v0  ;;  %2709 = vmatprep.mubr.msk.bf16.mxu1 %vm3165_vm0, %v3164_v0  ;;  %v2944_v6 = vld [vmem:[%s3875_s9] sm:$0xff]   ;;  %v2945_v9 = vld [vmem:[%s3875_s9 + $0x8] sm:$0xff]   ;;  %vm1091_vm3 = vcmask 124928   ;;  %vm1260_vm4 = vcmask 130048   ;;  %vm1722_vm5 = vcmask 1043456  }
  0x61   : > { %2706 = vmatpush3.bf16.msra.mxu1 %v2944_v6  ;;  %s3930_s24 = sld [smem:[#allocation25_spill]]  ;;  %s3931_s0 = sld [smem:[#allocation27_spill]]  ;;  %v2946_v17 = vld [vmem:[%s3879_s13] sm:$0xff]   ;;  %v2947_v18 = vld [vmem:[%s3879_s13 + $0x8] sm:$0xff]   ;;  %vm1445_vm6 = vcmask 64512   ;;  %vm1666_vm7 = vcmask 48128  }
  0x62   : > { %s3433_s3 = sshll.u32 %s3427_s4, 3  ;;  %2707 = vmatprep.subr.bf16.mxu1 %v3164_v0  ;;  %v2592_v21 = vld [vmem:[#allocation6] ss:$0 sm:$0xff]  ;;  %s3166_s19 = smov 80   ;;  %v2596_v44 = vld [vmem:[#allocation9] ss:$0 sm:$0xff] }
  0x63   : > { %v2600_v28 = vld [vmem:[%s3878_s12] ss:$0 sm:$0xff]  ;;  %s3168_s18 = smov 96   ;;  %vm1915_vm8 = vcmask 1042432   ;;  %vm2284_vm9 = vcmask 0   ;;  %s3169_s27 = smov 16  }
  0x64   : > { %s815_s23 = scalar_lea.vmem %s3926_s29, %s3433_s3  ;;  %v2604_v51 = vld [vmem:[%s3880_s14] ss:$0 sm:$0xff]  ;;  %vm2123_vm10 = vcmask 392192   ;;  %vm2165_vm11 = vcmask 523264   ;;  %p3934_p8 = scmp.ne.s32.totalorder %s3917_s6, 0 }
  0x65   : > { %v2938_v1 = vld [vmem:[%s3927_s7] sm:$0xff]   ;;  %v2939_v2 = vld [vmem:[%s3927_s7 + $0x8] sm:$0xff]   ;;  %s823_s2 = scalar_lea.vmem %s3928_s26, %s3433_s3  ;;  %2708 = vmatpush3.bf16.msra.mxu1 %v2945_v9  ;;  %s3929_s26 = sld [smem:[#allocation30_spill]] }
  0x66   : > { %2698 = vmatpush3.bf16.msra.mxu0 %v2938_v1  ;;  %v844_v3 = vld [vmem:[%s815_s23] sm:$0xff]  ;;  %2721 = vmatprep.subr.bf16.mxu1 %v3164_v0  ;;  %s3932_s23 = sld [smem:[#allocation29_spill]] }
  0x67   : > { %2699 = vmatprep.subr.bf16.mxu0 %v3164_v0  ;;  %v845_v4 = vpack.c.bf16 %v844_v3, %v844_v3  ;;  %v1012_v8 = vld [vmem:[%s823_s2] sm:$0x3f]  ;;  %s811_s29 = scalar_lea.vmem %s3930_s24, %s3433_s3  ;;  %s819_s25 = scalar_lea.vmem %s3931_s0, %s3433_s3 }
  0x68   : > { %v1013_v10 = vpack.c.bf16 %v1012_v8, %v1012_v8  ;;  %v3483_v13 = vld [vmem:[%s811_s29] sm:$0xff]  ;;  %s3933_s24 = sld [smem:[#allocation31_spill]]  ;;  %s3171_s29 = smov 48  }
  0x69   : > { %v1180_v14 = vpack.c.bf16 %v3483_v13, %v3483_v13  ;;  %v929_v15 = vld [vmem:[%s819_s25] sm:$0xff] }
  0x6a   : > { %2700 = vmatpush3.bf16.msra.mxu0 %v2939_v2  ;;  %v930_v16 = vpack.c.bf16 %v929_v15, %v929_v15 }
  0x6b   : > { %2713 = vmatprep.subr.bf16.mxu0 %v3164_v0  ;;  %v2942_v11 = vld [vmem:[%s3929_s26] sm:$0xff]   ;;  %v2943_v12 = vld [vmem:[%s3929_s26 + $0x8] sm:$0xff]  }
  0x6c   : > { %2710 = vmatmul.mubr.msk.bf16.vlgmr.msra.gmra.mrb[0].mxu1 %vm869_vm1, %v930_v16  ;;  %s827_s1 = scalar_lea.vmem %s3932_s23, %s3433_s3  ;;  %s3167_s3 = smov 112  }
  0x6d   : > { %2702 = vmatmul.mubr.msk.bf16.vlgmr.msra.gmra.mrb[0].mxu0 %vm869_vm1, %v845_v4  ;;  %2722 = vmatpush3.bf16.msra.mxu1 %v2946_v17  ;;  %v1096_v19 = vld [vmem:[%s827_s1] sm:$0x3f]  ;;  %s3628_s23 = sand.u32 1, %s3144_s28  }
  0x6e   : > { %2714 = vmatpush3.bf16.msra.mxu0 %v2940_v5  ;;  %2717 = vmatprep.mubr.msk.bf16.mxu0 %vm3165_vm0, %v3164_v0  ;;  %v1097_v20 = vpack.c.bf16 %v1096_v19, %v1096_v19  ;;  %v2608_v37 = vld [vmem:[%s3933_s24] ss:$0 sm:$0xff]  ;;  %s2584_s1 = sshll.u32 %s3628_s23, 5  ;;  %s838_s24 = scalar_lea.vmem %s3888_s22, %s3427_s4 }
  0x6f   : > { %2715 = vmatprep.subr.bf16.mxu0 %v3164_v0  ;;  %2725 = vmatprep.mubr.msk.bf16.mxu1 %vm3165_vm0, %v3164_v0  ;;  %s3634_s0 = scalar_lea.vmem [#allocation12], %s2584_s1  ;;  %2285 = vst.msk [vmem:[%s838_s24] sm:$0x1] %vm2284_vm9, %v3164_v0  ;;  %s2296_s2 = scalar_lea.sflag [#allocation13], %s3628_s23 }
  0x70   : > { %2723 = vmatprep.subr.bf16.mxu1 %v3164_v0  ;;  %s2335_s1 = sshll.u32 %s3634_s0, 4  ;;  %s3775_s1 = int_to_ptr.vmem [resolvable:$true] %s2335_s1 }
  0x71   : > { %2724 = vmatpush3.bf16.msra.mxu1 %v2947_v18 }
  0x72   : > { %2716 = vmatpush3.bf16.msra.mxu0 %v2941_v7  ;;  %2737 = vmatprep.subr.bf16.mxu1 %v3164_v0 }
  0x73   : > { %2729 = vmatprep.subr.bf16.mxu0 %v3164_v0 }
  0x74   : > { %2726 = vmatmul.mubr.msk.bf16.vlgmr.msra.gmra.mrb[4].mxu1 %vm869_vm1, %v1097_v20 }
  0x75   : > { %2718 = vmatmul.mubr.msk.bf16.vlgmr.msra.gmra.mrb[4].mxu0 %vm869_vm1, %v1013_v10  ;;  %2739 = vmatprep.mubr.msk.bf16.mxu1 %vm3165_vm0, %v3164_v0 }
  0x76   : > { %2730 = vmatpush3.bf16.msra.mxu0 %v2942_v11  ;;  %2733 = vmatprep.mubr.msk.bf16.mxu0 %vm3165_vm0, %v3164_v0 }
  0x77   : > { %2731 = vmatprep.subr.bf16.mxu0 %v3164_v0 }
  0x7a   : > { %2732 = vmatpush3.bf16.msra.mxu0 %v2943_v12 }
  0x7b   : > { %2743 = vmatprep.subr.bf16.mxu0 %v3164_v0 }
  0x7d   : > { %2734 = vmatmul.mubr.msk.bf16.vlgmr.msra.gmra.mrb[8].mxu0 %vm869_vm1, %v1180_v14 }
  0x7e   : > { %2745 = vmatprep.mubr.msk.bf16.mxu0 %vm3165_vm0, %v3164_v0 }
 0x13f   : > { %v991_v45 = vpop.f32.mrb[0].mxu1 }
 0x140   : > { %v907_v22 = vpop.f32.mrb[0].mxu0  ;;  %v992_v46 = vadd.f32 %v2596_v44, %v991_v45  ;;  %v2711_v47 = vpop.f32.mrb[1].mxu1 }
 0x141   : > { %v908_v23 = vadd.f32 %v2592_v21, %v907_v22  ;;  %v2703_v24 = vpop.f32.mrb[1].mxu0  ;;  %v994_v48 = vpop.f32.mrb[2].mxu1 }
 0x142   : > { %v910_v25 = vpop.f32.mrb[2].mxu0  ;;  %v3542_v49 = vpack.c.bf16 %v992_v46, %v992_v46  ;;  %v2712_v50 = vpop.f32.mrb[3].mxu1 }
 0x143   : > { %v913_v26 = vpack.c.bf16 %v908_v23, %v908_v23  ;;  %v2704_v27 = vpop.f32.mrb[3].mxu0 }
 0x144   : > { %1008 = vst.msk [vmem:[#allocation3] sm:$0xf] %vm924_vm2, %v3542_v49 }
 0x145   : > { %925 = vst.msk [vmem:[#allocation2] sm:$0xf] %vm924_vm2, %v913_v26  ;;  %921 = vrot.lane.b32.xlu1 %v913_v26, %s3166_s19  ;;  %915 = vrot.lane.b32.xlu0 %v913_v26, %s3167_s3 }
 0x147   : > { %v1158_v52 = vpop.f32.mrb[4].mxu1 }
 0x148   : > { %v1074_v29 = vpop.f32.mrb[4].mxu0  ;;  %v1159_v53 = vadd.f32 %v2604_v51, %v1158_v52  ;;  %v2727_v54 = vpop.f32.mrb[5].mxu1 }
 0x149   : > { %v1075_v30 = vadd.f32 %v2600_v28, %v1074_v29  ;;  %918 = vrot.lane.b32.xlu0 %v913_v26, %s3168_s18  ;;  %v2719_v31 = vpop.f32.mrb[5].mxu0  ;;  %v1161_v55 = vpop.f32.mrb[6].mxu1 }
 0x14a   : > { %v1077_v32 = vpop.f32.mrb[6].mxu0  ;;  %v3549_v56 = vpack.c.bf16 %v1159_v53, %v1159_v53  ;;  %v2728_v57 = vpop.f32.mrb[7].mxu1 }
 0x14b   : > { %v1080_v33 = vpack.c.bf16 %v1075_v30, %v1075_v30  ;;  %v2720_v34 = vpop.f32.mrb[7].mxu0  ;;  %v1715_v18 = vld [vmem:[#allocation3] sm:$0xf] }
 0x14c   : > { %v1256_v35 = vld [vmem:[#allocation2] sm:$0xf]  ;;  %1175 = vst.msk [vmem:[#allocation5] sm:$0x7] %vm1091_vm3, %v3549_v56  ;;  %v1724_v20 = vsel %vm1722_vm5, %v1715_v18, 0 }
 0x14d   : > { %1092 = vst.msk [vmem:[#allocation4] sm:$0x7] %vm1091_vm3, %v1080_v33  ;;  %1082 = vrot.lane.b32.xlu1 %v1080_v33, %s3167_s3  ;;  %v1265_v36 = vsel %vm1260_vm4, %v1256_v35, 0 }
 0x14e   : > { %2738 = vmatpush3.bf16.xpose.msra.mxu1 %v1265_v36 }
 0x14f   : > { %2749 = vmatprep.subr.bf16.mxu1 %v3164_v0 }
 0x150   : > { %v1242_v38 = vpop.f32.mrb[8].mxu0 }
 0x151   : > { %v1243_v39 = vadd.f32 %v2608_v37, %v1242_v38  ;;  %1085 = vrot.lane.b32.xlu1 %v1080_v33, %s3168_s18  ;;  %v2735_v40 = vpop.f32.mrb[9].mxu0 }
 0x152   : > { %v1245_v41 = vpop.f32.mrb[10].mxu0 }
 0x153   : > { %v3529_v42 = vpack.c.bf16 %v1243_v39, %v1243_v39  ;;  %v2736_v43 = vpop.f32.mrb[11].mxu0 }
 0x154   : > { %v1490_v8 = vld [vmem:[#allocation4] sm:$0x7] }
 0x155   : > { %1088 = vrot.lane.b32.xlu1 %v1080_v33, %s3166_s19  ;;  %1250 = vrot.lane.b32.xlu0 %v3529_v42, %s3167_s3  ;;  %v1495_v10 = vsel %vm1260_vm4, %v1490_v8, 0 }
 0x156   : > { %2740 = vmatmul.mubr.msk.bf16.vlgmr.msra.gmra.mrb[8].mxu1 %vm1260_vm4, %v3529_v42 }
 0x157   : > { %2751 = vmatprep.mubr.msk.bf16.mxu1 %vm3165_vm0, %v3164_v0 }
 0x159   : > { %1252 = vrot.lane.b32.xlu0 %v3529_v42, %s3168_s18 }
 0x15d   : > { %1254 = vrot.lane.b32.xlu0 %v3529_v42, %s3166_s19 }
 0x1b7   : > { %v922_v58 = vpop.permute.xlu1 %921  ;;  %v916_v59 = vpop.permute.xlu0 %915 }
 0x1b8   : > { %928 = vst.msk [vmem:[#allocation2 + $0xc] sm:$0xf] %vm924_vm2, %v922_v58  ;;  %926 = vst.msk [vmem:[#allocation2 + $0x4] sm:$0xf] %vm924_vm2, %v916_v59 }
 0x1bb   : > { %v919_v60 = vpop.permute.xlu0 %918 }
 0x1bc   : > { %927 = vst.msk [vmem:[#allocation2 + $0x8] sm:$0xf] %vm924_vm2, %v919_v60 }
 0x1bf   : > { %v1083_v61 = vpop.permute.xlu1 %1082  ;;  %v1257_v62 = vld [vmem:[#allocation2 + $0x4] sm:$0xf]  ;;  %v1259_v4 = vld [vmem:[#allocation2 + $0xc] sm:$0xf] }
 0x1c0   : > { %1093 = vst.msk [vmem:[#allocation4 + $0x4] sm:$0x7] %vm1091_vm3, %v1083_v61  ;;  %v1311_v63 = vsel %vm1260_vm4, %v1257_v62, 0  ;;  %v1403_v7 = vsel %vm1260_vm4, %v1259_v4, 0 }
 0x1c1   : > { %2744 = vmatpush3.bf16.xpose.msra.mxu0 %v1311_v63 }
 0x1c2   : > { %2755 = vmatprep.subr.bf16.mxu0 %v3164_v0 }
 0x1c3   : > { %v1086_v1 = vpop.permute.xlu1 %1085  ;;  %v1258_v2 = vld [vmem:[#allocation2 + $0x8] sm:$0xf] }
 0x1c4   : > { %1094 = vst.msk [vmem:[#allocation4 + $0x8] sm:$0x7] %vm1091_vm3, %v1086_v1  ;;  %v1357_v3 = vsel %vm1260_vm4, %v1258_v2, 0 }
 0x1c5   : > { %2750 = vmatpush3.bf16.xpose.msra.mxu1 %v1357_v3 }
 0x1c6   : > { %2761 = vmatprep.subr.bf16.mxu1 %v3164_v0 }
 0x1c7   : > { %v1089_v5 = vpop.permute.xlu1 %1088  ;;  %v1251_v6 = vpop.permute.xlu0 %1250  ;;  %v1491_v11 = vld [vmem:[#allocation4 + $0x4] sm:$0x7] }
 0x1c8   : > { %1095 = vst.msk [vmem:[#allocation4 + $0xc] sm:$0x7] %vm1091_vm3, %v1089_v5  ;;  %2746 = vmatmul.mubr.msk.bf16.vlgmr.msra.gmra.mrb[12].mxu0 %vm1260_vm4, %v1251_v6  ;;  %v1538_v14 = vsel %vm1260_vm4, %v1491_v11, 0 }
 0x1c9   : > { %2756 = vmatpush3.bf16.xpose.msra.mxu0 %v1403_v7  ;;  %2757 = vmatprep.mubr.msk.bf16.mxu0 %vm3165_vm0, %v3164_v0 }
 0x1ca   : > { %2767 = vmatprep.subr.bf16.mxu0 %v3164_v0 }
 0x1cb   : > { %v1253_v9 = vpop.permute.xlu0 %1252  ;;  %v1492_v15 = vld [vmem:[#allocation4 + $0x8] sm:$0x7] }
 0x1cc   : > { %2752 = vmatmul.mubr.msk.bf16.vlgmr.msra.gmra.mrb[12].mxu1 %vm1260_vm4, %v1253_v9  ;;  %v1581_v16 = vsel %vm1260_vm4, %v1492_v15, 0 }
 0x1cd   : > { %2762 = vmatpush3.bf16.xpose.msra.mxu1 %v1495_v10  ;;  %2763 = vmatprep.mubr.msk.bf16.mxu1 %vm3165_vm0, %v3164_v0 }
 0x1ce   : > { %2773 = vmatprep.subr.bf16.mxu1 %v3164_v0 }
 0x1cf   : > { %v1255_v12 = vpop.permute.xlu0 %1254  ;;  %v1493_v17 = vld [vmem:[#allocation4 + $0xc] sm:$0x7] }
 0x1d0   : > { %2758 = vmatmul.mubr.msk.bf16.vlgmr.msra.gmra.mrb[16].mxu0 %vm1260_vm4, %v1255_v12  ;;  %v1624_v19 = vsel %vm1260_vm4, %v1493_v17, 0 }
 0x1d1   : > { %2768 = vmatpush3.bf16.xpose.msra.mxu0 %v1538_v14  ;;  %2769 = vmatprep.mubr.msk.bf16.mxu0 %vm3165_vm0, %v3164_v0 }
 0x1d2   : > { %2779 = vmatprep.subr.bf16.mxu0 %v3164_v0 }
 0x1d4   : > { %2764 = vmatmul.mubr.msk.bf16.vlgmr.msra.gmra.mrb[16].mxu1 %vm1260_vm4, %v3529_v42 }
 0x1d5   : > { %2774 = vmatpush3.bf16.xpose.msra.mxu1 %v1581_v16  ;;  %2775 = vmatprep.mubr.msk.bf16.mxu1 %vm3165_vm0, %v3164_v0 }
 0x1d6   : > { %2785 = vmatprep.subr.bf16.mxu1 %v3164_v0 }
 0x1d8   : > { %2770 = vmatmul.mubr.msk.bf16.vlgmr.msra.gmra.mrb[20].mxu0 %vm1260_vm4, %v1251_v6 }
 0x1d9   : > { %2780 = vmatpush3.bf16.xpose.msra.mxu0 %v1624_v19  ;;  %2781 = vmatprep.mubr.msk.bf16.mxu0 %vm3165_vm0, %v3164_v0 }
 0x1da   : > { %2791 = vmatprep.subr.bf16.mxu0 %v3164_v0 }
 0x1dc   : > { %2776 = vmatmul.mubr.msk.bf16.vlgmr.msra.gmra.mrb[20].mxu1 %vm1260_vm4, %v1253_v9 }
 0x1dd   : > { %2786 = vmatpush3.bf16.msra.mxu1 %v1724_v20  ;;  %2787 = vmatprep.mubr.msk.bf16.mxu1 %vm3165_vm0, %v3164_v0 }
 0x1de   : > { %2797 = vmatprep.subr.bf16.mxu1 %v3164_v0 }
 0x1e0   : > { %2782 = vmatmul.mubr.msk.bf16.vlgmr.msra.gmra.mrb[24].mxu0 %vm1260_vm4, %v1255_v12 }
 0x1e1   : > { %2793 = vmatprep.mubr.msk.bf16.mxu0 %vm3165_vm0, %v3164_v0 }
 0x229   : > { %v1301_v21 = vpop.f32.mrb[8].mxu1 }
 0x22a   : > { %v2741_v22 = vpop.f32.mrb[9].mxu1  ;;  %v1446_v23 = vsel %vm1445_vm6, %v1301_v21, -inf }
 0x22b   : > { %1447 = vmax.xlane.f32.xlu1 %v1446_v23  ;;  %v1304_v24 = vpop.f32.mrb[10].mxu1 }
 0x22c   : > { %v2742_v25 = vpop.f32.mrb[11].mxu1 }
 0x29b   : > { %v1347_v26 = vpop.f32.mrb[12].mxu0 }
 0x29c   : > { %v2747_v27 = vpop.f32.mrb[13].mxu0  ;;  %v1449_v28 = vsel %vm1445_vm6, %v1347_v26, -inf }
 0x29d   : > { %1450 = vmax.xlane.f32.xlu0 %v1449_v28  ;;  %v1350_v29 = vpop.f32.mrb[14].mxu0 }
 0x29e   : > { %v2748_v30 = vpop.f32.mrb[15].mxu0 }
 0x29f   : > { %v1393_v31 = vpop.f32.mrb[12].mxu1 }
 0x2a0   : > { %v2753_v32 = vpop.f32.mrb[13].mxu1  ;;  %v1452_v33 = vsel %vm1445_vm6, %v1393_v31, -inf }
 0x2a1   : > { %v1396_v34 = vpop.f32.mrb[14].mxu1  ;;  %1453 = vmax.xlane.f32.xlu0 %v1452_v33 }
 0x2a2   : > { %v2754_v35 = vpop.f32.mrb[15].mxu1 }
 0x2a3   : > { %v1439_v36 = vpop.f32.mrb[16].mxu0 }
 0x2a4   : > { %v2759_v37 = vpop.f32.mrb[17].mxu0  ;;  %v1455_v38 = vsel %vm1445_vm6, %v1439_v36, -inf }
 0x2a5   : > { %1456 = vmax.xlane.f32.xlu1 %v1455_v38  ;;  %v1442_v39 = vpop.f32.mrb[18].mxu0 }
 0x2a6   : > { %v2760_v40 = vpop.f32.mrb[19].mxu0 }
 0x2a7   : > { %v1531_v41 = vpop.f32.mrb[16].mxu1 }
 0x2a8   : > { %v2765_v42 = vpop.f32.mrb[17].mxu1  ;;  %v1667_v43 = vsel %vm1666_vm7, %v1531_v41, -inf }
 0x2a9   : > { %v1534_v44 = vpop.f32.mrb[18].mxu1  ;;  %1668 = vmax.xlane.f32.xlu0 %v1667_v43 }
 0x2aa   : > { %v2766_v45 = vpop.f32.mrb[19].mxu1 }
 0x2ab   : > { %v3602_v46 = vpop.f32.mrb[20].mxu0 }
 0x2ac   : > { %v2771_v47 = vpop.f32.mrb[21].mxu0  ;;  %v1670_v48 = vsel %vm1666_vm7, %v3602_v46, -inf }
 0x2ad   : > { %1671 = vmax.xlane.f32.xlu1 %v1670_v48  ;;  %v1577_v50 = vpop.f32.mrb[22].mxu0 }
 0x2ae   : > { %v2772_v51 = vpop.f32.mrb[23].mxu0 }
 0x2af   : > { %v3606_v52 = vpop.f32.mrb[20].mxu1 }
 0x2b0   : > { %v2777_v53 = vpop.f32.mrb[21].mxu1  ;;  %v1673_v54 = vsel %vm1666_vm7, %v3606_v52, -inf }
 0x2b1   : > { %v1620_v55 = vpop.f32.mrb[22].mxu1  ;;  %1674 = vmax.xlane.f32.xlu0 %v1673_v54 }
 0x2b2   : > { %v2778_v57 = vpop.f32.mrb[23].mxu1 }
 0x2b3   : > { %v3610_v58 = vpop.f32.mrb[24].mxu0 }
 0x2b4   : > { %v2783_v59 = vpop.f32.mrb[25].mxu0  ;;  %v1676_v60 = vsel %vm1666_vm7, %v3610_v58, -inf }
 0x2b5   : > { %1677 = vmax.xlane.f32.xlu1 %v1676_v60  ;;  %v1663_v61 = vpop.f32.mrb[26].mxu0 }
 0x2b6   : > { %v2784_v62 = vpop.f32.mrb[27].mxu0 }
 0x2b8   : > { %v1448_v63 = vpop.xlane.xlu1 %1447 }
 0x2b9   : > { %v1458_v1 = vsub.f32 %v1301_v21, %v1448_v63 }
 0x2bb   : > { %v1462_v2 = vmul.f32 1.442695, %v1458_v1 }
 0x2bd   : > { %2952 = vpow2.f32 %v1462_v2 }
 0x2c7   : > { %v2953_v3 = vpop.eup %2952 }
 0x2c8   : > { %v1470_v4 = vsel %vm1445_vm6, %v2953_v3, 0.0 }
 0x2c9   : > { %1471 = vadd.xlane.f32.xlu0 %v1470_v4 }
 0x32a   : > { %v1451_v5 = vpop.xlane.xlu0 %1450 }
 0x32b   : > { %v1459_v6 = vsub.f32 %v1347_v26, %v1451_v5 }
 0x32d   : > { %v1464_v7 = vmul.f32 1.442695, %v1459_v6 }
 0x32e   : > { %v1454_v8 = vpop.xlane.xlu0 %1453 }
 0x32f   : > { %2954 = vpow2.f32 %v1464_v7  ;;  %v1460_v9 = vsub.f32 %v1393_v31, %v1454_v8  ;;  %v1908_v8 = vld [vmem:[#allocation5] sm:$0x7] }
 0x331   : > { %v1466_v10 = vmul.f32 1.442695, %v1460_v9 }
 0x332   : > { %v1457_v11 = vpop.xlane.xlu1 %1456 }
 0x333   : > { %2956 = vpow2.f32 %v1466_v10  ;;  %v1461_v12 = vsub.f32 %v1439_v36, %v1457_v11 }
 0x335   : > { %v1468_v14 = vmul.f32 1.442695, %v1461_v12 }
 0x336   : > { %v1669_v15 = vpop.xlane.xlu0 %1668 }
 0x337   : > { %2958 = vpow2.f32 %v1468_v14  ;;  %v1679_v16 = vsub.f32 %v1531_v41, %v1669_v15 }
 0x339   : > { %v2955_v17 = vpop.eup %2954  ;;  %v1683_v18 = vmul.f32 1.442695, %v1679_v16 }
 0x33a   : > { %v1473_v19 = vsel %vm1445_vm6, %v2955_v17, 0.0  ;;  %v1672_v28 = vpop.xlane.xlu1 %1671 }
 0x33b   : > { %2960 = vpow2.f32 %v1683_v18  ;;  %1474 = vadd.xlane.f32.xlu1 %v1473_v19  ;;  %v1680_v30 = vsub.f32 %v3602_v46, %v1672_v28 }
 0x33d   : > { %v2957_v20 = vpop.eup %2956  ;;  %v1685_v35 = vmul.f32 1.442695, %v1680_v30 }
 0x33e   : > { %v1476_v21 = vsel %vm1445_vm6, %v2957_v20, 0.0  ;;  %v1675_v26 = vpop.xlane.xlu0 %1674 }
 0x33f   : > { %1477 = vadd.xlane.f32.xlu0 %v1476_v21  ;;  %v1681_v34 = vsub.f32 %v3606_v52, %v1675_v26 }
 0x341   : > { %v3617_v22 = vpop.eup %2958  ;;  %v1687_v37 = vmul.f32 1.442695, %v1681_v34 }
 0x342   : > { %v1479_v23 = vsel %vm1445_vm6, %v3617_v22, 0.0  ;;  %v1678_v32 = vpop.xlane.xlu1 %1677 }
 0x343   : > { %1480 = vadd.xlane.f32.xlu1 %v1479_v23  ;;  %v1682_v36 = vsub.f32 %v3610_v58, %v1678_v32 }
 0x345   : > { %v3621_v24 = vpop.eup %2960  ;;  %v1689_v38 = vmul.f32 1.442695, %v1682_v36 }
 0x346   : > { %v1691_v25 = vsel %vm1666_vm7, %v3621_v24, 0.0 }
 0x347   : > { %1692 = vadd.xlane.f32.xlu0 %v1691_v25 }
 0x354   : > { %1002 = vrot.lane.b32.xlu1 %v3542_v49, %s3168_s18 }
 0x356   : > { %v1472_v27 = vpop.xlane.xlu0 %1471 }
 0x357   : > { %2962 = vrcp.f32 %v1472_v27 }
 0x358   : > { %2964 = vpow2.f32 %v1685_v35 }
 0x359   : > { %2966 = vpow2.f32 %v1687_v37 }
 0x35a   : > { %2968 = vpow2.f32 %v1689_v38 }
 0x35d   : > { %999 = vrot.lane.b32.xlu0 %v3542_v49, %s3167_s3 }
 0x361   : > { %v2963_v29 = vpop.eup %2962 }
 0x362   : > { %v1483_v31 = vmul.f32 %v2963_v29, %v2953_v3  ;;  %v3643_v39 = vpop.eup %2964 }
 0x363   : > { %v3645_v40 = vpop.eup %2966  ;;  %v1694_v41 = vsel %vm1666_vm7, %v3643_v39, 0.0 }
 0x364   : > { %v1711_v33 = vpack.c.bf16 %v1483_v31, %v1483_v31  ;;  %2241 = vst.msk [vmem:[%s3634_s0] sm:$0xff] %vm1445_vm6, %v1483_v31  ;;  %v3649_v42 = vpop.eup %2968  ;;  %v1697_v43 = vsel %vm1666_vm7, %v3645_v40, 0.0  ;;  %v2256_v57 = vmul.f32 %v1483_v31, %v1483_v31  ;;  %v2249_v58 = vsel %vm1445_vm6, %v1483_v31, 0.0 }
 0x365   : > { %v1700_v44 = vsel %vm1666_vm7, %v3649_v42, 0.0 }
 0x366   : > { %2788 = vmatmul.mubr.msk.bf16.vlgmr.msra.gmra.mrb[24].mxu1 %vm1445_vm6, %v1711_v33  ;;  %v2260_v3 = vsel %vm1445_vm6, %v2256_v57, 0.0 }
 0x367   : > { %2799 = vmatprep.mubr.msk.bf16.mxu1 %vm3165_vm0, %v3164_v0 }
 0x378   : > { %1695 = vadd.xlane.f32.xlu1 %v1694_v41 }
 0x37c   : > { %1698 = vadd.xlane.f32.xlu1 %v1697_v43  ;;  %1701 = vadd.xlane.f32.xlu0 %v1700_v44 }
 0x38d   : > { %1005 = vrot.lane.b32.xlu1 %v3542_v49, %s3166_s19 }
 0x391   : > { %1166 = vrot.lane.b32.xlu1 %v3549_v56, %s3167_s3 }
 0x395   : > { %1169 = vrot.lane.b32.xlu1 %v3549_v56, %s3168_s18 }
 0x399   : > { %1172 = vrot.lane.b32.xlu1 %v3549_v56, %s3166_s19  ;;  %s2643_s19 = sshll.u32 %s3427_s4, 5 }
 0x39a   : > { %s3690_s18 = scalar_lea.vmem %s3887_s21, %s2643_s19  ;;  %s2644_s19 = sshll.u32 %s3152_s30, 9 }
 0x3c8   : > { %v1475_v45 = vpop.xlane.xlu1 %1474 }
 0x3c9   : > { %2970 = vrcp.f32 %v1475_v45 }
 0x3cc   : > { %v1478_v46 = vpop.xlane.xlu0 %1477 }
 0x3cd   : > { %2972 = vrcp.f32 %v1478_v46 }
 0x3d0   : > { %v1481_v47 = vpop.xlane.xlu1 %1480 }
 0x3d1   : > { %2974 = vrcp.f32 %v1481_v47 }
 0x3d3   : > { %v2971_v48 = vpop.eup %2970 }
 0x3d4   : > { %v1485_v50 = vmul.f32 %v2971_v48, %v2955_v17  ;;  %v1693_v51 = vpop.xlane.xlu0 %1692  ;;  %v1003_v49 = vpop.permute.xlu1 %1002 }
 0x3d5   : > { %2976 = vrcp.f32 %v1693_v51  ;;  %1010 = vst.msk [vmem:[#allocation3 + $0x8] sm:$0xf] %vm924_vm2, %v1003_v49 }
 0x3d6   : > { %v2257_v52 = vmul.f32 %v1485_v50, %v1485_v50  ;;  %2242 = vst.msk [vmem:[%s3634_s0 + $0x8] sm:$0xff] %vm1445_vm6, %v1485_v50  ;;  %v2250_v55 = vsel %vm1445_vm6, %v1485_v50, 0.0  ;;  %v1712_v23 = vpack.c.bf16 %v1485_v50, %v1485_v50 }
 0x3d7   : > { %v2973_v53 = vpop.eup %2972  ;;  %v2251_v63 = vadd.f32 %v2250_v55, %v2249_v58 }
 0x3d8   : > { %v1487_v56 = vmul.f32 %v2973_v53, %v2957_v20  ;;  %v1000_v54 = vpop.permute.xlu0 %999  ;;  %v2261_v61 = vsel %vm1445_vm6, %v2257_v52, 0.0  ;;  %v1917_v20 = vsel %vm1915_vm8, %v1908_v8, 0 }
 0x3d9   : > { %1009 = vst.msk [vmem:[#allocation3 + $0x4] sm:$0xf] %vm924_vm2, %v1000_v54  ;;  %v2262_v7 = vadd.f32 %v2261_v61, %v2260_v3 }
 0x3da   : > { %v2252_v59 = vsel %vm1445_vm6, %v1487_v56, 0.0  ;;  %v2258_v60 = vmul.f32 %v1487_v56, %v1487_v56  ;;  %2243 = vst.msk [vmem:[%s3634_s0 + $0x10] sm:$0xff] %vm1445_vm6, %v1487_v56  ;;  %v1713_v12 = vpack.c.bf16 %v1487_v56, %v1487_v56 }
 0x3db   : > { %v2975_v62 = vpop.eup %2974  ;;  %v2253_v6 = vadd.f32 %v2252_v59, %v2251_v63  ;;  %v2948_v63 = vld [vmem:[%s3881_s15] sm:$0xff]  }
 0x3dc   : > { %v3674_v1 = vmul.f32 %v2975_v62, %v3617_v22  ;;  %v1717_v2 = vld [vmem:[#allocation3 + $0x8] sm:$0xf]  ;;  %v2263_v4 = vsel %vm1445_vm6, %v2258_v60, 0.0 }
 0x3dd   : > { %v1816_v5 = vsel %vm1722_vm5, %v1717_v2, 0  ;;  %v2264_v15 = vadd.f32 %v2263_v4, %v2262_v7  ;;  %v2286_v2 = vld [vmem:[%s838_s24] sm:$0x1] }
 0x3de   : > { %2798 = vmatpush3.bf16.msra.mxu1 %v1816_v5  ;;  %v2254_v9 = vsel %vm1445_vm6, %v3674_v1, 0.0  ;;  %v2259_v10 = vmul.f32 %v3674_v1, %v3674_v1  ;;  %2244 = vst.msk [vmem:[%s3634_s0 + $0x18] sm:$0xff] %vm1445_vm6, %v3674_v1 }
 0x3df   : > { %v2977_v11 = vpop.eup %2976  ;;  %2809 = vmatprep.subr.bf16.mxu1 %v3164_v0  ;;  %v2255_v14 = vadd.f32 %v2254_v9, %v2253_v6 }
 0x3e0   : > { %v1704_v16 = vmul.f32 %v2977_v11, %v3621_v24  ;;  %v1716_v17 = vld [vmem:[#allocation3 + $0x4] sm:$0xf]  ;;  %v2265_v18 = vsel %vm1445_vm6, %v2259_v10, 0.0 }
 0x3e1   : > { %2800 = vmatmul.mubr.msk.bf16.vlgmr.msra.gmra.mrb[28].mxu1 %vm1445_vm6, %v1713_v12  ;;  %v1770_v19 = vsel %vm1722_vm5, %v1716_v17, 0  ;;  %v2266_v21 = vadd.f32 %v2265_v18, %v2264_v15  ;;  %v2267_v22 = vmul.f32 %v2255_v14, %v2255_v14 }
 0x3e2   : > { %2245 = vst.msk [vmem:[%s3690_s18] sm:$0xff] %vm1666_vm7, %v1704_v16  ;;  %2792 = vmatpush3.bf16.msra.mxu0 %v1770_v19  ;;  %2810 = vmatpush3.bf16.msra.mxu1 %v1917_v20  ;;  %v1904_v26 = vpack.c.bf16 %v1704_v16, %v1704_v16 }
 0x3e3   : > { %v2268_v25 = vsub.f32 %v2267_v22, %v2266_v21  ;;  %2811 = vmatprep.mubr.msk.bf16.mxu1 %vm3165_vm0, %v3164_v0  ;;  %2803 = vmatprep.subr.bf16.mxu0 %v3164_v0  ;;  %v2949_v21 = vld [vmem:[%s3881_s15 + $0x8] sm:$0xff]  }
 0x3e4   : > { %2821 = vmatprep.subr.bf16.mxu1 %v3164_v0 }
 0x3e5   : > { %2794 = vmatmul.mubr.msk.bf16.vlgmr.msra.gmra.mrb[28].mxu0 %vm1445_vm6, %v1712_v23  ;;  %v2269_v24 = vsel %vm1445_vm6, %v2268_v25, 0.0 }
 0x3e6   : > { %2270 = vadd.xlane.f32.xlu0 %v2269_v24  ;;  %2805 = vmatprep.mubr.msk.bf16.mxu0 %vm3165_vm0, %v3164_v0 }
 0x3e9   : > { %2812 = vmatmul.mubr.msk.bf16.vlgmr.msra.gmra.mrb[32].mxu1 %vm1666_vm7, %v1904_v26  ;;  %v2950_v26 = vld [vmem:[%s3881_s15 + $0x10] sm:$0xff]  }
 0x3ea   : > { %2823 = vmatprep.mubr.msk.bf16.mxu1 %vm3165_vm0, %v3164_v0 }
 0x405   : > { %v1696_v27 = vpop.xlane.xlu1 %1695 }
 0x406   : > { %2978 = vrcp.f32 %v1696_v27  ;;  %v2951_v27 = vld [vmem:[%s3881_s15 + $0x18] sm:$0xff]  }
 0x409   : > { %v1702_v28 = vpop.xlane.xlu0 %1701  ;;  %v1699_v29 = vpop.xlane.xlu1 %1698 }
 0x40a   : > { %2980 = vrcp.f32 %v1702_v28 }
 0x40b   : > { %2982 = vrcp.f32 %v1699_v29 }
 0x40d   : > { %v1006_v30 = vpop.permute.xlu1 %1005 }
 0x40e   : > { %1011 = vst.msk [vmem:[#allocation3 + $0xc] sm:$0xf] %vm924_vm2, %v1006_v30 }
 0x410   : > { %v2979_v31 = vpop.eup %2978 }
 0x411   : > { %v1706_v32 = vmul.f32 %v2979_v31, %v3643_v39  ;;  %v1167_v33 = vpop.permute.xlu1 %1166  ;;  %v1714_v39 = vpack.c.bf16 %v3674_v1, %v3674_v1 }
 0x412   : > { %1176 = vst.msk [vmem:[#allocation5 + $0x4] sm:$0x7] %vm1091_vm3, %v1167_v33 }
 0x413   : > { %2246 = vst.msk [vmem:[%s3690_s18 + $0x8] sm:$0xff] %vm1666_vm7, %v1706_v32  ;;  %v1905_v47 = vpack.c.bf16 %v1706_v32, %v1706_v32 }
 0x414   : > { %v2981_v34 = vpop.eup %2980 }
 0x415   : > { %v2983_v35 = vpop.eup %2982  ;;  %v1710_v36 = vmul.f32 %v2981_v34, %v3649_v42  ;;  %v1170_v37 = vpop.permute.xlu1 %1169  ;;  %v1718_v38 = vld [vmem:[#allocation3 + $0xc] sm:$0xf] }
 0x416   : > { %v1708_v41 = vmul.f32 %v2983_v35, %v3645_v40  ;;  %1177 = vst.msk [vmem:[#allocation5 + $0x8] sm:$0x7] %vm1091_vm3, %v1170_v37  ;;  %v1862_v43 = vsel %vm1722_vm5, %v1718_v38, 0 }
 0x417   : > { %2248 = vst.msk [vmem:[%s3690_s18 + $0x18] sm:$0xff] %vm1666_vm7, %v1710_v36  ;;  %2804 = vmatpush3.bf16.msra.mxu0 %v1862_v43  ;;  %v1907_v49 = vpack.c.bf16 %v1710_v36, %v1710_v36 }
 0x418   : > { %2247 = vst.msk [vmem:[%s3690_s18 + $0x10] sm:$0xff] %vm1666_vm7, %v1708_v41  ;;  %2815 = vmatprep.subr.bf16.mxu0 %v3164_v0  ;;  %v1906_v48 = vpack.c.bf16 %v1708_v41, %v1708_v41  ;;  %s3780_s18 = scalar_lea.hbm %s3886_s20, %s2644_s19 }
 0x419   : > { %v1173_v44 = vpop.permute.xlu1 %1172  ;;  %v1909_v42 = vld [vmem:[#allocation5 + $0x4] sm:$0x7] }
 0x41a   : > { %1178 = vst.msk [vmem:[#allocation5 + $0xc] sm:$0x7] %vm1091_vm3, %v1173_v44  ;;  %2806 = vmatmul.mubr.msk.bf16.vlgmr.msra.gmra.mrb[32].mxu0 %vm1445_vm6, %v1714_v39  ;;  %v1963_v40 = vsel %vm1915_vm8, %v1909_v42, 0 }
 0x41b   : > { %2816 = vmatpush3.bf16.msra.mxu0 %v1963_v40  ;;  %2817 = vmatprep.mubr.msk.bf16.mxu0 %vm3165_vm0, %v3164_v0 }
 0x41c   : > { %2827 = vmatprep.subr.bf16.mxu0 %v3164_v0 }
 0x41d   : > { %v1910_v45 = vld [vmem:[#allocation5 + $0x8] sm:$0x7] }
 0x41e   : > { %v2009_v46 = vsel %vm1915_vm8, %v1910_v45, 0 }
 0x41f   : > { %2822 = vmatpush3.bf16.msra.mxu1 %v2009_v46 }
 0x420   : > { %2833 = vmatprep.subr.bf16.mxu1 %v3164_v0 }
 0x421   : > { %v1911_v50 = vld [vmem:[#allocation5 + $0xc] sm:$0x7] }
 0x422   : > { %2818 = vmatmul.mubr.msk.bf16.vlgmr.msra.gmra.mrb[36].mxu0 %vm1666_vm7, %v1905_v47  ;;  %2824 = vmatmul.mubr.msk.bf16.vlgmr.msra.gmra.mrb[36].mxu1 %vm1666_vm7, %v1906_v48  ;;  %v2055_v51 = vsel %vm1915_vm8, %v1911_v50, 0 }
 0x423   : > { %2828 = vmatpush3.bf16.msra.mxu0 %v2055_v51  ;;  %2829 = vmatprep.mubr.msk.bf16.mxu0 %vm3165_vm0, %v3164_v0 }
 0x424   : > { %2841 = vmatprep.mubr.msk.bf16.mxu1 %vm3165_vm0, %v3164_v0  ;;  %2834 = vmatpush3.bf16.msra.mxu1 %v2948_v63 }
 0x425   : > { %2835 = vmatprep.subr.bf16.mxu1 %v3164_v0 }
 0x428   : > { %2836 = vmatpush3.bf16.msra.mxu1 %v2949_v21 }
 0x429   : > { %2837 = vmatprep.subr.bf16.mxu1 %v3164_v0 }
 0x42a   : > { %2830 = vmatmul.mubr.msk.bf16.vlgmr.msra.gmra.mrb[40].mxu0 %vm1666_vm7, %v1907_v49 }
 0x42c   : > { %2838 = vmatpush3.bf16.msra.mxu1 %v2950_v26 }
 0x42d   : > { %2839 = vmatprep.subr.bf16.mxu1 %v3164_v0 }
 0x430   : > { %2840 = vmatpush3.bf16.msra.mxu1 %v2951_v27 }
 0x439   : > { %v1760_v52 = vpop.f32.mrb[24].mxu1 }
 0x43a   : > { %v2789_v53 = vpop.f32.mrb[25].mxu1  ;;  %v2097_v15 = vmul.f32 0.5, %v1760_v52 }
 0x43b   : > { %v1763_v56 = vpop.f32.mrb[26].mxu1 }
 0x43c   : > { %v2790_v54 = vpop.f32.mrb[27].mxu1 }
 0x43d   : > { %v2628_v54 = vld [vmem:[%s3882_s16] ss:$0 sm:$0xff] }
 0x473   : > { %v2271_v55 = vpop.xlane.xlu0 %2270 }
 0x474   : > { %v2272_v57 = vrot.slane %v2271_v55, 4 }
 0x476   : > { %v2273_v58 = vadd.f32 %v2272_v57, %v2271_v55 }
 0x478   : > { %v2274_v59 = vrot.slane %v2273_v58, 2 }
 0x47a   : > { %v2275_v60 = vadd.f32 %v2274_v59, %v2273_v58 }
 0x47c   : > { %v2276_v61 = vrot.slane %v2275_v60, 1 }
 0x47e   : > { %v2277_v62 = vadd.f32 %v2276_v61, %v2275_v60 }
 0x480   : > { %2845 = vpush %v2277_v62 }
 0x4b1   : > { %s2846_s4 = spop %2845 }
 0x4b2   : > { %v2279_v1 = vstv %s2846_s4 }
 0x4b3   : > { %v2280_v3 = vmax.f32 %v2279_v1, 0.0 }
 0x4b4   : > { %v1852_v4 = vpop.f32.mrb[28].mxu1 }
 0x4b5   : > { %v2287_v5 = vadd.f32 %v2286_v2, %v2280_v3  ;;  %v2801_v6 = vpop.f32.mrb[29].mxu1  ;;  %v2099_v30 = vmul.f32 0.5, %v1852_v4 }
 0x4b6   : > { %v1855_v7 = vpop.f32.mrb[30].mxu1 }
 0x4b7   : > { %2289 = vst.msk [vmem:[%s838_s24] sm:$0x1] %vm2284_vm9, %v2287_v5  ;;  %v2802_v8 = vpop.f32.mrb[31].mxu1  ;;  %s3170_s24 = smov 32  }
 0x4b8   : > { %v1806_v9 = vpop.f32.mrb[28].mxu0 }
 0x4b9   : > { %v2795_v10 = vpop.f32.mrb[29].mxu0  ;;  %v2098_v31 = vmul.f32 0.5, %v1806_v9 }
 0x4ba   : > { %v1809_v11 = vpop.f32.mrb[30].mxu0 }
 0x4bb   : > { %v2796_v12 = vpop.f32.mrb[31].mxu0 }
 0x4bc   : > { %v1953_v14 = vpop.f32.mrb[32].mxu1 }
 0x4bd   : > { %v2101_v16 = vmul.f32 0.5, %v1953_v14  ;;  %v2813_v17 = vpop.f32.mrb[33].mxu1 }
 0x4be   : > { %v1956_v18 = vpop.f32.mrb[34].mxu1 }
 0x4bf   : > { %v2105_v19 = vadd.f32 %v2101_v16, %v2097_v15  ;;  %v2814_v20 = vpop.f32.mrb[35].mxu1 }
 0x4ed   : > { %v1898_v22 = vpop.f32.mrb[32].mxu0 }
 0x4ee   : > { %v2807_v23 = vpop.f32.mrb[33].mxu0  ;;  %v2100_v44 = vmul.f32 0.5, %v1898_v22 }
 0x4ef   : > { %v1901_v25 = vpop.f32.mrb[34].mxu0 }
 0x4f0   : > { %v2808_v24 = vpop.f32.mrb[35].mxu0 }
 0x4f5   : > { %v1999_v28 = vpop.f32.mrb[36].mxu0  ;;  %v2045_v29 = vpop.f32.mrb[36].mxu1 }
 0x4f6   : > { %v2102_v32 = vmul.f32 0.5, %v1999_v28  ;;  %v2103_v33 = vmul.f32 0.5, %v2045_v29  ;;  %v2819_v34 = vpop.f32.mrb[37].mxu0  ;;  %v2825_v35 = vpop.f32.mrb[37].mxu1 }
 0x4f7   : > { %v2002_v36 = vpop.f32.mrb[38].mxu0  ;;  %v2048_v37 = vpop.f32.mrb[38].mxu1 }
 0x4f8   : > { %v2106_v38 = vadd.f32 %v2102_v32, %v2098_v31  ;;  %v2107_v41 = vadd.f32 %v2103_v33, %v2099_v30  ;;  %v2820_v43 = vpop.f32.mrb[39].mxu0  ;;  %v2826_v39 = vpop.f32.mrb[39].mxu1 }
 0x4fa   : > { %2110 = vrot.lane.b32.xlu1 %v2106_v38, %s3169_s27  ;;  %s3042_s27 = scalar_lea.vmem %s3775_s1, 512 }
 0x4fb   : > { %p3043_p13 = scmp.ne.s32.totalorder %s3775_s1, %s3042_s27 }
 0x4fd   : > { %v2091_v0 = vpop.f32.mrb[40].mxu0  ;;  %p3044_p10 = pnand %p3043_p13, %p3934_p8 }
 0x4fe   : > { %v2104_v42 = vmul.f32 0.5, %v2091_v0  ;;  %2114 = vrot.lane.b32.xlu1 %v2107_v41, %s3170_s24  ;;  %v2831_v40 = vpop.f32.mrb[41].mxu0  ;;  %s3172_s24 = smov [#allocation12]  }
 0x4ff   : > { %v2094_v45 = vpop.f32.mrb[42].mxu0  ;;  %p3045_p11 = pneg %p3044_p10 }
 0x500   : > { %v2108_v46 = vadd.f32 %v2104_v42, %v2100_v44  ;;  %v2832_v47 = vpop.f32.mrb[43].mxu0 }
 0x502   : > { %2118 = vrot.lane.b32.xlu1 %v2108_v46, %s3171_s29  ;;  %s3046_s29 = sshll.u32 %s3172_s24, 4  ;;  %s3047_s29 = int_to_ptr.vmem [resolvable:$false] %s3046_s29 }
 0x503   : > { %s3048_s0 = scalar_lea.vmem %s3047_s29, 1024  ;;  %p3049_p2 = scmp.lt.s32.totalorder %s3775_s1, %s3047_s29 }
 0x504   : > { %p3050_p3 = scmp.lt.s32.totalorder %s3048_s0, %s3042_s27 }
 0x506   : > { %p3051_p5 = por %p3050_p3, %p3049_p2 }
 0x508   : > { %p3052_p6 = pnand %p3051_p5, %p3045_p11 }
 0x56c   : > { %v2111_v48 = vpop.permute.xlu1 %2110 }
 0x56d   : > { %v2121_v51 = vsel %vm1260_vm4, %v2105_v19, %v2111_v48 }
 0x570   : > { %v2115_v50 = vpop.permute.xlu1 %2114 }
 0x571   : > { %v2122_v49 = vsel %vm869_vm1, %v2121_v51, %v2115_v50 }
 0x574   : > { %v2119_v52 = vpop.permute.xlu1 %2118 }
 0x575   : > { %v2124_v53 = vsel %vm2123_vm10, %v2122_v49, %v2119_v52 }
 0x576   : > { %v2125_v56 = vpack.c.bf16 %v2124_v53, %v2124_v53 }
 0x578   : > { %2842 = vmatmul.mubr.msk.bf16.vlgmr.msra.gmra.mrb[40].mxu1 %vm2165_vm11, %v2125_v56 }
 0x64b   : > { %v2203_v55 = vpop.f32.mrb[40].mxu1 }
 0x64c   : > { %v2204_v57 = vadd.f32 %v2628_v54, %v2203_v55  ;;  %v2843_v58 = vpop.f32.mrb[41].mxu1 }
 0x64d   : > { %v2206_v59 = vpop.f32.mrb[42].mxu1 }
 0x64e   : > { %v2844_v60 = vpop.f32.mrb[43].mxu1  ;;  %v2209_v61 = vadd.f32 %v2204_v57, %v3483_v13 }
 0x650   : > { %v2210_v62 = vsel %vm869_vm1, %v2209_v61, 0.0 }
 0x651   : > { %2211 = vadd.xlane.f32.xlu1 %v2210_v62 }
 0x6de   : > { %v2212_v63 = vpop.xlane.xlu1 %2211 }
 0x6df   : > { %v2214_v1 = vmul.f32 0.03125, %v2212_v63 }
 0x6e1   : > { %v2215_v2 = vsub.f32 %v2209_v61, %v2214_v1 }
 0x6e3   : > { %v2216_v3 = vmul.f32 %v2215_v2, %v2215_v2 }
 0x6e5   : > { %v2217_v4 = vsel %vm869_vm1, %v2216_v3, 0.0 }
 0x6e6   : > { %2218 = vadd.xlane.f32.xlu0 %v2217_v4 }
 0x6e7   : > { %3055 = shalt.err (!%p3052_p6)
}
 0x6e8   : > { %s3056_s5 = scalar_lea.hbm %s3780_s18, 512  ;;  %s3060_s3 = scalar_lea.hbm %s3886_s20, 1024 }
 0x6e9   : > { %p3057_p7 = scmp.ne.s32.totalorder %s3780_s18, %s3056_s5  ;;  %p3061_p0 = scmp.lt.u32.totalorder %s3780_s18, %s3886_s20 }
 0x6ea   : > { %p3062_p1 = scmp.lt.u32.totalorder %s3060_s3, %s3056_s5  ;;  %p3064_p13 = scmp.lt.u32.totalorder %s3056_s5, %s3780_s18 }
 0x6eb   : > { %p3058_p9 = pnand %p3057_p7, %p3934_p8 }
 0x6ec   : > { %p3063_p4 = por %p3062_p1, %p3061_p0 }
 0x6ed   : > { %p3059_p12 = pneg %p3058_p9 }
 0x6ee   : > { %p3065_p10 = por %p3064_p13, %p3063_p4 }
 0x6f0   : > { %p3066_p11 = pnand %p3065_p10, %p3059_p12 }
 0x6f2   : > { %3069 = shalt.err (!%p3066_p11)
}
 0x6f3   : > { %s3173_s27 = smov 128   ;;  %s3174_s29 = smov 8   ;;  %v2634_v8 = vld [vmem:[%s3883_s17] ss:$0 sm:$0xff] }
 0x6f4   : > { %2856 = dma.vmem_to_hbm [thread:$0]  (%p3934_p8), %s3775_s1, 512, %s3780_s18, %s2296_s2, %s3173_s27, %s3173_s27, %s3174_s29  }
 0x6f5   : > { %s2583_s0 = sshll.u32 %s3628_s23, 3  ;;  %s3935_s25 = sld [smem:[#allocation33_spill]] }
 0x6f6   : > { %s2638_s24 = sshll.u32 %s3152_s30, 7  ;;  %s782_s7 = scalar_lea.vmem [#allocation11], %s2583_s0 }
 0x6f7   : > { %s2321_s1 = sshll.u32 %s782_s7, 4  ;;  %s3936_s27 = sld [smem:[#allocation34_spill]]  ;;  %s3819_s1 = int_to_ptr.vmem [resolvable:$true] %s2321_s1 }
 0x6f8   : > { %s2291_s5 = scalar_lea.sflag [#allocation8], %s3628_s23  ;;  %s3070_s4 = scalar_lea.vmem %s3819_s1, 128 }
 0x6f9   : > { %p3071_p2 = scmp.ne.s32.totalorder %s3819_s1, %s3070_s4  ;;  %s3175_s30 = smov [#allocation11]  }
 0x6fa   : > { %s3074_s0 = sshll.u32 %s3175_s30, 4  ;;  %s3075_s0 = int_to_ptr.vmem [resolvable:$false] %s3074_s0 }
 0x6fb   : > { %v2635_v10 = vld [vmem:[%s3935_s25] ss:$0 sm:$0xff]  ;;  %p3072_p3 = pnand %p3071_p2, %p3934_p8  ;;  %s3076_s19 = scalar_lea.vmem %s3075_s0, 256 }
 0x6fc   : > { %p3077_p6 = scmp.lt.s32.totalorder %s3819_s1, %s3075_s0  ;;  %p3078_p7 = scmp.lt.s32.totalorder %s3076_s19, %s3070_s4 }
 0x6fd   : > { %s3817_s29 = scalar_lea.hbm %s3936_s27, %s2638_s24  ;;  %p3073_p5 = pneg %p3072_p3 }
 0x6fe   : > { %p3079_p9 = por %p3078_p7, %p3077_p6 }
 0x700   : > { %p3080_p12 = pnand %p3079_p9, %p3073_p5 }
 0x773   : > { %v2219_v13 = vpop.xlane.xlu0 %2218 }
 0x774   : > { %v2220_v5 = vmul.f32 0.03125, %v2219_v13 }
 0x776   : > { %v2221_v6 = vadd.f32 1e-05, %v2220_v5 }
 0x778   : > { %2984 = vrsqrt.f32 %v2221_v6 }
 0x782   : > { %v2985_v7 = vpop.eup %2984 }
 0x783   : > { %v2223_v9 = vmul.f32 %v2985_v7, %v2215_v2 }
 0x785   : > { %v2231_v11 = vmul.f32 %v2634_v8, %v2223_v9 }
 0x787   : > { %v2239_v12 = vadd.f32 %v2635_v10, %v2231_v11 }
 0x789   : > { %2240 = vst.msk [vmem:[%s782_s7] sm:$0xff] %vm869_vm1, %v2239_v12 }
 0x78a   : > { %3083 = shalt.err (!%p3080_p12)
}
 0x78b   : > { %s3084_s7 = scalar_lea.hbm %s3817_s29, 128  ;;  %s3088_s25 = scalar_lea.hbm %s3936_s27, 256 }
 0x78c   : > { %p3085_p0 = scmp.ne.s32.totalorder %s3817_s29, %s3084_s7  ;;  %p3089_p13 = scmp.lt.u32.totalorder %s3817_s29, %s3936_s27 }
 0x78d   : > { %p3090_p10 = scmp.lt.u32.totalorder %s3088_s25, %s3084_s7  ;;  %p3092_p2 = scmp.lt.u32.totalorder %s3084_s7, %s3817_s29 }
 0x78e   : > { %p3086_p1 = pnand %p3085_p0, %p3934_p8 }
 0x78f   : > { %p3091_p11 = por %p3090_p10, %p3089_p13 }
 0x790   : > { %p3087_p4 = pneg %p3086_p1 }
 0x791   : > { %p3093_p3 = por %p3092_p2, %p3091_p11 }
 0x793   : > { %p3094_p5 = pnand %p3093_p3, %p3087_p4 }
 0x795   : > { %3097 = shalt.err (!%p3094_p5)
}
 0x796   : > { %2855 = dma.vmem_to_hbm [thread:$0]  (%p3934_p8), %s3819_s1, 128, %s3817_s29, %s2291_s5  }
 0x797 PF: > { %s3937_s2 = sld [smem:[#allocation21_spill]]  ;;  %s3938_s4 = sld [smem:[#allocation18_spill]] }
 0x798   : > { %s3939_s30 = sld [smem:[#allocation23_spill]] }
 0x79d   : > { %p2877_p6 = scmp.ge.s32.totalorder %s3937_s2, 2  ;;  %s2356_s0 = sand.u32 1, %s3938_s4  }
 0x79e   : > { %p3940_p7 = scmp.ne.s32.totalorder %s3939_s30, 0  ;;  %s2357_s19 = scalar_lea.sflag [#allocation8], %s2356_s0 }
 0x7a0   : > { %p2867_p9 = pnand %p2877_p6, %p3940_p7 }
 0x7a2   : > { %3131 = dma.done.wait (!%p2867_p9), %s2357_s19, 128  }
 0x7a3   : > { %3133 = vsyncadd (!%p2867_p9), %s2357_s19, 4294967168  ;;  %s2366_s7 = scalar_lea.sflag [#allocation13], %s2356_s0 }
 0x7a4   : > { %3135 = dma.done.wait (!%p2867_p9), %s2366_s7, 512  }
 0x7a5   : > { %3137 = vsyncadd (!%p2867_p9), %s2366_s7, 4294966784  ;;  %s41_s0 = sadd.s32 1, %s3937_s2   ;;  %s3941_s6 = sld [smem:[#allocation19_spill]] }
 0x7a6   : > { %p38_p12 = scmp.ge.s32.totalorder %s41_s0, 4   ;;  %s3942_s29 = sld [smem:[#allocation24_spill]] }
 0x7a7   : > { %s3943_s30 = sld [smem:[#allocation20_spill]]  ;;  %s3944_s4 = sld [smem:[#allocation22_spill]] }
 0x7a8   : > { %s3945_s3 = smov %s3144_s28  ;;  %40 = sbr.rel (!%p38_p12) target bundleno = 19 (0x13), region = 201 }
 0x7ab   : > { %s3946_s28 = smov %s3941_s6 }
 0x7af   :  { %2388 = vsyncpa [#allocation7], 1 }
 0x7b0   :  { %2390 = vsyncpa [#allocation7 + $0x1], 1 }
 0x7b1   :  { %2391 = vsyncpa [#allocation10], 1 }
 0x7b2   :  { %2392 = vsyncpa [#allocation8], 1 }
 0x7b3   :  { %2394 = vsyncpa [#allocation8 + $0x1], 1 }
 0x7b4   :  { %2395 = vsyncpa [#allocation13], 1 }
 0x7b5   :  { %2397 = vsyncpa [#allocation13 + $0x1], 1 }

// kernel: tpu_custom_call.1
= control target key start
LH: loop header
LB: loop body
LE: loop exit
PB: predicated region body
PF: predicated region fallthrough
CT: control target
= control target key end

     0   :  { %s3866_s0 = inlined_call_operand.vmem [shape: f32[2,8,32], index: 0, kind: input, shape index: {}]   ;;  %s3867_s1 = inlined_call_operand.vmem [shape: f32[2,8,32], index: 1, kind: input, shape index: {}]   ;;  %s3868_s2 = inlined_call_operand.vmem [shape: f32[2,8,32], index: 2, kind: input, shape index: {}]   ;;  %s3869_s3 = inlined_call_operand.vmem [shape: f32[2,6,32], index: 3, kind: input, shape index: {}]   ;;  %s3870_s4 = inlined_call_operand.vmem [shape: f32[2,6,32], index: 4, kind: input, shape index: {}]   ;;  %s3871_s5 = inlined_call_operand.vmem [shape: bf16[32,64], index: 5, kind: input, shape index: {}]   ;;  %s3872_s6 = inlined_call_operand.vmem [shape: f32[1,64], index: 6, kind: input, shape index: {}]   ;;  %s3873_s7 = inlined_call_operand.vmem [shape: bf16[32,64], index: 7, kind: input, shape index: {}]   ;;  %s3874_s8 = inlined_call_operand.hbm [shape: f32[1,64], index: 8, kind: input, shape index: {}]   ;;  %s3875_s9 = inlined_call_operand.vmem [shape: bf16[32,64], index: 9, kind: input, shape index: {}]   ;;  %s3876_s10 = inlined_call_operand.hbm [shape: f32[1,64], index: 10, kind: input, shape index: {}]   ;;  %s3877_s11 = inlined_call_operand.vmem [shape: bf16[32,64], index: 11, kind: input, shape index: {}]   ;;  %s3878_s12 = inlined_call_operand.vmem [shape: f32[1,64], index: 12, kind: input, shape index: {}]   ;;  %s3879_s13 = inlined_call_operand.vmem [shape: bf16[32,64], index: 13, kind: input, shape index: {}]   ;;  %s3880_s14 = inlined_call_operand.vmem [shape: f32[1,64], index: 14, kind: input, shape index: {}]   ;;  %s3881_s15 = inlined_call_operand.vmem [shape: bf16[64,32], index: 15, kind: input, shape index: {}]   ;;  %s3882_s16 = inlined_call_operand.vmem [shape: f32[1,32], index: 16, kind: input, shape index: {}]   ;;  %s3883_s17 = inlined_call_operand.vmem [shape: f32[1,32], index: 17, kind: input, shape index: {}]   ;;  %s3884_s18 = inlined_call_operand.vmem [shape: f32[1,32], index: 18, kind: input, shape index: {}]   ;;  %s3885_s19 = inlined_call_operand.hbm [shape: f32[2,8,32], index: 19, kind: output, shape index: {0}]   ;;  %s3886_s20 = inlined_call_operand.hbm [shape: f32[2,4,8,8], index: 20, kind: output, shape index: {1}]   ;;  %s3887_s21 = inlined_call_operand.vmem [shape: f32[2,4,8,6], index: 21, kind: output, shape index: {2}]   ;;  %s3888_s22 = inlined_call_operand.vmem [shape: f32[2,1,1], index: 22, kind: output, shape index: {3}]  }
   0x1   :  { %3902 = sst [smem:[#allocation25_spill]] %s3866_s0 }
   0x2   :  { %3903 = sst [smem:[#allocation26_spill]] %s3867_s1 }
   0x3   :  { %3904 = sst [smem:[#allocation27_spill]] %s3868_s2 }
   0x4   :  { %3905 = sst [smem:[#allocation28_spill]] %s3869_s3 }
   0x5   :  { %3906 = sst [smem:[#allocation29_spill]] %s3870_s4 }
   0x6   :  { %3907 = sst [smem:[#allocation30_spill]] %s3871_s5 }
   0x7   :  { %3908 = sst [smem:[#allocation31_spill]] %s3872_s6 }
   0x8   :  { %3909 = sst [smem:[#allocation32_spill]] %s3873_s7 }
   0x9   :  { %3910 = sst [smem:[#allocation33_spill]] %s3884_s18 }
   0xa   :  { %3911 = sst [smem:[#allocation34_spill]] %s3885_s19 }
   0xb   :  { %28 = vsyncpa [#allocation7], 0 }
   0xc   :  { %29 = vsyncpa [#allocation10], 0 }
   0xd   :  { %30 = vsyncpa [#allocation8], 0 }
   0xe   :  { %32 = vsyncpa [#allocation8 + $0x1], 0 }
   0xf   :  { %33 = vsyncpa [#allocation13], 0 }
  0x10   :  { %35 = vsyncpa [#allocation13 + $0x1], 0  ;;  %s3291_s3 = smov 0   ;;  %s3293_s28 = smov 0  }
  0x11   :  { %s3295_s29 = smov 0   ;;  %s3297_s30 = smov 0  }
  0x12   :  { %s3299_s4 = smov 0   ;;  %s3301_s0 = smov 0  }
  0x13 LB: > { %3912 = sst [smem:[#allocation18_spill]] %s3140_s3  ;;  %s2574_s23 = sadd.s32 4294967295, %s3160_s0   ;;  %s3160_s0 = sphi %s3301_s0, %s41_s0   ;;  %s3156_s4 = sphi %s3299_s4, %s3944_s4   ;;  %s3152_s30 = sphi %s3297_s30, %s3943_s30   ;;  %s3148_s29 = sphi %s3295_s29, %s3942_s29   ;;  %s3144_s28 = sphi %s3293_s28, %s3946_s28   ;;  %s3140_s3 = sphi %s3291_s3, %s3945_s3  }
  0x14   : > { %3913 = sst [smem:[#allocation19_spill]] %s3148_s29  ;;  %s2575_s1 = sadd.s32 4294967294, %s3160_s0  }
  0x15   : > { %3914 = sst [smem:[#allocation20_spill]] %s3156_s4  ;;  %s53_s5 = sadd.s32 1, %s3156_s4 }
  0x16   : > { %3915 = sst [smem:[#allocation21_spill]] %s3160_s0  ;;  %s488_s24 = sadd.s32 1, %s3148_s29 }
  0x17   : > { %p55_p0 = scmp.ge.s32.totalorder %s53_s5, 2  ;;  %p498_p1 = scmp.ne.s32.totalorder %s3148_s29, %s3144_s28 }
  0x18   : > { %p499_p2 = scmp.eq.s32.totalorder %s2574_s23, 1  ;;  %p504_p3 = scmp.ne.s32.totalorder %s3144_s28, %s3140_s3 }
  0x19   : > { %s3948_s5 = smov (%p55_p0, %s53_s5), 0  ;;  %p505_p5 = scmp.eq.s32.totalorder %s2575_s1, 1 }
  0x1a   : > { %3916 = sst [smem:[#allocation22_spill]] %s3948_s5  ;;  %p3331_p4 = por %p499_p2, %p498_p1 }
  0x1b   : > { %s483_s25 = ssub.s32 %s3156_s4, %s3948_s5  ;;  %p2576_p6 = scmp.ge.s32.totalorder %s3160_s0, 1 }
  0x1c   : > { %s3917_s6 = scalar_select %p3331_p4, 1, 0 }
  0x1d   : > { %p486_p7 = scmp.eq.s32.totalorder %s483_s25, 0  ;;  %p3338_p8 = por %p505_p5, %p504_p3 }
  0x1e   : > { %p594_p9 = scmp.lt.s32.totalorder %s3160_s0, 3  ;;  %p3350_p11 = scmp.eq.s32.totalorder %s2574_s23, 0 }
  0x1f   : > { %s3918_s26 = scalar_select %p3338_p8, 1, 0 }
  0x20   : > { %s3344_s2 = scalar_select %p486_p7, %s3148_s29, %s488_s24  }
  0x21   : > { %3919 = sst [smem:[#allocation23_spill]] %s3918_s26  ;;  %p3346_p10 = pnand %p2576_p6, %p594_p9 }
  0x22   : > { %3920 = sst [smem:[#allocation24_spill]] %s3344_s2  ;;  %s3162_s1 = smov [#allocation6]  }
  0x23   : > { %s3921_s27 = scalar_select %p3346_p10, 1, 0 }
  0x24   : > { %s3922_s3 = scalar_select %p3350_p11, 1, 0 }
  0x25   : > { %p2859_p12 = pneg %p3346_p10  ;;  %s616_s25 = sshll.u32 %s3162_s1, 4  ;;  %s617_s25 = int_to_ptr.vmem [resolvable:$true] %s616_s25 }
  0x26   : > { %s3163_s5 = smov [#allocation9]   ;;  %s2986_s29 = scalar_lea.hbm %s3874_s8, 16 }
  0x27   : > { %s630_s4 = sshll.u32 %s3163_s5, 4  ;;  %p3358_p13 = pnand %p3350_p11, %p2859_p12  ;;  %s3362_s4 = int_to_ptr.vmem [resolvable:$true] %s630_s4 }
  0x28   : > { %p2987_p0 = scmp.ne.s32.totalorder %s3874_s8, %s2986_s29  ;;  %p2993_p5 = scmp.lt.u32.totalorder %s2986_s29, %s3874_s8 }
  0x29   : > { %p2988_p1 = pneg %p3358_p13 }
  0x2b   : > { %p2989_p2 = pnand %p2988_p1, %p2987_p0 }
  0x2d   : > { %p2990_p3 = pneg %p2989_p2 }
  0x2f   : > { %p2995_p6 = pnand %p2993_p5, %p2990_p3 }
  0x31   : > { %2998 = shalt.err (!%p2995_p6)
}
  0x32   : > { %s2999_s19 = scalar_lea.vmem %s617_s25, 16  ;;  %s3006_s0 = scalar_lea.vmem %s617_s25, 32 }
  0x33   : > { %p3000_p7 = scmp.ne.s32.totalorder %s617_s25, %s2999_s19  ;;  %p3007_p8 = scmp.lt.s32.totalorder %s617_s25, %s617_s25 }
  0x34   : > { %p3008_p4 = scmp.lt.s32.totalorder %s3006_s0, %s2999_s19 }
  0x35   : > { %p3002_p9 = pnand %p3000_p7, %p2988_p1 }
  0x36   : > { %p3009_p11 = por %p3008_p4, %p3007_p8 }
  0x37   : > { %p3003_p12 = pneg %p3002_p9 }
  0x39   : > { %p3010_p10 = pnand %p3009_p11, %p3003_p12 }
  0x3b   : > { %3013 = shalt.err (!%p3010_p10)
}
  0x3c   : > { %2862 = dma.hbm_to_vmem [thread:$0]  (!%p3358_p13), %s3874_s8, 16, %s617_s25, [#allocation7]  }
  0x3d   : > { %s3014_s5 = scalar_lea.hbm %s3876_s10, 16 }
  0x3e   : > { %p3015_p0 = scmp.ne.s32.totalorder %s3876_s10, %s3014_s5  ;;  %p3021_p10 = scmp.lt.u32.totalorder %s3014_s5, %s3876_s10 }
  0x40   : > { %p3017_p4 = pnand %p3015_p0, %p2988_p1 }
  0x42   : > { %p3018_p8 = pneg %p3017_p4 }
  0x44   : > { %p3023_p11 = pnand %p3021_p10, %p3018_p8 }
  0x46   : > { %3026 = shalt.err (!%p3023_p11)
}
  0x47   : > { %s3027_s25 = scalar_lea.vmem %s3362_s4, 16  ;;  %s3034_s18 = scalar_lea.vmem %s3362_s4, 32 }
  0x48   : > { %p3028_p2 = scmp.ne.s32.totalorder %s3362_s4, %s3027_s25  ;;  %p3035_p6 = scmp.lt.s32.totalorder %s3362_s4, %s3362_s4 }
  0x49   : > { %p3036_p7 = scmp.lt.s32.totalorder %s3034_s18, %s3027_s25 }
  0x4a   : > { %p3030_p3 = pnand %p3028_p2, %p2988_p1 }
  0x4b   : > { %p3037_p9 = por %p3036_p7, %p3035_p6 }
  0x4c   : > { %p3031_p5 = pneg %p3030_p3 }
  0x4e   : > { %p3038_p12 = pnand %p3037_p9, %p3031_p5 }
  0x50   : > { %3041 = shalt.err (!%p3038_p12)
}
  0x51   : > { %2865 = dma.hbm_to_vmem [thread:$0]  (!%p3358_p13), %s3876_s10, 16, %s3362_s4, [#allocation10]  }
  0x52   : > { %p3924_p0 = scmp.ne.s32.totalorder %s3921_s27, 0 }
  0x53   : > { %p3925_p1 = scmp.ne.s32.totalorder (!%p3924_p0), %s3922_s3, 0 }
  0x54   : > { %705 = sbr.rel (%p3924_p0) target bundleno = 1943 (0x797), region = 96 }
  0x5b   : > { %3123 = dma.done.wait (%p3925_p1), [#allocation7], 16  }
  0x5c   : > { %3125 = vsyncadd (%p3925_p1), [#allocation7], 4294967280 }
  0x5d   : > { %3127 = dma.done.wait (%p3925_p1), [#allocation10], 16  }
  0x5e   : > { %3129 = vsyncadd (%p3925_p1), [#allocation10], 4294967280  ;;  %p805_p4 = scmp.lt.s32.totalorder %s3152_s30, 1  ;;  %v3164_v0 = vmov 0.0   ;;  %vm3165_vm0 = vmmov 0   ;;  %s3926_s29 = sld [smem:[#allocation26_spill]] }
  0x5f   : > { %2697 = vmatprep.subr.bf16.mxu0 %v3164_v0  ;;  %2701 = vmatprep.mubr.msk.bf16.mxu0 %vm3165_vm0, %v3164_v0  ;;  %s3927_s7 = sld [smem:[#allocation32_spill]]  ;;  %s3928_s26 = sld [smem:[#allocation28_spill]]  ;;  %vm869_vm1 = vcmask 261120   ;;  %v2940_v5 = vld [vmem:[%s3877_s11] sm:$0xff]   ;;  %v2941_v7 = vld [vmem:[%s3877_s11 + $0x8] sm:$0xff]   ;;  %vm924_vm2 = vcmask 125952  }
  0x60   : > { %s3427_s4 = scalar_select %p805_p4, %s3152_s30, 1  ;;  %2705 = vmatprep.subr.bf16.mxu1 %v3164_v0  ;;  %2709 = vmatprep.mubr.msk.bf16.mxu1 %vm3165_vm0, %v3164_v0  ;;  %v2944_v6 = vld [vmem:[%s3875_s9] sm:$0xff]   ;;  %v2945_v9 = vld [vmem:[%s3875_s9 + $0x8] sm:$0xff]   ;;  %vm1091_vm3 = vcmask 124928   ;;  %vm1260_vm4 = vcmask 130048   ;;  %vm1722_vm5 = vcmask 1043456  }
  0x61   : > { %2706 = vmatpush3.bf16.msra.mxu1 %v2944_v6  ;;  %s3930_s24 = sld [smem:[#allocation25_spill]]  ;;  %s3931_s0 = sld [smem:[#allocation27_spill]]  ;;  %v2946_v17 = vld [vmem:[%s3879_s13] sm:$0xff]   ;;  %v2947_v18 = vld [vmem:[%s3879_s13 + $0x8] sm:$0xff]   ;;  %vm1445_vm6 = vcmask 64512   ;;  %vm1666_vm7 = vcmask 48128  }
  0x62   : > { %s3433_s3 = sshll.u32 %s3427_s4, 3  ;;  %2707 = vmatprep.subr.bf16.mxu1 %v3164_v0  ;;  %v2592_v21 = vld [vmem:[#allocation6] ss:$0 sm:$0xff]  ;;  %s3166_s19 = smov 80   ;;  %v2596_v44 = vld [vmem:[#allocation9] ss:$0 sm:$0xff] }
  0x63   : > { %v2600_v28 = vld [vmem:[%s3878_s12] ss:$0 sm:$0xff]  ;;  %s3168_s18 = smov 96   ;;  %vm1915_vm8 = vcmask 1042432   ;;  %vm2284_vm9 = vcmask 0   ;;  %s3169_s27 = smov 16  }
  0x64   : > { %s815_s23 = scalar_lea.vmem %s3926_s29, %s3433_s3  ;;  %v2604_v51 = vld [vmem:[%s3880_s14] ss:$0 sm:$0xff]  ;;  %vm2123_vm10 = vcmask 392192   ;;  %vm2165_vm11 = vcmask 523264   ;;  %p3934_p8 = scmp.ne.s32.totalorder %s3917_s6, 0 }
  0x65   : > { %v2938_v1 = vld [vmem:[%s3927_s7] sm:$0xff]   ;;  %v2939_v2 = vld [vmem:[%s3927_s7 + $0x8] sm:$0xff]   ;;  %s823_s2 = scalar_lea.vmem %s3928_s26, %s3433_s3  ;;  %2708 = vmatpush3.bf16.msra.mxu1 %v2945_v9  ;;  %s3929_s26 = sld [smem:[#allocation30_spill]] }
  0x66   : > { %2698 = vmatpush3.bf16.msra.mxu0 %v2938_v1  ;;  %v844_v3 = vld [vmem:[%s815_s23] sm:$0xff]  ;;  %2721 = vmatprep.subr.bf16.mxu1 %v3164_v0  ;;  %s3932_s23 = sld [smem:[#allocation29_spill]] }
  0x67   : > { %2699 = vmatprep.subr.bf16.mxu0 %v3164_v0  ;;  %v845_v4 = vpack.c.bf16 %v844_v3, %v844_v3  ;;  %v1012_v8 = vld [vmem:[%s823_s2] sm:$0x3f]  ;;  %s811_s29 = scalar_lea.vmem %s3930_s24, %s3433_s3  ;;  %s819_s25 = scalar_lea.vmem %s3931_s0, %s3433_s3 }
  0x68   : > { %v1013_v10 = vpack.c.bf16 %v1012_v8, %v1012_v8  ;;  %v3483_v13 = vld [vmem:[%s811_s29] sm:$0xff]  ;;  %s3933_s24 = sld [smem:[#allocation31_spill]]  ;;  %s3171_s29 = smov 48  }
  0x69   : > { %v1180_v14 = vpack.c.bf16 %v3483_v13, %v3483_v13  ;;  %v929_v15 = vld [vmem:[%s819_s25] sm:$0xff] }
  0x6a   : > { %2700 = vmatpush3.bf16.msra.mxu0 %v2939_v2  ;;  %v930_v16 = vpack.c.bf16 %v929_v15, %v929_v15 }
  0x6b   : > { %2713 = vmatprep.subr.bf16.mxu0 %v3164_v0  ;;  %v2942_v11 = vld [vmem:[%s3929_s26] sm:$0xff]   ;;  %v2943_v12 = vld [vmem:[%s3929_s26 + $0x8] sm:$0xff]  }
  0x6c   : > { %2710 = vmatmul.mubr.msk.bf16.vlgmr.msra.gmra.mrb[0].mxu1 %vm869_vm1, %v930_v16  ;;  %s827_s1 = scalar_lea.vmem %s3932_s23, %s3433_s3  ;;  %s3167_s3 = smov 112  }
  0x6d   : > { %2702 = vmatmul.mubr.msk.bf16.vlgmr.msra.gmra.mrb[0].mxu0 %vm869_vm1, %v845_v4  ;;  %2722 = vmatpush3.bf16.msra.mxu1 %v2946_v17  ;;  %v1096_v19 = vld [vmem:[%s827_s1] sm:$0x3f]  ;;  %s3628_s23 = sand.u32 1, %s3144_s28  }
  0x6e   : > { %2714 = vmatpush3.bf16.msra.mxu0 %v2940_v5  ;;  %2717 = vmatprep.mubr.msk.bf16.mxu0 %vm3165_vm0, %v3164_v0  ;;  %v1097_v20 = vpack.c.bf16 %v1096_v19, %v1096_v19  ;;  %v2608_v37 = vld [vmem:[%s3933_s24] ss:$0 sm:$0xff]  ;;  %s2584_s1 = sshll.u32 %s3628_s23, 5  ;;  %s838_s24 = scalar_lea.vmem %s3888_s22, %s3427_s4 }
  0x6f   : > { %2715 = vmatprep.subr.bf16.mxu0 %v3164_v0  ;;  %2725 = vmatprep.mubr.msk.bf16.mxu1 %vm3165_vm0, %v3164_v0  ;;  %s3634_s0 = scalar_lea.vmem [#allocation12], %s2584_s1  ;;  %2285 = vst.msk [vmem:[%s838_s24] sm:$0x1] %vm2284_vm9, %v3164_v0  ;;  %s2296_s2 = scalar_lea.sflag [#allocation13], %s3628_s23 }
  0x70   : > { %2723 = vmatprep.subr.bf16.mxu1 %v3164_v0  ;;  %s2335_s1 = sshll.u32 %s3634_s0, 4  ;;  %s3775_s1 = int_to_ptr.vmem [resolvable:$true] %s2335_s1 }
  0x71   : > { %2724 = vmatpush3.bf16.msra.mxu1 %v2947_v18 }
  0x72   : > { %2716 = vmatpush3.bf16.msra.mxu0 %v2941_v7  ;;  %2737 = vmatprep.subr.bf16.mxu1 %v3164_v0 }
  0x73   : > { %2729 = vmatprep.subr.bf16.mxu0 %v3164_v0 }
  0x74   : > { %2726 = vmatmul.mubr.msk.bf16.vlgmr.msra.gmra.mrb[4].mxu1 %vm869_vm1, %v1097_v20 }
  0x75   : > { %2718 = vmatmul.mubr.msk.bf16.vlgmr.msra.gmra.mrb[4].mxu0 %vm869_vm1, %v1013_v10  ;;  %2739 = vmatprep.mubr.msk.bf16.mxu1 %vm3165_vm0, %v3164_v0 }
  0x76   : > { %2730 = vmatpush3.bf16.msra.mxu0 %v2942_v11  ;;  %2733 = vmatprep.mubr.msk.bf16.mxu0 %vm3165_vm0, %v3164_v0 }
  0x77   : > { %2731 = vmatprep.subr.bf16.mxu0 %v3164_v0 }
  0x7a   : > { %2732 = vmatpush3.bf16.msra.mxu0 %v2943_v12 }
  0x7b   : > { %2743 = vmatprep.subr.bf16.mxu0 %v3164_v0 }
  0x7d   : > { %2734 = vmatmul.mubr.msk.bf16.vlgmr.msra.gmra.mrb[8].mxu0 %vm869_vm1, %v1180_v14 }
  0x7e   : > { %2745 = vmatprep.mubr.msk.bf16.mxu0 %vm3165_vm0, %v3164_v0 }
 0x13f   : > { %v991_v45 = vpop.f32.mrb[0].mxu1 }
 0x140   : > { %v907_v22 = vpop.f32.mrb[0].mxu0  ;;  %v992_v46 = vadd.f32 %v2596_v44, %v991_v45  ;;  %v2711_v47 = vpop.f32.mrb[1].mxu1 }
 0x141   : > { %v908_v23 = vadd.f32 %v2592_v21, %v907_v22  ;;  %v2703_v24 = vpop.f32.mrb[1].mxu0  ;;  %v994_v48 = vpop.f32.mrb[2].mxu1 }
 0x142   : > { %v910_v25 = vpop.f32.mrb[2].mxu0  ;;  %v3542_v49 = vpack.c.bf16 %v992_v46, %v992_v46  ;;  %v2712_v50 = vpop.f32.mrb[3].mxu1 }
 0x143   : > { %v913_v26 = vpack.c.bf16 %v908_v23, %v908_v23  ;;  %v2704_v27 = vpop.f32.mrb[3].mxu0 }
 0x144   : > { %1008 = vst.msk [vmem:[#allocation3] sm:$0xf] %vm924_vm2, %v3542_v49 }
 0x145   : > { %925 = vst.msk [vmem:[#allocation2] sm:$0xf] %vm924_vm2, %v913_v26  ;;  %921 = vrot.lane.b32.xlu1 %v913_v26, %s3166_s19  ;;  %915 = vrot.lane.b32.xlu0 %v913_v26, %s3167_s3 }
 0x147   : > { %v1158_v52 = vpop.f32.mrb[4].mxu1 }
 0x148   : > { %v1074_v29 = vpop.f32.mrb[4].mxu0  ;;  %v1159_v53 = vadd.f32 %v2604_v51, %v1158_v52  ;;  %v2727_v54 = vpop.f32.mrb[5].mxu1 }
 0x149   : > { %v1075_v30 = vadd.f32 %v2600_v28, %v1074_v29  ;;  %918 = vrot.lane.b32.xlu0 %v913_v26, %s3168_s18  ;;  %v2719_v31 = vpop.f32.mrb[5].mxu0  ;;  %v1161_v55 = vpop.f32.mrb[6].mxu1 }
 0x14a   : > { %v1077_v32 = vpop.f32.mrb[6].mxu0  ;;  %v3549_v56 = vpack.c.bf16 %v1159_v53, %v1159_v53  ;;  %v2728_v57 = vpop.f32.mrb[7].mxu1 }
 0x14b   : > { %v1080_v33 = vpack.c.bf16 %v1075_v30, %v1075_v30  ;;  %v2720_v34 = vpop.f32.mrb[7].mxu0  ;;  %v1715_v18 = vld [vmem:[#allocation3] sm:$0xf] }
 0x14c   : > { %v1256_v35 = vld [vmem:[#allocation2] sm:$0xf]  ;;  %1175 = vst.msk [vmem:[#allocation5] sm:$0x7] %vm1091_vm3, %v3549_v56  ;;  %v1724_v20 = vsel %vm1722_vm5, %v1715_v18, 0 }
 0x14d   : > { %1092 = vst.msk [vmem:[#allocation4] sm:$0x7] %vm1091_vm3, %v1080_v33  ;;  %1082 = vrot.lane.b32.xlu1 %v1080_v33, %s3167_s3  ;;  %v1265_v36 = vsel %vm1260_vm4, %v1256_v35, 0 }
 0x14e   : > { %2738 = vmatpush3.bf16.xpose.msra.mxu1 %v1265_v36 }
 0x14f   : > { %2749 = vmatprep.subr.bf16.mxu1 %v3164_v0 }
 0x150   : > { %v1242_v38 = vpop.f32.mrb[8].mxu0 }
 0x151   : > { %v1243_v39 = vadd.f32 %v2608_v37, %v1242_v38  ;;  %1085 = vrot.lane.b32.xlu1 %v1080_v33, %s3168_s18  ;;  %v2735_v40 = vpop.f32.mrb[9].mxu0 }
 0x152   : > { %v1245_v41 = vpop.f32.mrb[10].mxu0 }
 0x153   : > { %v3529_v42 = vpack.c.bf16 %v1243_v39, %v1243_v39  ;;  %v2736_v43 = vpop.f32.mrb[11].mxu0 }
 0x154   : > { %v1490_v8 = vld [vmem:[#allocation4] sm:$0x7] }
 0x155   : > { %1088 = vrot.lane.b32.xlu1 %v1080_v33, %s3166_s19  ;;  %1250 = vrot.lane.b32.xlu0 %v3529_v42, %s3167_s3  ;;  %v1495_v10 = vsel %vm1260_vm4, %v1490_v8, 0 }
 0x156   : > { %2740 = vmatmul.mubr.msk.bf16.vlgmr.msra.gmra.mrb[8].mxu1 %vm1260_vm4, %v3529_v42 }
 0x157   : > { %2751 = vmatprep.mubr.msk.bf16.mxu1 %vm3165_vm0, %v3164_v0 }
 0x159   : > { %1252 = vrot.lane.b32.xlu0 %v3529_v42, %s3168_s18 }
 0x15d   : > { %1254 = vrot.lane.b32.xlu0 %v3529_v42, %s3166_s19 }
 0x1b7   : > { %v922_v58 = vpop.permute.xlu1 %921  ;;  %v916_v59 = vpop.permute.xlu0 %915 }
 0x1b8   : > { %928 = vst.msk [vmem:[#allocation2 + $0xc] sm:$0xf] %vm924_vm2, %v922_v58  ;;  %926 = vst.msk [vmem:[#allocation2 + $0x4] sm:$0xf] %vm924_vm2, %v916_v59 }
 0x1bb   : > { %v919_v60 = vpop.permute.xlu0 %918 }
 0x1bc   : > { %927 = vst.msk [vmem:[#allocation2 + $0x8] sm:$0xf] %vm924_vm2, %v919_v60 }
 0x1bf   : > { %v1083_v61 = vpop.permute.xlu1 %1082  ;;  %v1257_v62 = vld [vmem:[#allocation2 + $0x4] sm:$0xf]  ;;  %v1259_v4 = vld [vmem:[#allocation2 + $0xc] sm:$0xf] }
 0x1c0   : > { %1093 = vst.msk [vmem:[#allocation4 + $0x4] sm:$0x7] %vm1091_vm3, %v1083_v61  ;;  %v1311_v63 = vsel %vm1260_vm4, %v1257_v62, 0  ;;  %v1403_v7 = vsel %vm1260_vm4, %v1259_v4, 0 }
 0x1c1   : > { %2744 = vmatpush3.bf16.xpose.msra.mxu0 %v1311_v63 }
 0x1c2   : > { %2755 = vmatprep.subr.bf16.mxu0 %v3164_v0 }
 0x1c3   : > { %v1086_v1 = vpop.permute.xlu1 %1085  ;;  %v1258_v2 = vld [vmem:[#allocation2 + $0x8] sm:$0xf] }
 0x1c4   : > { %1094 = vst.msk [vmem:[#allocation4 + $0x8] sm:$0x7] %vm1091_vm3, %v1086_v1  ;;  %v1357_v3 = vsel %vm1260_vm4, %v1258_v2, 0 }
 0x1c5   : > { %2750 = vmatpush3.bf16.xpose.msra.mxu1 %v1357_v3 }
 0x1c6   : > { %2761 = vmatprep.subr.bf16.mxu1 %v3164_v0 }
 0x1c7   : > { %v1089_v5 = vpop.permute.xlu1 %1088  ;;  %v1251_v6 = vpop.permute.xlu0 %1250  ;;  %v1491_v11 = vld [vmem:[#allocation4 + $0x4] sm:$0x7] }
 0x1c8   : > { %1095 = vst.msk [vmem:[#allocation4 + $0xc] sm:$0x7] %vm1091_vm3, %v1089_v5  ;;  %2746 = vmatmul.mubr.msk.bf16.vlgmr.msra.gmra.mrb[12].mxu0 %vm1260_vm4, %v1251_v6  ;;  %v1538_v14 = vsel %vm1260_vm4, %v1491_v11, 0 }
 0x1c9   : > { %2756 = vmatpush3.bf16.xpose.msra.mxu0 %v1403_v7  ;;  %2757 = vmatprep.mubr.msk.bf16.mxu0 %vm3165_vm0, %v3164_v0 }
 0x1ca   : > { %2767 = vmatprep.subr.bf16.mxu0 %v3164_v0 }
 0x1cb   : > { %v1253_v9 = vpop.permute.xlu0 %1252  ;;  %v1492_v15 = vld [vmem:[#allocation4 + $0x8] sm:$0x7] }
 0x1cc   : > { %2752 = vmatmul.mubr.msk.bf16.vlgmr.msra.gmra.mrb[12].mxu1 %vm1260_vm4, %v1253_v9  ;;  %v1581_v16 = vsel %vm1260_vm4, %v1492_v15, 0 }
 0x1cd   : > { %2762 = vmatpush3.bf16.xpose.msra.mxu1 %v1495_v10  ;;  %2763 = vmatprep.mubr.msk.bf16.mxu1 %vm3165_vm0, %v3164_v0 }
 0x1ce   : > { %2773 = vmatprep.subr.bf16.mxu1 %v3164_v0 }
 0x1cf   : > { %v1255_v12 = vpop.permute.xlu0 %1254  ;;  %v1493_v17 = vld [vmem:[#allocation4 + $0xc] sm:$0x7] }
 0x1d0   : > { %2758 = vmatmul.mubr.msk.bf16.vlgmr.msra.gmra.mrb[16].mxu0 %vm1260_vm4, %v1255_v12  ;;  %v1624_v19 = vsel %vm1260_vm4, %v1493_v17, 0 }
 0x1d1   : > { %2768 = vmatpush3.bf16.xpose.msra.mxu0 %v1538_v14  ;;  %2769 = vmatprep.mubr.msk.bf16.mxu0 %vm3165_vm0, %v3164_v0 }
 0x1d2   : > { %2779 = vmatprep.subr.bf16.mxu0 %v3164_v0 }
 0x1d4   : > { %2764 = vmatmul.mubr.msk.bf16.vlgmr.msra.gmra.mrb[16].mxu1 %vm1260_vm4, %v3529_v42 }
 0x1d5   : > { %2774 = vmatpush3.bf16.xpose.msra.mxu1 %v1581_v16  ;;  %2775 = vmatprep.mubr.msk.bf16.mxu1 %vm3165_vm0, %v3164_v0 }
 0x1d6   : > { %2785 = vmatprep.subr.bf16.mxu1 %v3164_v0 }
 0x1d8   : > { %2770 = vmatmul.mubr.msk.bf16.vlgmr.msra.gmra.mrb[20].mxu0 %vm1260_vm4, %v1251_v6 }
 0x1d9   : > { %2780 = vmatpush3.bf16.xpose.msra.mxu0 %v1624_v19  ;;  %2781 = vmatprep.mubr.msk.bf16.mxu0 %vm3165_vm0, %v3164_v0 }
 0x1da   : > { %2791 = vmatprep.subr.bf16.mxu0 %v3164_v0 }
 0x1dc   : > { %2776 = vmatmul.mubr.msk.bf16.vlgmr.msra.gmra.mrb[20].mxu1 %vm1260_vm4, %v1253_v9 }
 0x1dd   : > { %2786 = vmatpush3.bf16.msra.mxu1 %v1724_v20  ;;  %2787 = vmatprep.mubr.msk.bf16.mxu1 %vm3165_vm0, %v3164_v0 }
 0x1de   : > { %2797 = vmatprep.subr.bf16.mxu1 %v3164_v0 }
 0x1e0   : > { %2782 = vmatmul.mubr.msk.bf16.vlgmr.msra.gmra.mrb[24].mxu0 %vm1260_vm4, %v1255_v12 }
 0x1e1   : > { %2793 = vmatprep.mubr.msk.bf16.mxu0 %vm3165_vm0, %v3164_v0 }
 0x229   : > { %v1301_v21 = vpop.f32.mrb[8].mxu1 }
 0x22a   : > { %v2741_v22 = vpop.f32.mrb[9].mxu1  ;;  %v1446_v23 = vsel %vm1445_vm6, %v1301_v21, -inf }
 0x22b   : > { %1447 = vmax.xlane.f32.xlu1 %v1446_v23  ;;  %v1304_v24 = vpop.f32.mrb[10].mxu1 }
 0x22c   : > { %v2742_v25 = vpop.f32.mrb[11].mxu1 }
 0x29b   : > { %v1347_v26 = vpop.f32.mrb[12].mxu0 }
 0x29c   : > { %v2747_v27 = vpop.f32.mrb[13].mxu0  ;;  %v1449_v28 = vsel %vm1445_vm6, %v1347_v26, -inf }
 0x29d   : > { %1450 = vmax.xlane.f32.xlu0 %v1449_v28  ;;  %v1350_v29 = vpop.f32.mrb[14].mxu0 }
 0x29e   : > { %v2748_v30 = vpop.f32.mrb[15].mxu0 }
 0x29f   : > { %v1393_v31 = vpop.f32.mrb[12].mxu1 }
 0x2a0   : > { %v2753_v32 = vpop.f32.mrb[13].mxu1  ;;  %v1452_v33 = vsel %vm1445_vm6, %v1393_v31, -inf }
 0x2a1   : > { %v1396_v34 = vpop.f32.mrb[14].mxu1  ;;  %1453 = vmax.xlane.f32.xlu0 %v1452_v33 }
 0x2a2   : > { %v2754_v35 = vpop.f32.mrb[15].mxu1 }
 0x2a3   : > { %v1439_v36 = vpop.f32.mrb[16].mxu0 }
 0x2a4   : > { %v2759_v37 = vpop.f32.mrb[17].mxu0  ;;  %v1455_v38 = vsel %vm1445_vm6, %v1439_v36, -inf }
 0x2a5   : > { %1456 = vmax.xlane.f32.xlu1 %v1455_v38  ;;  %v1442_v39 = vpop.f32.mrb[18].mxu0 }
 0x2a6   : > { %v2760_v40 = vpop.f32.mrb[19].mxu0 }
 0x2a7   : > { %v1531_v41 = vpop.f32.mrb[16].mxu1 }
 0x2a8   : > { %v2765_v42 = vpop.f32.mrb[17].mxu1  ;;  %v1667_v43 = vsel %vm1666_vm7, %v1531_v41, -inf }
 0x2a9   : > { %v1534_v44 = vpop.f32.mrb[18].mxu1  ;;  %1668 = vmax.xlane.f32.xlu0 %v1667_v43 }
 0x2aa   : > { %v2766_v45 = vpop.f32.mrb[19].mxu1 }
 0x2ab   : > { %v3602_v46 = vpop.f32.mrb[20].mxu0 }
 0x2ac   : > { %v2771_v47 = vpop.f32.mrb[21].mxu0  ;;  %v1670_v48 = vsel %vm1666_vm7, %v3602_v46, -inf }
 0x2ad   : > { %1671 = vmax.xlane.f32.xlu1 %v1670_v48  ;;  %v1577_v50 = vpop.f32.mrb[22].mxu0 }
 0x2ae   : > { %v2772_v51 = vpop.f32.mrb[23].mxu0 }
 0x2af   : > { %v3606_v52 = vpop.f32.mrb[20].mxu1 }
 0x2b0   : > { %v2777_v53 = vpop.f32.mrb[21].mxu1  ;;  %v1673_v54 = vsel %vm1666_vm7, %v3606_v52, -inf }
 0x2b1   : > { %v1620_v55 = vpop.f32.mrb[22].mxu1  ;;  %1674 = vmax.xlane.f32.xlu0 %v1673_v54 }
 0x2b2   : > { %v2778_v57 = vpop.f32.mrb[23].mxu1 }
 0x2b3   : > { %v3610_v58 = vpop.f32.mrb[24].mxu0 }
 0x2b4   : > { %v2783_v59 = vpop.f32.mrb[25].mxu0  ;;  %v1676_v60 = vsel %vm1666_vm7, %v3610_v58, -inf }
 0x2b5   : > { %1677 = vmax.xlane.f32.xlu1 %v1676_v60  ;;  %v1663_v61 = vpop.f32.mrb[26].mxu0 }
 0x2b6   : > { %v2784_v62 = vpop.f32.mrb[27].mxu0 }
 0x2b8   : > { %v1448_v63 = vpop.xlane.xlu1 %1447 }
 0x2b9   : > { %v1458_v1 = vsub.f32 %v1301_v21, %v1448_v63 }
 0x2bb   : > { %v1462_v2 = vmul.f32 1.442695, %v1458_v1 }
 0x2bd   : > { %2952 = vpow2.f32 %v1462_v2 }
 0x2c7   : > { %v2953_v3 = vpop.eup %2952 }
 0x2c8   : > { %v1470_v4 = vsel %vm1445_vm6, %v2953_v3, 0.0 }
 0x2c9   : > { %1471 = vadd.xlane.f32.xlu0 %v1470_v4 }
 0x32a   : > { %v1451_v5 = vpop.xlane.xlu0 %1450 }
 0x32b   : > { %v1459_v6 = vsub.f32 %v1347_v26, %v1451_v5 }
 0x32d   : > { %v1464_v7 = vmul.f32 1.442695, %v1459_v6 }
 0x32e   : > { %v1454_v8 = vpop.xlane.xlu0 %1453 }
 0x32f   : > { %2954 = vpow2.f32 %v1464_v7  ;;  %v1460_v9 = vsub.f32 %v1393_v31, %v1454_v8  ;;  %v1908_v8 = vld [vmem:[#allocation5] sm:$0x7] }
 0x331   : > { %v1466_v10 = vmul.f32 1.442695, %v1460_v9 }
 0x332   : > { %v1457_v11 = vpop.xlane.xlu1 %1456 }
 0x333   : > { %2956 = vpow2.f32 %v1466_v10  ;;  %v1461_v12 = vsub.f32 %v1439_v36, %v1457_v11 }
 0x335   : > { %v1468_v14 = vmul.f32 1.442695, %v1461_v12 }
 0x336   : > { %v1669_v15 = vpop.xlane.xlu0 %1668 }
 0x337   : > { %2958 = vpow2.f32 %v1468_v14  ;;  %v1679_v16 = vsub.f32 %v1531_v41, %v1669_v15 }
 0x339   : > { %v2955_v17 = vpop.eup %2954  ;;  %v1683_v18 = vmul.f32 1.442695, %v1679_v16 }
 0x33a   : > { %v1473_v19 = vsel %vm1445_vm6, %v2955_v17, 0.0  ;;  %v1672_v28 = vpop.xlane.xlu1 %1671 }
 0x33b   : > { %2960 = vpow2.f32 %v1683_v18  ;;  %1474 = vadd.xlane.f32.xlu1 %v1473_v19  ;;  %v1680_v30 = vsub.f32 %v3602_v46, %v1672_v28 }
 0x33d   : > { %v2957_v20 = vpop.eup %2956  ;;  %v1685_v35 = vmul.f32 1.442695, %v1680_v30 }
 0x33e   : > { %v1476_v21 = vsel %vm1445_vm6, %v2957_v20, 0.0  ;;  %v1675_v26 = vpop.xlane.xlu0 %1674 }
 0x33f   : > { %1477 = vadd.xlane.f32.xlu0 %v1476_v21  ;;  %v1681_v34 = vsub.f32 %v3606_v52, %v1675_v26 }
 0x341   : > { %v3617_v22 = vpop.eup %2958  ;;  %v1687_v37 = vmul.f32 1.442695, %v1681_v34 }
 0x342   : > { %v1479_v23 = vsel %vm1445_vm6, %v3617_v22, 0.0  ;;  %v1678_v32 = vpop.xlane.xlu1 %1677 }
 0x343   : > { %1480 = vadd.xlane.f32.xlu1 %v1479_v23  ;;  %v1682_v36 = vsub.f32 %v3610_v58, %v1678_v32 }
 0x345   : > { %v3621_v24 = vpop.eup %2960  ;;  %v1689_v38 = vmul.f32 1.442695, %v1682_v36 }
 0x346   : > { %v1691_v25 = vsel %vm1666_vm7, %v3621_v24, 0.0 }
 0x347   : > { %1692 = vadd.xlane.f32.xlu0 %v1691_v25 }
 0x354   : > { %1002 = vrot.lane.b32.xlu1 %v3542_v49, %s3168_s18 }
 0x356   : > { %v1472_v27 = vpop.xlane.xlu0 %1471 }
 0x357   : > { %2962 = vrcp.f32 %v1472_v27 }
 0x358   : > { %2964 = vpow2.f32 %v1685_v35 }
 0x359   : > { %2966 = vpow2.f32 %v1687_v37 }
 0x35a   : > { %2968 = vpow2.f32 %v1689_v38 }
 0x35d   : > { %999 = vrot.lane.b32.xlu0 %v3542_v49, %s3167_s3 }
 0x361   : > { %v2963_v29 = vpop.eup %2962 }
 0x362   : > { %v1483_v31 = vmul.f32 %v2963_v29, %v2953_v3  ;;  %v3643_v39 = vpop.eup %2964 }
 0x363   : > { %v3645_v40 = vpop.eup %2966  ;;  %v1694_v41 = vsel %vm1666_vm7, %v3643_v39, 0.0 }
 0x364   : > { %v1711_v33 = vpack.c.bf16 %v1483_v31, %v1483_v31  ;;  %2241 = vst.msk [vmem:[%s3634_s0] sm:$0xff] %vm1445_vm6, %v1483_v31  ;;  %v3649_v42 = vpop.eup %2968  ;;  %v1697_v43 = vsel %vm1666_vm7, %v3645_v40, 0.0  ;;  %v2256_v57 = vmul.f32 %v1483_v31, %v1483_v31  ;;  %v2249_v58 = vsel %vm1445_vm6, %v1483_v31, 0.0 }
 0x365   : > { %v1700_v44 = vsel %vm1666_vm7, %v3649_v42, 0.0 }
 0x366   : > { %2788 = vmatmul.mubr.msk.bf16.vlgmr.msra.gmra.mrb[24].mxu1 %vm1445_vm6, %v1711_v33  ;;  %v2260_v3 = vsel %vm1445_vm6, %v2256_v57, 0.0 }
 0x367   : > { %2799 = vmatprep.mubr.msk.bf16.mxu1 %vm3165_vm0, %v3164_v0 }
 0x378   : > { %1695 = vadd.xlane.f32.xlu1 %v1694_v41 }
 0x37c   : > { %1698 = vadd.xlane.f32.xlu1 %v1697_v43  ;;  %1701 = vadd.xlane.f32.xlu0 %v1700_v44 }
 0x38d   : > { %1005 = vrot.lane.b32.xlu1 %v3542_v49, %s3166_s19 }
 0x391   : > { %1166 = vrot.lane.b32.xlu1 %v3549_v56, %s3167_s3 }
 0x395   : > { %1169 = vrot.lane.b32.xlu1 %v3549_v56, %s3168_s18 }
 0x399   : > { %1172 = vrot.lane.b32.xlu1 %v3549_v56, %s3166_s19  ;;  %s2643_s19 = sshll.u32 %s3427_s4, 5 }
 0x39a   : > { %s3690_s18 = scalar_lea.vmem %s3887_s21, %s2643_s19  ;;  %s2644_s19 = sshll.u32 %s3152_s30, 9 }
 0x3c8   : > { %v1475_v45 = vpop.xlane.xlu1 %1474 }
 0x3c9   : > { %2970 = vrcp.f32 %v1475_v45 }
 0x3cc   : > { %v1478_v46 = vpop.xlane.xlu0 %1477 }
 0x3cd   : > { %2972 = vrcp.f32 %v1478_v46 }
 0x3d0   : > { %v1481_v47 = vpop.xlane.xlu1 %1480 }
 0x3d1   : > { %2974 = vrcp.f32 %v1481_v47 }
 0x3d3   : > { %v2971_v48 = vpop.eup %2970 }
 0x3d4   : > { %v1485_v50 = vmul.f32 %v2971_v48, %v2955_v17  ;;  %v1693_v51 = vpop.xlane.xlu0 %1692  ;;  %v1003_v49 = vpop.permute.xlu1 %1002 }
 0x3d5   : > { %2976 = vrcp.f32 %v1693_v51  ;;  %1010 = vst.msk [vmem:[#allocation3 + $0x8] sm:$0xf] %vm924_vm2, %v1003_v49 }
 0x3d6   : > { %v2257_v52 = vmul.f32 %v1485_v50, %v1485_v50  ;;  %2242 = vst.msk [vmem:[%s3634_s0 + $0x8] sm:$0xff] %vm1445_vm6, %v1485_v50  ;;  %v2250_v55 = vsel %vm1445_vm6, %v1485_v50, 0.0  ;;  %v1712_v23 = vpack.c.bf16 %v1485_v50, %v1485_v50 }
 0x3d7   : > { %v2973_v53 = vpop.eup %2972  ;;  %v2251_v63 = vadd.f32 %v2250_v55, %v2249_v58 }
 0x3d8   : > { %v1487_v56 = vmul.f32 %v2973_v53, %v2957_v20  ;;  %v1000_v54 = vpop.permute.xlu0 %999  ;;  %v2261_v61 = vsel %vm1445_vm6, %v2257_v52, 0.0  ;;  %v1917_v20 = vsel %vm1915_vm8, %v1908_v8, 0 }
 0x3d9   : > { %1009 = vst.msk [vmem:[#allocation3 + $0x4] sm:$0xf] %vm924_vm2, %v1000_v54  ;;  %v2262_v7 = vadd.f32 %v2261_v61, %v2260_v3 }
 0x3da   : > { %v2252_v59 = vsel %vm1445_vm6, %v1487_v56, 0.0  ;;  %v2258_v60 = vmul.f32 %v1487_v56, %v1487_v56  ;;  %2243 = vst.msk [vmem:[%s3634_s0 + $0x10] sm:$0xff] %vm1445_vm6, %v1487_v56  ;;  %v1713_v12 = vpack.c.bf16 %v1487_v56, %v1487_v56 }
 0x3db   : > { %v2975_v62 = vpop.eup %2974  ;;  %v2253_v6 = vadd.f32 %v2252_v59, %v2251_v63  ;;  %v2948_v63 = vld [vmem:[%s3881_s15] sm:$0xff]  }
 0x3dc   : > { %v3674_v1 = vmul.f32 %v2975_v62, %v3617_v22  ;;  %v1717_v2 = vld [vmem:[#allocation3 + $0x8] sm:$0xf]  ;;  %v2263_v4 = vsel %vm1445_vm6, %v2258_v60, 0.0 }
 0x3dd   : > { %v1816_v5 = vsel %vm1722_vm5, %v1717_v2, 0  ;;  %v2264_v15 = vadd.f32 %v2263_v4, %v2262_v7  ;;  %v2286_v2 = vld [vmem:[%s838_s24] sm:$0x1] }
 0x3de   : > { %2798 = vmatpush3.bf16.msra.mxu1 %v1816_v5  ;;  %v2254_v9 = vsel %vm1445_vm6, %v3674_v1, 0.0  ;;  %v2259_v10 = vmul.f32 %v3674_v1, %v3674_v1  ;;  %2244 = vst.msk [vmem:[%s3634_s0 + $0x18] sm:$0xff] %vm1445_vm6, %v3674_v1 }
 0x3df   : > { %v2977_v11 = vpop.eup %2976  ;;  %2809 = vmatprep.subr.bf16.mxu1 %v3164_v0  ;;  %v2255_v14 = vadd.f32 %v2254_v9, %v2253_v6 }
 0x3e0   : > { %v1704_v16 = vmul.f32 %v2977_v11, %v3621_v24  ;;  %v1716_v17 = vld [vmem:[#allocation3 + $0x4] sm:$0xf]  ;;  %v2265_v18 = vsel %vm1445_vm6, %v2259_v10, 0.0 }
 0x3e1   : > { %2800 = vmatmul.mubr.msk.bf16.vlgmr.msra.gmra.mrb[28].mxu1 %vm1445_vm6, %v1713_v12  ;;  %v1770_v19 = vsel %vm1722_vm5, %v1716_v17, 0  ;;  %v2266_v21 = vadd.f32 %v2265_v18, %v2264_v15  ;;  %v2267_v22 = vmul.f32 %v2255_v14, %v2255_v14 }
 0x3e2   : > { %2245 = vst.msk [vmem:[%s3690_s18] sm:$0xff] %vm1666_vm7, %v1704_v16  ;;  %2792 = vmatpush3.bf16.msra.mxu0 %v1770_v19  ;;  %2810 = vmatpush3.bf16.msra.mxu1 %v1917_v20  ;;  %v1904_v26 = vpack.c.bf16 %v1704_v16, %v1704_v16 }
 0x3e3   : > { %v2268_v25 = vsub.f32 %v2267_v22, %v2266_v21  ;;  %2811 = vmatprep.mubr.msk.bf16.mxu1 %vm3165_vm0, %v3164_v0  ;;  %2803 = vmatprep.subr.bf16.mxu0 %v3164_v0  ;;  %v2949_v21 = vld [vmem:[%s3881_s15 + $0x8] sm:$0xff]  }
 0x3e4   : > { %2821 = vmatprep.subr.bf16.mxu1 %v3164_v0 }
 0x3e5   : > { %2794 = vmatmul.mubr.msk.bf16.vlgmr.msra.gmra.mrb[28].mxu0 %vm1445_vm6, %v1712_v23  ;;  %v2269_v24 = vsel %vm1445_vm6, %v2268_v25, 0.0 }
 0x3e6   : > { %2270 = vadd.xlane.f32.xlu0 %v2269_v24  ;;  %2805 = vmatprep.mubr.msk.bf16.mxu0 %vm3165_vm0, %v3164_v0 }
 0x3e9   : > { %2812 = vmatmul.mubr.msk.bf16.vlgmr.msra.gmra.mrb[32].mxu1 %vm1666_vm7, %v1904_v26  ;;  %v2950_v26 = vld [vmem:[%s3881_s15 + $0x10] sm:$0xff]  }
 0x3ea   : > { %2823 = vmatprep.mubr.msk.bf16.mxu1 %vm3165_vm0, %v3164_v0 }
 0x405   : > { %v1696_v27 = vpop.xlane.xlu1 %1695 }
 0x406   : > { %2978 = vrcp.f32 %v1696_v27  ;;  %v2951_v27 = vld [vmem:[%s3881_s15 + $0x18] sm:$0xff]  }
 0x409   : > { %v1702_v28 = vpop.xlane.xlu0 %1701  ;;  %v1699_v29 = vpop.xlane.xlu1 %1698 }
 0x40a   : > { %2980 = vrcp.f32 %v1702_v28 }
 0x40b   : > { %2982 = vrcp.f32 %v1699_v29 }
 0x40d   : > { %v1006_v30 = vpop.permute.xlu1 %1005 }
 0x40e   : > { %1011 = vst.msk [vmem:[#allocation3 + $0xc] sm:$0xf] %vm924_vm2, %v1006_v30 }
 0x410   : > { %v2979_v31 = vpop.eup %2978 }
 0x411   : > { %v1706_v32 = vmul.f32 %v2979_v31, %v3643_v39  ;;  %v1167_v33 = vpop.permute.xlu1 %1166  ;;  %v1714_v39 = vpack.c.bf16 %v3674_v1, %v3674_v1 }
 0x412   : > { %1176 = vst.msk [vmem:[#allocation5 + $0x4] sm:$0x7] %vm1091_vm3, %v1167_v33 }
 0x413   : > { %2246 = vst.msk [vmem:[%s3690_s18 + $0x8] sm:$0xff] %vm1666_vm7, %v1706_v32  ;;  %v1905_v47 = vpack.c.bf16 %v1706_v32, %v1706_v32 }
 0x414   : > { %v2981_v34 = vpop.eup %2980 }
 0x415   : > { %v2983_v35 = vpop.eup %2982  ;;  %v1710_v36 = vmul.f32 %v2981_v34, %v3649_v42  ;;  %v1170_v37 = vpop.permute.xlu1 %1169  ;;  %v1718_v38 = vld [vmem:[#allocation3 + $0xc] sm:$0xf] }
 0x416   : > { %v1708_v41 = vmul.f32 %v2983_v35, %v3645_v40  ;;  %1177 = vst.msk [vmem:[#allocation5 + $0x8] sm:$0x7] %vm1091_vm3, %v1170_v37  ;;  %v1862_v43 = vsel %vm1722_vm5, %v1718_v38, 0 }
 0x417   : > { %2248 = vst.msk [vmem:[%s3690_s18 + $0x18] sm:$0xff] %vm1666_vm7, %v1710_v36  ;;  %2804 = vmatpush3.bf16.msra.mxu0 %v1862_v43  ;;  %v1907_v49 = vpack.c.bf16 %v1710_v36, %v1710_v36 }
 0x418   : > { %2247 = vst.msk [vmem:[%s3690_s18 + $0x10] sm:$0xff] %vm1666_vm7, %v1708_v41  ;;  %2815 = vmatprep.subr.bf16.mxu0 %v3164_v0  ;;  %v1906_v48 = vpack.c.bf16 %v1708_v41, %v1708_v41  ;;  %s3780_s18 = scalar_lea.hbm %s3886_s20, %s2644_s19 }
 0x419   : > { %v1173_v44 = vpop.permute.xlu1 %1172  ;;  %v1909_v42 = vld [vmem:[#allocation5 + $0x4] sm:$0x7] }
 0x41a   : > { %1178 = vst.msk [vmem:[#allocation5 + $0xc] sm:$0x7] %vm1091_vm3, %v1173_v44  ;;  %2806 = vmatmul.mubr.msk.bf16.vlgmr.msra.gmra.mrb[32].mxu0 %vm1445_vm6, %v1714_v39  ;;  %v1963_v40 = vsel %vm1915_vm8, %v1909_v42, 0 }
 0x41b   : > { %2816 = vmatpush3.bf16.msra.mxu0 %v1963_v40  ;;  %2817 = vmatprep.mubr.msk.bf16.mxu0 %vm3165_vm0, %v3164_v0 }
 0x41c   : > { %2827 = vmatprep.subr.bf16.mxu0 %v3164_v0 }
 0x41d   : > { %v1910_v45 = vld [vmem:[#allocation5 + $0x8] sm:$0x7] }
 0x41e   : > { %v2009_v46 = vsel %vm1915_vm8, %v1910_v45, 0 }
 0x41f   : > { %2822 = vmatpush3.bf16.msra.mxu1 %v2009_v46 }
 0x420   : > { %2833 = vmatprep.subr.bf16.mxu1 %v3164_v0 }
 0x421   : > { %v1911_v50 = vld [vmem:[#allocation5 + $0xc] sm:$0x7] }
 0x422   : > { %2818 = vmatmul.mubr.msk.bf16.vlgmr.msra.gmra.mrb[36].mxu0 %vm1666_vm7, %v1905_v47  ;;  %2824 = vmatmul.mubr.msk.bf16.vlgmr.msra.gmra.mrb[36].mxu1 %vm1666_vm7, %v1906_v48  ;;  %v2055_v51 = vsel %vm1915_vm8, %v1911_v50, 0 }
 0x423   : > { %2828 = vmatpush3.bf16.msra.mxu0 %v2055_v51  ;;  %2829 = vmatprep.mubr.msk.bf16.mxu0 %vm3165_vm0, %v3164_v0 }
 0x424   : > { %2841 = vmatprep.mubr.msk.bf16.mxu1 %vm3165_vm0, %v3164_v0  ;;  %2834 = vmatpush3.bf16.msra.mxu1 %v2948_v63 }
 0x425   : > { %2835 = vmatprep.subr.bf16.mxu1 %v3164_v0 }
 0x428   : > { %2836 = vmatpush3.bf16.msra.mxu1 %v2949_v21 }
 0x429   : > { %2837 = vmatprep.subr.bf16.mxu1 %v3164_v0 }
 0x42a   : > { %2830 = vmatmul.mubr.msk.bf16.vlgmr.msra.gmra.mrb[40].mxu0 %vm1666_vm7, %v1907_v49 }
 0x42c   : > { %2838 = vmatpush3.bf16.msra.mxu1 %v2950_v26 }
 0x42d   : > { %2839 = vmatprep.subr.bf16.mxu1 %v3164_v0 }
 0x430   : > { %2840 = vmatpush3.bf16.msra.mxu1 %v2951_v27 }
 0x439   : > { %v1760_v52 = vpop.f32.mrb[24].mxu1 }
 0x43a   : > { %v2789_v53 = vpop.f32.mrb[25].mxu1  ;;  %v2097_v15 = vmul.f32 0.5, %v1760_v52 }
 0x43b   : > { %v1763_v56 = vpop.f32.mrb[26].mxu1 }
 0x43c   : > { %v2790_v54 = vpop.f32.mrb[27].mxu1 }
 0x43d   : > { %v2628_v54 = vld [vmem:[%s3882_s16] ss:$0 sm:$0xff] }
 0x473   : > { %v2271_v55 = vpop.xlane.xlu0 %2270 }
 0x474   : > { %v2272_v57 = vrot.slane %v2271_v55, 4 }
 0x476   : > { %v2273_v58 = vadd.f32 %v2272_v57, %v2271_v55 }
 0x478   : > { %v2274_v59 = vrot.slane %v2273_v58, 2 }
 0x47a   : > { %v2275_v60 = vadd.f32 %v2274_v59, %v2273_v58 }
 0x47c   : > { %v2276_v61 = vrot.slane %v2275_v60, 1 }
 0x47e   : > { %v2277_v62 = vadd.f32 %v2276_v61, %v2275_v60 }
 0x480   : > { %2845 = vpush %v2277_v62 }
 0x4b1   : > { %s2846_s4 = spop %2845 }
 0x4b2   : > { %v2279_v1 = vstv %s2846_s4 }
 0x4b3   : > { %v2280_v3 = vmax.f32 %v2279_v1, 0.0 }
 0x4b4   : > { %v1852_v4 = vpop.f32.mrb[28].mxu1 }
 0x4b5   : > { %v2287_v5 = vadd.f32 %v2286_v2, %v2280_v3  ;;  %v2801_v6 = vpop.f32.mrb[29].mxu1  ;;  %v2099_v30 = vmul.f32 0.5, %v1852_v4 }
 0x4b6   : > { %v1855_v7 = vpop.f32.mrb[30].mxu1 }
 0x4b7   : > { %2289 = vst.msk [vmem:[%s838_s24] sm:$0x1] %vm2284_vm9, %v2287_v5  ;;  %v2802_v8 = vpop.f32.mrb[31].mxu1  ;;  %s3170_s24 = smov 32  }
 0x4b8   : > { %v1806_v9 = vpop.f32.mrb[28].mxu0 }
 0x4b9   : > { %v2795_v10 = vpop.f32.mrb[29].mxu0  ;;  %v2098_v31 = vmul.f32 0.5, %v1806_v9 }
 0x4ba   : > { %v1809_v11 = vpop.f32.mrb[30].mxu0 }
 0x4bb   : > { %v2796_v12 = vpop.f32.mrb[31].mxu0 }
 0x4bc   : > { %v1953_v14 = vpop.f32.mrb[32].mxu1 }
 0x4bd   : > { %v2101_v16 = vmul.f32 0.5, %v1953_v14  ;;  %v2813_v17 = vpop.f32.mrb[33].mxu1 }
 0x4be   : > { %v1956_v18 = vpop.f32.mrb[34].mxu1 }
 0x4bf   : > { %v2105_v19 = vadd.f32 %v2101_v16, %v2097_v15  ;;  %v2814_v20 = vpop.f32.mrb[35].mxu1 }
 0x4ed   : > { %v1898_v22 = vpop.f32.mrb[32].mxu0 }
 0x4ee   : > { %v2807_v23 = vpop.f32.mrb[33].mxu0  ;;  %v2100_v44 = vmul.f32 0.5, %v1898_v22 }
 0x4ef   : > { %v1901_v25 = vpop.f32.mrb[34].mxu0 }
 0x4f0   : > { %v2808_v24 = vpop.f32.mrb[35].mxu0 }
 0x4f5   : > { %v1999_v28 = vpop.f32.mrb[36].mxu0  ;;  %v2045_v29 = vpop.f32.mrb[36].mxu1 }
 0x4f6   : > { %v2102_v32 = vmul.f32 0.5, %v1999_v28  ;;  %v2103_v33 = vmul.f32 0.5, %v2045_v29  ;;  %v2819_v34 = vpop.f32.mrb[37].mxu0  ;;  %v2825_v35 = vpop.f32.mrb[37].mxu1 }
 0x4f7   : > { %v2002_v36 = vpop.f32.mrb[38].mxu0  ;;  %v2048_v37 = vpop.f32.mrb[38].mxu1 }
 0x4f8   : > { %v2106_v38 = vadd.f32 %v2102_v32, %v2098_v31  ;;  %v2107_v41 = vadd.f32 %v2103_v33, %v2099_v30  ;;  %v2820_v43 = vpop.f32.mrb[39].mxu0  ;;  %v2826_v39 = vpop.f32.mrb[39].mxu1 }
 0x4fa   : > { %2110 = vrot.lane.b32.xlu1 %v2106_v38, %s3169_s27  ;;  %s3042_s27 = scalar_lea.vmem %s3775_s1, 512 }
 0x4fb   : > { %p3043_p13 = scmp.ne.s32.totalorder %s3775_s1, %s3042_s27 }
 0x4fd   : > { %v2091_v0 = vpop.f32.mrb[40].mxu0  ;;  %p3044_p10 = pnand %p3043_p13, %p3934_p8 }
 0x4fe   : > { %v2104_v42 = vmul.f32 0.5, %v2091_v0  ;;  %2114 = vrot.lane.b32.xlu1 %v2107_v41, %s3170_s24  ;;  %v2831_v40 = vpop.f32.mrb[41].mxu0  ;;  %s3172_s24 = smov [#allocation12]  }
 0x4ff   : > { %v2094_v45 = vpop.f32.mrb[42].mxu0  ;;  %p3045_p11 = pneg %p3044_p10 }
 0x500   : > { %v2108_v46 = vadd.f32 %v2104_v42, %v2100_v44  ;;  %v2832_v47 = vpop.f32.mrb[43].mxu0 }
 0x502   : > { %2118 = vrot.lane.b32.xlu1 %v2108_v46, %s3171_s29  ;;  %s3046_s29 = sshll.u32 %s3172_s24, 4  ;;  %s3047_s29 = int_to_ptr.vmem [resolvable:$false] %s3046_s29 }
 0x503   : > { %s3048_s0 = scalar_lea.vmem %s3047_s29, 1024  ;;  %p3049_p2 = scmp.lt.s32.totalorder %s3775_s1, %s3047_s29 }
 0x504   : > { %p3050_p3 = scmp.lt.s32.totalorder %s3048_s0, %s3042_s27 }
 0x506   : > { %p3051_p5 = por %p3050_p3, %p3049_p2 }
 0x508   : > { %p3052_p6 = pnand %p3051_p5, %p3045_p11 }
 0x56c   : > { %v2111_v48 = vpop.permute.xlu1 %2110 }
 0x56d   : > { %v2121_v51 = vsel %vm1260_vm4, %v2105_v19, %v2111_v48 }
 0x570   : > { %v2115_v50 = vpop.permute.xlu1 %2114 }
 0x571   : > { %v2122_v49 = vsel %vm869_vm1, %v2121_v51, %v2115_v50 }
 0x574   : > { %v2119_v52 = vpop.permute.xlu1 %2118 }
 0x575   : > { %v2124_v53 = vsel %vm2123_vm10, %v2122_v49, %v2119_v52 }
 0x576   : > { %v2125_v56 = vpack.c.bf16 %v2124_v53, %v2124_v53 }
 0x578   : > { %2842 = vmatmul.mubr.msk.bf16.vlgmr.msra.gmra.mrb[40].mxu1 %vm2165_vm11, %v2125_v56 }
 0x64b   : > { %v2203_v55 = vpop.f32.mrb[40].mxu1 }
 0x64c   : > { %v2204_v57 = vadd.f32 %v2628_v54, %v2203_v55  ;;  %v2843_v58 = vpop.f32.mrb[41].mxu1 }
 0x64d   : > { %v2206_v59 = vpop.f32.mrb[42].mxu1 }
 0x64e   : > { %v2844_v60 = vpop.f32.mrb[43].mxu1  ;;  %v2209_v61 = vadd.f32 %v2204_v57, %v3483_v13 }
 0x650   : > { %v2210_v62 = vsel %vm869_vm1, %v2209_v61, 0.0 }
 0x651   : > { %2211 = vadd.xlane.f32.xlu1 %v2210_v62 }
 0x6de   : > { %v2212_v63 = vpop.xlane.xlu1 %2211 }
 0x6df   : > { %v2214_v1 = vmul.f32 0.03125, %v2212_v63 }
 0x6e1   : > { %v2215_v2 = vsub.f32 %v2209_v61, %v2214_v1 }
 0x6e3   : > { %v2216_v3 = vmul.f32 %v2215_v2, %v2215_v2 }
 0x6e5   : > { %v2217_v4 = vsel %vm869_vm1, %v2216_v3, 0.0 }
 0x6e6   : > { %2218 = vadd.xlane.f32.xlu0 %v2217_v4 }
 0x6e7   : > { %3055 = shalt.err (!%p3052_p6)
}
 0x6e8   : > { %s3056_s5 = scalar_lea.hbm %s3780_s18, 512  ;;  %s3060_s3 = scalar_lea.hbm %s3886_s20, 1024 }
 0x6e9   : > { %p3057_p7 = scmp.ne.s32.totalorder %s3780_s18, %s3056_s5  ;;  %p3061_p0 = scmp.lt.u32.totalorder %s3780_s18, %s3886_s20 }
 0x6ea   : > { %p3062_p1 = scmp.lt.u32.totalorder %s3060_s3, %s3056_s5  ;;  %p3064_p13 = scmp.lt.u32.totalorder %s3056_s5, %s3780_s18 }
 0x6eb   : > { %p3058_p9 = pnand %p3057_p7, %p3934_p8 }
 0x6ec   : > { %p3063_p4 = por %p3062_p1, %p3061_p0 }
 0x6ed   : > { %p3059_p12 = pneg %p3058_p9 }
 0x6ee   : > { %p3065_p10 = por %p3064_p13, %p3063_p4 }
 0x6f0   : > { %p3066_p11 = pnand %p3065_p10, %p3059_p12 }
 0x6f2   : > { %3069 = shalt.err (!%p3066_p11)
}
 0x6f3   : > { %s3173_s27 = smov 128   ;;  %s3174_s29 = smov 8   ;;  %v2634_v8 = vld [vmem:[%s3883_s17] ss:$0 sm:$0xff] }
 0x6f4   : > { %2856 = dma.vmem_to_hbm [thread:$0]  (%p3934_p8), %s3775_s1, 512, %s3780_s18, %s2296_s2, %s3173_s27, %s3173_s27, %s3174_s29  }
 0x6f5   : > { %s2583_s0 = sshll.u32 %s3628_s23, 3  ;;  %s3935_s25 = sld [smem:[#allocation33_spill]] }
 0x6f6   : > { %s2638_s24 = sshll.u32 %s3152_s30, 7  ;;  %s782_s7 = scalar_lea.vmem [#allocation11], %s2583_s0 }
 0x6f7   : > { %s2321_s1 = sshll.u32 %s782_s7, 4  ;;  %s3936_s27 = sld [smem:[#allocation34_spill]]  ;;  %s3819_s1 = int_to_ptr.vmem [resolvable:$true] %s2321_s1 }
 0x6f8   : > { %s2291_s5 = scalar_lea.sflag [#allocation8], %s3628_s23  ;;  %s3070_s4 = scalar_lea.vmem %s3819_s1, 128 }
 0x6f9   : > { %p3071_p2 = scmp.ne.s32.totalorder %s3819_s1, %s3070_s4  ;;  %s3175_s30 = smov [#allocation11]  }
 0x6fa   : > { %s3074_s0 = sshll.u32 %s3175_s30, 4  ;;  %s3075_s0 = int_to_ptr.vmem [resolvable:$false] %s3074_s0 }
 0x6fb   : > { %v2635_v10 = vld [vmem:[%s3935_s25] ss:$0 sm:$0xff]  ;;  %p3072_p3 = pnand %p3071_p2, %p3934_p8  ;;  %s3076_s19 = scalar_lea.vmem %s3075_s0, 256 }
 0x6fc   : > { %p3077_p6 = scmp.lt.s32.totalorder %s3819_s1, %s3075_s0  ;;  %p3078_p7 = scmp.lt.s32.totalorder %s3076_s19, %s3070_s4 }
 0x6fd   : > { %s3817_s29 = scalar_lea.hbm %s3936_s27, %s2638_s24  ;;  %p3073_p5 = pneg %p3072_p3 }
 0x6fe   : > { %p3079_p9 = por %p3078_p7, %p3077_p6 }
 0x700   : > { %p3080_p12 = pnand %p3079_p9, %p3073_p5 }
 0x773   : > { %v2219_v13 = vpop.xlane.xlu0 %2218 }
 0x774   : > { %v2220_v5 = vmul.f32 0.03125, %v2219_v13 }
 0x776   : > { %v2221_v6 = vadd.f32 1e-05, %v2220_v5 }
 0x778   : > { %2984 = vrsqrt.f32 %v2221_v6 }
 0x782   : > { %v2985_v7 = vpop.eup %2984 }
 0x783   : > { %v2223_v9 = vmul.f32 %v2985_v7, %v2215_v2 }
 0x785   : > { %v2231_v11 = vmul.f32 %v2634_v8, %v2223_v9 }
 0x787   : > { %v2239_v12 = vadd.f32 %v2635_v10, %v2231_v11 }
 0x789   : > { %2240 = vst.msk [vmem:[%s782_s7] sm:$0xff] %vm869_vm1, %v2239_v12 }
 0x78a   : > { %3083 = shalt.err (!%p3080_p12)
}
 0x78b   : > { %s3084_s7 = scalar_lea.hbm %s3817_s29, 128  ;;  %s3088_s25 = scalar_lea.hbm %s3936_s27, 256 }
 0x78c   : > { %p3085_p0 = scmp.ne.s32.totalorder %s3817_s29, %s3084_s7  ;;  %p3089_p13 = scmp.lt.u32.totalorder %s3817_s29, %s3936_s27 }
 0x78d   : > { %p3090_p10 = scmp.lt.u32.totalorder %s3088_s25, %s3084_s7  ;;  %p3092_p2 = scmp.lt.u32.totalorder %s3084_s7, %s3817_s29 }
 0x78e   : > { %p3086_p1 = pnand %p3085_p0, %p3934_p8 }
 0x78f   : > { %p3091_p11 = por %p3090_p10, %p3089_p13 }
 0x790   : > { %p3087_p4 = pneg %p3086_p1 }
 0x791   : > { %p3093_p3 = por %p3092_p2, %p3091_p11 }
 0x793   : > { %p3094_p5 = pnand %p3093_p3, %p3087_p4 }
 0x795   : > { %3097 = shalt.err (!%p3094_p5)
}
 0x796   : > { %2855 = dma.vmem_to_hbm [thread:$0]  (%p3934_p8), %s3819_s1, 128, %s3817_s29, %s2291_s5  }
 0x797 PF: > { %s3937_s2 = sld [smem:[#allocation21_spill]]  ;;  %s3938_s4 = sld [smem:[#allocation18_spill]] }
 0x798   : > { %s3939_s30 = sld [smem:[#allocation23_spill]] }
 0x79d   : > { %p2877_p6 = scmp.ge.s32.totalorder %s3937_s2, 2  ;;  %s2356_s0 = sand.u32 1, %s3938_s4  }
 0x79e   : > { %p3940_p7 = scmp.ne.s32.totalorder %s3939_s30, 0  ;;  %s2357_s19 = scalar_lea.sflag [#allocation8], %s2356_s0 }
 0x7a0   : > { %p2867_p9 = pnand %p2877_p6, %p3940_p7 }
 0x7a2   : > { %3131 = dma.done.wait (!%p2867_p9), %s2357_s19, 128  }
 0x7a3   : > { %3133 = vsyncadd (!%p2867_p9), %s2357_s19, 4294967168  ;;  %s2366_s7 = scalar_lea.sflag [#allocation13], %s2356_s0 }
 0x7a4   : > { %3135 = dma.done.wait (!%p2867_p9), %s2366_s7, 512  }
 0x7a5   : > { %3137 = vsyncadd (!%p2867_p9), %s2366_s7, 4294966784  ;;  %s41_s0 = sadd.s32 1, %s3937_s2   ;;  %s3941_s6 = sld [smem:[#allocation19_spill]] }
 0x7a6   : > { %p38_p12 = scmp.ge.s32.totalorder %s41_s0, 4   ;;  %s3942_s29 = sld [smem:[#allocation24_spill]] }
 0x7a7   : > { %s3943_s30 = sld [smem:[#allocation20_spill]]  ;;  %s3944_s4 = sld [smem:[#allocation22_spill]] }
 0x7a8   : > { %s3945_s3 = smov %s3144_s28  ;;  %40 = sbr.rel (!%p38_p12) target bundleno = 19 (0x13), region = 201 }
 0x7ab   : > { %s3946_s28 = smov %s3941_s6 }
 0x7af   :  { %2388 = vsyncpa [#allocation7], 1 }
 0x7b0   :  { %2390 = vsyncpa [#allocation7 + $0x1], 1 }
 0x7b1   :  { %2391 = vsyncpa [#allocation10], 1 }
 0x7b2   :  { %2392 = vsyncpa [#allocation8], 1 }
 0x7b3   :  { %2394 = vsyncpa [#allocation8 + $0x1], 1 }
 0x7b4   :  { %2395 = vsyncpa [#allocation13], 1 }
 0x7b5   :  { %2397 = vsyncpa [#allocation13 + $0x1], 1 }

</bundles_post_ra>
